<compile_context>
chip_gen: v6e
topology: v6e:2x2x1
jax: 0.10.0
libtpu: 0.0.40
codegen_flags: <defaults>
</compile_context>

<pallas_src>
import functools

import jax
import jax.numpy as jnp
from jax.experimental import pallas as pl
from jax.experimental.pallas import tpu as pltpu

# ----- config (mirrors the DictConfig fields used by STEncoder / RNNLayer) ---
EMBED_SIZE = 32      # config.embed_size
HIDDEN_SIZE = 32     # config.rnn.hidden_size
NUM_LAYERS = 2       # config.rnn.num_layers
USE_BI = True        # config.rnn.use_bi
PAD_IDX = 0
VOCAB_SIZE = 64
# Projection-matmul operand dtype.  Set to jnp.bfloat16 on v6e/v7x (halves the
# VMEM footprint of the folded [V, 8H] table and doubles MXU throughput on the
# hoisted projections); keep float32 on v5e (no bf16 VALU) and for tight
# agreement with the f32 reference check below.
MATMUL_DTYPE = jnp.float32

# TODO(synk): w2v weight loading (__add_w2v_weights) is a checkpoint load, skipped.
# TODO(synk): training-mode dropout not implemented (eval-mode identity only).
# TODO(synk): stage whh on the MXU once per layer (pltpu.matmul_push_rhs /
#             matmul_acc_lhs / matmul_pop) instead of re-pushing the [2H,8H]
#             RHS every recurrence step, after checking in the bundle dump
#             whether Mosaic already hoists the push.
# TODO(synk): at production V / N, keep the embedding table in HBM
#             (memory_space=pl.ANY) with a scalar-prefetched row gather, and
#             tile a grid over node blocks with dimension_semantics=
#             ("parallel",) so v7x's two TensorCores split the batch; at the
#             test shapes (N=6, V=64) a grid/DMA gather is pure overhead.
#             Caller-side: batch as many nodes as VMEM allows into one call
#             (the recurrence cost is independent of N until N ~ 128 rows).


# ------------------------------ fused kernel ---------------------------------
def _st_encoder_kernel(*refs, n, t, h, v, num_layers):
    """refs = (seq, lens, [wx, whh, b] * num_layers, out, gx_scr, xhid_scr).

    Gate layout (width 8H): 4 gate blocks [i|f|g|o], each block = [fwd H | bwd H].
    Hidden/cell state layout (width 2H): [fwd H | bwd H].
    """
    seq_ref, lens_ref = refs[0], refs[1]
    w_refs = refs[2:2 + 3 * num_layers]
    out_ref = refs[2 + 3 * num_layers]
    gx_scr, xhid_scr = refs[3 + 3 * num_layers:]

    g2 = 2 * h                      # per-gate block width (fwd | bwd)
    g8 = 8 * h                      # combined gate width (256 lanes)

    lens = lens_ref[...]            # [N, 1] int32

    # ---- static lane masks, hoisted out of all loops -------------------------
    lane8 = jax.lax.broadcasted_iota(jnp.int32, (1, g8), 1)
    fwd_lane = (lane8 % g2) < h                       # fwd half of each gate block
    lane2 = jax.lax.broadcasted_iota(jnp.int32, (1, g2), 1)
    lane4 = jax.lax.broadcasted_iota(jnp.int32, (1, 2 * g2), 1)
    g_lane = lane4 < g2                               # g-half of the [g|o] vreg pair
    # lane masks for the merged inter-layer scratch stores (full-width, no
    # lane rotation of the value)
    fwd_keep = jnp.broadcast_to(lane2 < h, (n, g2))
    bwd_keep = jnp.logical_not(fwd_keep)

    # ---- per-step validity masks, computed ONCE and shared by both layers ----
    valid_masks = []
    for s in range(t):
        t_both = jnp.where(lane2 < h, s, t - 1 - s)   # [1, 2H] constant
        valid_masks.append(lens > t_both)             # [N, 2H]

    h_sum = jnp.zeros((n, h), jnp.float32)

    for layer in range(num_layers):
        wx_ref, whh_ref, b_ref = w_refs[3 * layer:3 * layer + 3]
        last_layer = layer == num_layers - 1
        mm_dtype = wx_ref.dtype

        # ---- hoisted input projection + bias for ALL timesteps (bulk MXU) ----
        if layer == 0:
            # embedding folded into W_ih: onehot(ids) @ (table @ W_ih)
            ids = seq_ref[...]                                       # [T*N, 1]
            onehot = (ids == jax.lax.broadcasted_iota(jnp.int32, (t * n, v), 1)
                      ).astype(mm_dtype)
            gx_scr[...] = (jnp.dot(onehot, wx_ref[...],
                                   preferred_element_type=jnp.float32)
                           + b_ref[...])
        else:
            # single contiguous [T*N, 2H] slab (merged fwd|bwd), no concat
            x_prev = xhid_scr[...].astype(mm_dtype)
            gx_scr[...] = (jnp.dot(x_prev, wx_ref[...],
                                   preferred_element_type=jnp.float32)
                           + b_ref[...])

        # ---- direction-align gx in place (bulk pre-pass, off the recurrence
        #      chain): after this, row s holds fwd gates @ s in the fwd lanes
        #      and bwd gates @ T-1-s in the bwd lanes.
        for s in range((t + 1) // 2):
            sb = t - 1 - s
            if sb == s:
                continue
            row_a = gx_scr[pl.ds(s * n, n), :]
            row_b = gx_scr[pl.ds(sb * n, n), :]
            gx_scr[pl.ds(s * n, n), :] = jnp.where(fwd_lane, row_a, row_b)
            gx_scr[pl.ds(sb * n, n), :] = jnp.where(fwd_lane, row_b, row_a)

        whh = whh_ref[...]          # [2H, 8H] block-diagonal per gate block
        hcat = jnp.zeros((n, g2), jnp.float32)   # [fwd h | bwd h]
        ccat = jnp.zeros((n, g2), jnp.float32)

        for s in range(t):          # static trip count -> fully unrolled
            t_f = s                 # forward-direction time index
            t_b = t - 1 - s         # reverse-direction time index
            # critical path: one row load + one [N,2H]x[2H,8H] matmul + VPU
            gates = gx_scr[pl.ds(s * n, n), :] + jnp.dot(
                hcat, whh, preferred_element_type=jnp.float32)
            # 128-lane-aligned activations: sigmoid over [i|f], tanh/sigmoid +
            # static lane select over [g|o] (EUP slot is far from saturated)
            if_act = jax.nn.sigmoid(gates[:, 0:2 * g2])
            go_pre = gates[:, 2 * g2:4 * g2]
            go_act = jnp.where(g_lane, jnp.tanh(go_pre), jax.nn.sigmoid(go_pre))
            i_g = if_act[:, 0:g2]
            f_g = if_act[:, g2:2 * g2]
            g_g = go_act[:, 0:g2]
            o_g = go_act[:, g2:2 * g2]
            c_new = f_g * ccat + i_g * g_g
            h_new = o_g * jnp.tanh(c_new)
            # packed-sequence semantics: hold state once t >= length
            valid = valid_masks[s]                    # precomputed, shared
            ccat = jnp.where(valid, c_new, ccat)
            hcat = jnp.where(valid, h_new, hcat)
            if not last_layer:
                # next layer's time-indexed input, kept in VMEM; lane-masked
                # stores keep values at their native lanes (no rotation) and
                # sit off the recurrence dependency chain
                pltpu.store(xhid_scr.at[pl.ds(t_f * n, n), :], hcat,
                            mask=fwd_keep)
                pltpu.store(xhid_scr.at[pl.ds(t_b * n, n), :], hcat,
                            mask=bwd_keep)

        # h_n contribution of this layer (forward + reverse final hidden)
        h_sum = h_sum + hcat[:, 0:h] + hcat[:, h:g2]

    out_ref[...] = h_sum


# ---------------------------- parameter handling ------------------------------
def init_params(key):
    """PyTorch-layout parameters (nn.Embedding + nn.LSTM, bidirectional)."""
    params = {}
    key, k_emb = jax.random.split(key)
    # xavier_uniform_ over the whole table (pad row included, as in the module)
    bound = (6.0 / (VOCAB_SIZE + EMBED_SIZE)) ** 0.5
    params["embedding"] = jax.random.uniform(
        k_emb, (VOCAB_SIZE, EMBED_SIZE), jnp.float32, -bound, bound)

    num_dirs = 2 if USE_BI else 1
    k = 1.0 / (HIDDEN_SIZE ** 0.5)
    layers = []
    for layer in range(NUM_LAYERS):
        in_size = EMBED_SIZE if layer == 0 else HIDDEN_SIZE * num_dirs
        dirs = []
        for _ in range(num_dirs):
            key, k1, k2, k3, k4 = jax.random.split(key, 5)
            dirs.append({
                "wih": jax.random.uniform(k1, (4 * HIDDEN_SIZE, in_size),
                                          jnp.float32, -k, k),
                "whh": jax.random.uniform(k2, (4 * HIDDEN_SIZE, HIDDEN_SIZE),
                                          jnp.float32, -k, k),
                "b_ih": jax.random.uniform(k3, (4 * HIDDEN_SIZE,), jnp.float32, -k, k),
                "b_hh": jax.random.uniform(k4, (4 * HIDDEN_SIZE,), jnp.float32, -k, k),
            })
        layers.append(dirs)
    params["lstm"] = layers
    return params


def _interleave_gate_major(wf, wb, h):
    """[rows, 4H] fwd + [rows, 4H] bwd -> [rows, 8H] = [i_f i_b|f_f f_b|g_f g_b|o_f o_b]."""
    rows = wf.shape[0]
    return jnp.concatenate([wf.reshape(rows, 4, h), wb.reshape(rows, 4, h)],
                           axis=2).reshape(rows, 8 * h)


def _blockdiag_gate_major(whh_f_t, whh_b_t, h):
    """[H, 4H] fwd + [H, 4H] bwd -> [2H, 8H] so [h_f | h_b] @ W gives combined gates."""
    z = jnp.zeros((h, 4, h), jnp.float32)
    top = jnp.concatenate([whh_f_t.reshape(h, 4, h), z], axis=2).reshape(h, 8 * h)
    bot = jnp.concatenate([z, whh_b_t.reshape(h, 4, h)], axis=2).reshape(h, 8 * h)
    return jnp.concatenate([top, bot], axis=0)


def pack_params(params):
    """Build fused fwd+bwd weight tiles; fold the embedding table into layer 0."""
    assert USE_BI, "fused kernel assumes the bidirectional config (use_bi=True)"
    h = HIDDEN_SIZE
    packed = []
    for layer_idx, dirs in enumerate(params["lstm"]):
        pf, pb = dirs[0], dirs[1]
        wx = _interleave_gate_major(pf["wih"].T, pb["wih"].T, h)      # [in, 8H]
        if layer_idx == 0:
            wx = jnp.dot(params["embedding"], wx)                     # [V, 8H]
        wx = wx.astype(MATMUL_DTYPE)                                  # bf16 on v6e/v7x
        whh = _blockdiag_gate_major(pf["whh"].T, pb["whh"].T, h)      # [2H, 8H] f32
        bias = _interleave_gate_major((pf["b_ih"] + pf["b_hh"])[None, :],
                                      (pb["b_ih"] + pb["b_hh"])[None, :], h)  # [1, 8H]
        packed.append((wx, whh, bias))
    return packed


# ------------------------------- forward --------------------------------------
@jax.jit
def st_encoder_forward(seq, packed_layers):
    """seq: [n nodes, max parts] int32 token ids -> [n nodes, hidden]."""
    n, t = seq.shape
    h = HIDDEN_SIZE
    n_pad = max(8, ((n + 7) // 8) * 8)          # sublane multiple

    # first_pad_pos semantics from RNNLayer (first pad position, else seq len)
    is_pad = (seq == PAD_IDX)
    has_pad = jnp.any(is_pad, axis=1)
    first_pad = jnp.argmax(is_pad.astype(jnp.int32), axis=1)
    lens = jnp.where(has_pad, first_pad, t).astype(jnp.int32)

    seq_p = jnp.full((n_pad, t), PAD_IDX, jnp.int32).at[:n].set(seq.astype(jnp.int32))
    lens_p = jnp.zeros((n_pad, 1), jnp.int32).at[:n, 0].set(lens)   # pad rows: len 0
    seq_tm = seq_p.T.reshape(t * n_pad, 1)                          # time-major ids

    flat_w = [w for layer in packed_layers for w in layer]
    num_layers = len(packed_layers)
    v = packed_layers[0][0].shape[0]

    kernel = functools.partial(_st_encoder_kernel, n=n_pad, t=t, h=h, v=v,
                               num_layers=num_layers)
    out = pl.pallas_call(
        kernel,
        out_shape=jax.ShapeDtypeStruct((n_pad, h), jnp.float32),
        in_specs=[pl.BlockSpec(memory_space=pltpu.MemorySpace.VMEM)]
                 * (2 + 3 * num_layers),
        out_specs=pl.BlockSpec(memory_space=pltpu.MemorySpace.VMEM),
        scratch_shapes=[pltpu.VMEM((t * n_pad, 8 * h), jnp.float32),   # gates_x
                        pltpu.VMEM((t * n_pad, 2 * h), jnp.float32)],  # fwd|bwd hseq
    )(seq_tm, lens_p, *flat_w)
    return out[:n]


# --------------------------- pure-JAX reference --------------------------------
def st_encoder_reference(seq, params):
    n, t = seq.shape
    h = HIDDEN_SIZE
    is_pad = (seq == PAD_IDX)
    has_pad = jnp.any(is_pad, axis=1)
    first_pad = jnp.argmax(is_pad.astype(jnp.int32), axis=1)
    lens = jnp.where(has_pad, first_pad, t).astype(jnp.int32)

    x = params["embedding"][seq]                      # [n, t, E]
    h_sum = jnp.zeros((n, h), jnp.float32)
    for dirs in params["lstm"]:
        outs = []
        for d, p in enumerate(dirs):
            reverse = d == 1
            hh = jnp.zeros((n, h), jnp.float32)
            cc = jnp.zeros((n, h), jnp.float32)
            seq_h = [None] * t
            order = range(t - 1, -1, -1) if reverse else range(t)
            for tt in order:
                gates = (x[:, tt, :] @ p["wih"].T + hh @ p["whh"].T
                         + p["b_ih"] + p["b_hh"])
                i_g = jax.nn.sigmoid(gates[:, 0 * h:1 * h])
                f_g = jax.nn.sigmoid(gates[:, 1 * h:2 * h])
                g_g = jnp.tanh(gates[:, 2 * h:3 * h])
                o_g = jax.nn.sigmoid(gates[:, 3 * h:4 * h])
                c_new = f_g * cc + i_g * g_g
                h_new = o_g * jnp.tanh(c_new)
                valid = (tt < lens)[:, None]
                hh = jnp.where(valid, h_new, hh)
                cc = jnp.where(valid, c_new, cc)
                seq_h[tt] = hh
            h_sum = h_sum + hh
            outs.append(jnp.stack(seq_h, axis=1))
        x = jnp.concatenate(outs, axis=-1)
    return h_sum


# -------------------------------- main ----------------------------------------
if __name__ == "__main__":
    params = init_params(jax.random.PRNGKey(0))
    packed = pack_params(params)

    n_nodes, max_parts = 6, 8
    k_tok, k_len = jax.random.split(jax.random.PRNGKey(1))
    tokens = jax.random.randint(k_tok, (n_nodes, max_parts), 1, VOCAB_SIZE,
                                dtype=jnp.int32)
    lengths = jax.random.randint(k_len, (n_nodes,), 1, max_parts + 1,
                                 dtype=jnp.int32)
    pos = jnp.arange(max_parts)[None, :]
    seq = jnp.where(pos < lengths[:, None], tokens, PAD_IDX).astype(jnp.int32)

    out = st_encoder_forward(seq, packed)
    jax.block_until_ready(out)
    assert out.shape == (n_nodes, HIDDEN_SIZE)

    ref = st_encoder_reference(seq, params)
    tol = 2e-3 if MATMUL_DTYPE == jnp.float32 else 1e-2
    assert jnp.allclose(out, ref, atol=tol, rtol=tol), \
        float(jnp.max(jnp.abs(out - ref)))
    print("KERNEL_OK")
</pallas_src>

<mosaic_0001>
module attributes {stable_mosaic.version = 11 : i64} {
  func.func @_st_encoder_kernel(%arg0: memref<64x1xi32, #tpu.memory_space<vmem>>, %arg1: memref<8x1xi32, #tpu.memory_space<vmem>>, %arg2: memref<64x256xf32, #tpu.memory_space<vmem>>, %arg3: memref<64x256xf32, #tpu.memory_space<vmem>>, %arg4: memref<1x256xf32, #tpu.memory_space<vmem>>, %arg5: memref<64x256xf32, #tpu.memory_space<vmem>>, %arg6: memref<64x256xf32, #tpu.memory_space<vmem>>, %arg7: memref<1x256xf32, #tpu.memory_space<vmem>>, %arg8: memref<8x32xf32, #tpu.memory_space<vmem>>, %arg9: memref<64x256xf32, #tpu.memory_space<vmem>>, %arg10: memref<64x64xf32, #tpu.memory_space<vmem>>) attributes {dimension_semantics = [], scalar_prefetch = 0 : i64, scratch_operands = 2 : i64, tpu.core_type = #tpu.core_type<tc>} {
    %c0 = arith.constant 0 : index
    %c0_0 = arith.constant 0 : index
    %0 = vector.load %arg1[%c0, %c0_0] : memref<8x1xi32, #tpu.memory_space<vmem>>, vector<8x1xi32>
    %1 = tpu.iota {dimensions = array<i32: 1>} : vector<1x256xi32>
    %c64_i32 = arith.constant 64 : i32
    %c0_i32 = arith.constant 0 : i32
    %2 = arith.cmpi eq, %c64_i32, %c0_i32 : i32
    %c1_i32 = arith.constant 1 : i32
    %3 = arith.select %2, %c1_i32, %c64_i32 : i32
    %4 = vector.broadcast %3 : i32 to vector<1x256xi32>
    %5 = arith.remsi %1, %4 : vector<1x256xi32>
    %c0_i32_1 = arith.constant 0 : i32
    %6 = vector.broadcast %c0_i32_1 : i32 to vector<1x256xi32>
    %7 = arith.cmpi ne, %5, %6 : vector<1x256xi32>
    %c0_i32_2 = arith.constant 0 : i32
    %8 = vector.broadcast %c0_i32_2 : i32 to vector<1x256xi32>
    %9 = arith.cmpi slt, %5, %8 : vector<1x256xi32>
    %c0_i32_3 = arith.constant 0 : i32
    %10 = arith.cmpi slt, %3, %c0_i32_3 : i32
    %11 = vector.broadcast %10 : i1 to vector<1x256xi1>
    %12 = vector.broadcast %11 : vector<1x256xi1> to vector<1x256xi1>
    %13 = arith.xori %9, %12 : vector<1x256xi1>
    %14 = arith.andi %13, %7 : vector<1x256xi1>
    %15 = vector.broadcast %3 : i32 to vector<1x256xi32>
    %16 = arith.addi %5, %15 : vector<1x256xi32>
    %17 = arith.select %14, %16, %5 : vector<1x256xi1>, vector<1x256xi32>
    %c32_i32 = arith.constant 32 : i32
    %18 = vector.broadcast %c32_i32 : i32 to vector<1x256xi32>
    %19 = arith.cmpi slt, %17, %18 : vector<1x256xi32>
    %20 = tpu.iota {dimensions = array<i32: 1>} : vector<1x64xi32>
    %21 = tpu.iota {dimensions = array<i32: 1>} : vector<1x128xi32>
    %c64_i32_4 = arith.constant 64 : i32
    %22 = vector.broadcast %c64_i32_4 : i32 to vector<1x128xi32>
    %23 = arith.cmpi slt, %21, %22 : vector<1x128xi32>
    %c32_i32_5 = arith.constant 32 : i32
    %24 = vector.broadcast %c32_i32_5 : i32 to vector<1x64xi32>
    %25 = arith.cmpi slt, %20, %24 : vector<1x64xi32>
    %26 = vector.shape_cast %25 : vector<1x64xi1> to vector<1x64xi1>
    %27 = vector.broadcast %26 : vector<1x64xi1> to vector<8x64xi1>
    %cst = arith.constant dense<true> : vector<8x64xi1>
    %28 = arith.xori %27, %cst : vector<8x64xi1>
    %c32_i32_6 = arith.constant 32 : i32
    %29 = vector.broadcast %c32_i32_6 : i32 to vector<1x64xi32>
    %30 = arith.cmpi slt, %20, %29 : vector<1x64xi32>
    %c0_i32_7 = arith.constant 0 : i32
    %c7_i32 = arith.constant 7 : i32
    %31 = vector.broadcast %c0_i32_7 : i32 to vector<1x64xi32>
    %32 = vector.broadcast %c7_i32 : i32 to vector<1x64xi32>
    %33 = arith.select %30, %31, %32 : vector<1x64xi1>, vector<1x64xi32>
    %34 = vector.broadcast %0 : vector<8x1xi32> to vector<8x64xi32>
    %35 = vector.broadcast %33 : vector<1x64xi32> to vector<8x64xi32>
    %36 = arith.cmpi sgt, %34, %35 : vector<8x64xi32>
    %c32_i32_8 = arith.constant 32 : i32
    %37 = vector.broadcast %c32_i32_8 : i32 to vector<1x64xi32>
    %38 = arith.cmpi slt, %20, %37 : vector<1x64xi32>
    %c1_i32_9 = arith.constant 1 : i32
    %c6_i32 = arith.constant 6 : i32
    %39 = vector.broadcast %c1_i32_9 : i32 to vector<1x64xi32>
    %40 = vector.broadcast %c6_i32 : i32 to vector<1x64xi32>
    %41 = arith.select %38, %39, %40 : vector<1x64xi1>, vector<1x64xi32>
    %42 = vector.broadcast %0 : vector<8x1xi32> to vector<8x64xi32>
    %43 = vector.broadcast %41 : vector<1x64xi32> to vector<8x64xi32>
    %44 = arith.cmpi sgt, %42, %43 : vector<8x64xi32>
    %c32_i32_10 = arith.constant 32 : i32
    %45 = vector.broadcast %c32_i32_10 : i32 to vector<1x64xi32>
    %46 = arith.cmpi slt, %20, %45 : vector<1x64xi32>
    %c2_i32 = arith.constant 2 : i32
    %c5_i32 = arith.constant 5 : i32
    %47 = vector.broadcast %c2_i32 : i32 to vector<1x64xi32>
    %48 = vector.broadcast %c5_i32 : i32 to vector<1x64xi32>
    %49 = arith.select %46, %47, %48 : vector<1x64xi1>, vector<1x64xi32>
    %50 = vector.broadcast %0 : vector<8x1xi32> to vector<8x64xi32>
    %51 = vector.broadcast %49 : vector<1x64xi32> to vector<8x64xi32>
    %52 = arith.cmpi sgt, %50, %51 : vector<8x64xi32>
    %c32_i32_11 = arith.constant 32 : i32
    %53 = vector.broadcast %c32_i32_11 : i32 to vector<1x64xi32>
    %54 = arith.cmpi slt, %20, %53 : vector<1x64xi32>
    %c3_i32 = arith.constant 3 : i32
    %c4_i32 = arith.constant 4 : i32
    %55 = vector.broadcast %c3_i32 : i32 to vector<1x64xi32>
    %56 = vector.broadcast %c4_i32 : i32 to vector<1x64xi32>
    %57 = arith.select %54, %55, %56 : vector<1x64xi1>, vector<1x64xi32>
    %58 = vector.broadcast %0 : vector<8x1xi32> to vector<8x64xi32>
    %59 = vector.broadcast %57 : vector<1x64xi32> to vector<8x64xi32>
    %60 = arith.cmpi sgt, %58, %59 : vector<8x64xi32>
    %c32_i32_12 = arith.constant 32 : i32
    %61 = vector.broadcast %c32_i32_12 : i32 to vector<1x64xi32>
    %62 = arith.cmpi slt, %20, %61 : vector<1x64xi32>
    %c4_i32_13 = arith.constant 4 : i32
    %c3_i32_14 = arith.constant 3 : i32
    %63 = vector.broadcast %c4_i32_13 : i32 to vector<1x64xi32>
    %64 = vector.broadcast %c3_i32_14 : i32 to vector<1x64xi32>
    %65 = arith.select %62, %63, %64 : vector<1x64xi1>, vector<1x64xi32>
    %66 = vector.broadcast %0 : vector<8x1xi32> to vector<8x64xi32>
    %67 = vector.broadcast %65 : vector<1x64xi32> to vector<8x64xi32>
    %68 = arith.cmpi sgt, %66, %67 : vector<8x64xi32>
    %c32_i32_15 = arith.constant 32 : i32
    %69 = vector.broadcast %c32_i32_15 : i32 to vector<1x64xi32>
    %70 = arith.cmpi slt, %20, %69 : vector<1x64xi32>
    %c5_i32_16 = arith.constant 5 : i32
    %c2_i32_17 = arith.constant 2 : i32
    %71 = vector.broadcast %c5_i32_16 : i32 to vector<1x64xi32>
    %72 = vector.broadcast %c2_i32_17 : i32 to vector<1x64xi32>
    %73 = arith.select %70, %71, %72 : vector<1x64xi1>, vector<1x64xi32>
    %74 = vector.broadcast %0 : vector<8x1xi32> to vector<8x64xi32>
    %75 = vector.broadcast %73 : vector<1x64xi32> to vector<8x64xi32>
    %76 = arith.cmpi sgt, %74, %75 : vector<8x64xi32>
    %c32_i32_18 = arith.constant 32 : i32
    %77 = vector.broadcast %c32_i32_18 : i32 to vector<1x64xi32>
    %78 = arith.cmpi slt, %20, %77 : vector<1x64xi32>
    %c6_i32_19 = arith.constant 6 : i32
    %c1_i32_20 = arith.constant 1 : i32
    %79 = vector.broadcast %c6_i32_19 : i32 to vector<1x64xi32>
    %80 = vector.broadcast %c1_i32_20 : i32 to vector<1x64xi32>
    %81 = arith.select %78, %79, %80 : vector<1x64xi1>, vector<1x64xi32>
    %82 = vector.broadcast %0 : vector<8x1xi32> to vector<8x64xi32>
    %83 = vector.broadcast %81 : vector<1x64xi32> to vector<8x64xi32>
    %84 = arith.cmpi sgt, %82, %83 : vector<8x64xi32>
    %c32_i32_21 = arith.constant 32 : i32
    %85 = vector.broadcast %c32_i32_21 : i32 to vector<1x64xi32>
    %86 = arith.cmpi slt, %20, %85 : vector<1x64xi32>
    %c7_i32_22 = arith.constant 7 : i32
    %c0_i32_23 = arith.constant 0 : i32
    %87 = vector.broadcast %c7_i32_22 : i32 to vector<1x64xi32>
    %88 = vector.broadcast %c0_i32_23 : i32 to vector<1x64xi32>
    %89 = arith.select %86, %87, %88 : vector<1x64xi1>, vector<1x64xi32>
    %90 = vector.broadcast %0 : vector<8x1xi32> to vector<8x64xi32>
    %91 = vector.broadcast %89 : vector<1x64xi32> to vector<8x64xi32>
    %92 = arith.cmpi sgt, %90, %91 : vector<8x64xi32>
    %cst_24 = arith.constant 0.000000e+00 : f32
    %93 = vector.broadcast %cst_24 : f32 to vector<8x32xf32>
    %c0_25 = arith.constant 0 : index
    %c0_26 = arith.constant 0 : index
    %94 = vector.load %arg0[%c0_25, %c0_26] : memref<64x1xi32, #tpu.memory_space<vmem>>, vector<64x1xi32>
    %95 = tpu.iota {dimensions = array<i32: 1>} : vector<64x64xi32>
    %96 = vector.broadcast %94 : vector<64x1xi32> to vector<64x64xi32>
    %97 = arith.cmpi eq, %96, %95 : vector<64x64xi32>
    %98 = arith.extui %97 : vector<64x64xi1> to vector<64x64xi32>
    %99 = arith.sitofp %98 : vector<64x64xi32> to vector<64x64xf32>
    %c0_27 = arith.constant 0 : index
    %c0_28 = arith.constant 0 : index
    %100 = vector.load %arg2[%c0_27, %c0_28] : memref<64x256xf32, #tpu.memory_space<vmem>>, vector<64x256xf32>
    %cst_29 = arith.constant dense<0.000000e+00> : vector<64x256xf32>
    %101 = tpu.matmul %99, %100, %cst_29 {dimension_numbers = #tpu.dot_dimension_numbers<[1], [0], [0], [1], [0, 0, 1, 1], [], []>} : vector<64x64xf32>, vector<64x256xf32>, vector<64x256xf32> -> vector<64x256xf32>
    %c0_30 = arith.constant 0 : index
    %c0_31 = arith.constant 0 : index
    %102 = vector.load %arg4[%c0_30, %c0_31] : memref<1x256xf32, #tpu.memory_space<vmem>>, vector<1x256xf32>
    %103 = vector.broadcast %102 : vector<1x256xf32> to vector<64x256xf32>
    %104 = arith.addf %101, %103 : vector<64x256xf32>
    %c0_32 = arith.constant 0 : index
    %c0_33 = arith.constant 0 : index
    %105 = vector.load %arg9[%c0_32, %c0_33] : memref<64x256xf32, #tpu.memory_space<vmem>>, vector<64x256xf32>
    tpu.vector_store %arg9[%c0_32, %c0_33], %104 {strides = array<i32>} : memref<64x256xf32, #tpu.memory_space<vmem>>, vector<64x256xf32>,
    %c0_34 = arith.constant 0 : index
    %c0_35 = arith.constant 0 : index
    %106 = vector.load %arg9[%c0_34, %c0_35] : memref<64x256xf32, #tpu.memory_space<vmem>>, vector<8x256xf32>
    %c56 = arith.constant 56 : index
    %c0_36 = arith.constant 0 : index
    %107 = vector.load %arg9[%c56, %c0_36] : memref<64x256xf32, #tpu.memory_space<vmem>>, vector<8x256xf32>
    %108 = vector.shape_cast %19 : vector<1x256xi1> to vector<1x256xi1>
    %109 = vector.broadcast %108 : vector<1x256xi1> to vector<8x256xi1>
    %110 = arith.select %109, %106, %107 : vector<8x256xi1>, vector<8x256xf32>
    %c0_37 = arith.constant 0 : index
    %c0_38 = arith.constant 0 : index
    %111 = vector.load %arg9[%c0_37, %c0_38] : memref<64x256xf32, #tpu.memory_space<vmem>>, vector<8x256xf32>
    tpu.vector_store %arg9[%c0_37, %c0_38], %110 {strides = array<i32>} : memref<64x256xf32, #tpu.memory_space<vmem>>, vector<8x256xf32>,
    %112 = vector.shape_cast %19 : vector<1x256xi1> to vector<1x256xi1>
    %113 = vector.broadcast %112 : vector<1x256xi1> to vector<8x256xi1>
    %114 = arith.select %113, %107, %106 : vector<8x256xi1>, vector<8x256xf32>
    %c56_39 = arith.constant 56 : index
    %c0_40 = arith.constant 0 : index
    %115 = vector.load %arg9[%c56_39, %c0_40] : memref<64x256xf32, #tpu.memory_space<vmem>>, vector<8x256xf32>
    tpu.vector_store %arg9[%c56_39, %c0_40], %114 {strides = array<i32>} : memref<64x256xf32, #tpu.memory_space<vmem>>, vector<8x256xf32>,
    %c8 = arith.constant 8 : index
    %c0_41 = arith.constant 0 : index
    %116 = vector.load %arg9[%c8, %c0_41] : memref<64x256xf32, #tpu.memory_space<vmem>>, vector<8x256xf32>
    %c48 = arith.constant 48 : index
    %c0_42 = arith.constant 0 : index
    %117 = vector.load %arg9[%c48, %c0_42] : memref<64x256xf32, #tpu.memory_space<vmem>>, vector<8x256xf32>
    %118 = vector.shape_cast %19 : vector<1x256xi1> to vector<1x256xi1>
    %119 = vector.broadcast %118 : vector<1x256xi1> to vector<8x256xi1>
    %120 = arith.select %119, %116, %117 : vector<8x256xi1>, vector<8x256xf32>
    %c8_43 = arith.constant 8 : index
    %c0_44 = arith.constant 0 : index
    %121 = vector.load %arg9[%c8_43, %c0_44] : memref<64x256xf32, #tpu.memory_space<vmem>>, vector<8x256xf32>
    tpu.vector_store %arg9[%c8_43, %c0_44], %120 {strides = array<i32>} : memref<64x256xf32, #tpu.memory_space<vmem>>, vector<8x256xf32>,
    %122 = vector.shape_cast %19 : vector<1x256xi1> to vector<1x256xi1>
    %123 = vector.broadcast %122 : vector<1x256xi1> to vector<8x256xi1>
    %124 = arith.select %123, %117, %116 : vector<8x256xi1>, vector<8x256xf32>
    %c48_45 = arith.constant 48 : index
    %c0_46 = arith.constant 0 : index
    %125 = vector.load %arg9[%c48_45, %c0_46] : memref<64x256xf32, #tpu.memory_space<vmem>>, vector<8x256xf32>
    tpu.vector_store %arg9[%c48_45, %c0_46], %124 {strides = array<i32>} : memref<64x256xf32, #tpu.memory_space<vmem>>, vector<8x256xf32>,
    %c16 = arith.constant 16 : index
    %c0_47 = arith.constant 0 : index
    %126 = vector.load %arg9[%c16, %c0_47] : memref<64x256xf32, #tpu.memory_space<vmem>>, vector<8x256xf32>
    %c40 = arith.constant 40 : index
    %c0_48 = arith.constant 0 : index
    %127 = vector.load %arg9[%c40, %c0_48] : memref<64x256xf32, #tpu.memory_space<vmem>>, vector<8x256xf32>
    %128 = vector.shape_cast %19 : vector<1x256xi1> to vector<1x256xi1>
    %129 = vector.broadcast %128 : vector<1x256xi1> to vector<8x256xi1>
    %130 = arith.select %129, %126, %127 : vector<8x256xi1>, vector<8x256xf32>
    %c16_49 = arith.constant 16 : index
    %c0_50 = arith.constant 0 : index
    %131 = vector.load %arg9[%c16_49, %c0_50] : memref<64x256xf32, #tpu.memory_space<vmem>>, vector<8x256xf32>
    tpu.vector_store %arg9[%c16_49, %c0_50], %130 {strides = array<i32>} : memref<64x256xf32, #tpu.memory_space<vmem>>, vector<8x256xf32>,
    %132 = vector.shape_cast %19 : vector<1x256xi1> to vector<1x256xi1>
    %133 = vector.broadcast %132 : vector<1x256xi1> to vector<8x256xi1>
    %134 = arith.select %133, %127, %126 : vector<8x256xi1>, vector<8x256xf32>
    %c40_51 = arith.constant 40 : index
    %c0_52 = arith.constant 0 : index
    %135 = vector.load %arg9[%c40_51, %c0_52] : memref<64x256xf32, #tpu.memory_space<vmem>>, vector<8x256xf32>
    tpu.vector_store %arg9[%c40_51, %c0_52], %134 {strides = array<i32>} : memref<64x256xf32, #tpu.memory_space<vmem>>, vector<8x256xf32>,
    %c24 = arith.constant 24 : index
    %c0_53 = arith.constant 0 : index
    %136 = vector.load %arg9[%c24, %c0_53] : memref<64x256xf32, #tpu.memory_space<vmem>>, vector<8x256xf32>
    %c32 = arith.constant 32 : index
    %c0_54 = arith.constant 0 : index
    %137 = vector.load %arg9[%c32, %c0_54] : memref<64x256xf32, #tpu.memory_space<vmem>>, vector<8x256xf32>
    %138 = vector.shape_cast %19 : vector<1x256xi1> to vector<1x256xi1>
    %139 = vector.broadcast %138 : vector<1x256xi1> to vector<8x256xi1>
    %140 = arith.select %139, %136, %137 : vector<8x256xi1>, vector<8x256xf32>
    %c24_55 = arith.constant 24 : index
    %c0_56 = arith.constant 0 : index
    %141 = vector.load %arg9[%c24_55, %c0_56] : memref<64x256xf32, #tpu.memory_space<vmem>>, vector<8x256xf32>
    tpu.vector_store %arg9[%c24_55, %c0_56], %140 {strides = array<i32>} : memref<64x256xf32, #tpu.memory_space<vmem>>, vector<8x256xf32>,
    %142 = vector.shape_cast %19 : vector<1x256xi1> to vector<1x256xi1>
    %143 = vector.broadcast %142 : vector<1x256xi1> to vector<8x256xi1>
    %144 = arith.select %143, %137, %136 : vector<8x256xi1>, vector<8x256xf32>
    %c32_57 = arith.constant 32 : index
    %c0_58 = arith.constant 0 : index
    %145 = vector.load %arg9[%c32_57, %c0_58] : memref<64x256xf32, #tpu.memory_space<vmem>>, vector<8x256xf32>
    tpu.vector_store %arg9[%c32_57, %c0_58], %144 {strides = array<i32>} : memref<64x256xf32, #tpu.memory_space<vmem>>, vector<8x256xf32>,
    %c0_59 = arith.constant 0 : index
    %c0_60 = arith.constant 0 : index
    %146 = vector.load %arg3[%c0_59, %c0_60] : memref<64x256xf32, #tpu.memory_space<vmem>>, vector<64x256xf32>
    %cst_61 = arith.constant 0.000000e+00 : f32
    %147 = vector.broadcast %cst_61 : f32 to vector<8x64xf32>
    %cst_62 = arith.constant 0.000000e+00 : f32
    %148 = vector.broadcast %cst_62 : f32 to vector<8x64xf32>
    %c0_63 = arith.constant 0 : index
    %c0_64 = arith.constant 0 : index
    %149 = vector.load %arg9[%c0_63, %c0_64] : memref<64x256xf32, #tpu.memory_space<vmem>>, vector<8x256xf32>
    %cst_65 = arith.constant dense<0.000000e+00> : vector<8x256xf32>
    %150 = tpu.matmul %147, %146, %cst_65 {dimension_numbers = #tpu.dot_dimension_numbers<[1], [0], [0], [1], [0, 0, 1, 1], [], []>} : vector<8x64xf32>, vector<64x256xf32>, vector<8x256xf32> -> vector<8x256xf32>
    %151 = arith.addf %149, %150 : vector<8x256xf32>
    %152 = vector.extract_strided_slice %151 {offsets = [0, 0], sizes = [8, 128], strides = [1, 1]} : vector<8x256xf32> to vector<8x128xf32>
    %153 = arith.negf %152 : vector<8x128xf32>
    %154 = math.exp %153 : vector<8x128xf32>
    %cst_66 = arith.constant 1.000000e+00 : f32
    %155 = vector.broadcast %cst_66 : f32 to vector<8x128xf32>
    %156 = arith.addf %155, %154 : vector<8x128xf32>
    %157 = arith.divf %155, %156 : vector<8x128xf32>
    %158 = vector.extract_strided_slice %151 {offsets = [0, 128], sizes = [8, 128], strides = [1, 1]} : vector<8x256xf32> to vector<8x128xf32>
    %159 = math.tanh %158 : vector<8x128xf32>
    %160 = arith.negf %158 : vector<8x128xf32>
    %161 = math.exp %160 : vector<8x128xf32>
    %cst_67 = arith.constant 1.000000e+00 : f32
    %162 = vector.broadcast %cst_67 : f32 to vector<8x128xf32>
    %163 = arith.addf %162, %161 : vector<8x128xf32>
    %164 = arith.divf %162, %163 : vector<8x128xf32>
    %165 = vector.shape_cast %23 : vector<1x128xi1> to vector<1x128xi1>
    %166 = vector.broadcast %165 : vector<1x128xi1> to vector<8x128xi1>
    %167 = arith.select %166, %159, %164 : vector<8x128xi1>, vector<8x128xf32>
    %168 = vector.extract_strided_slice %157 {offsets = [0, 0], sizes = [8, 64], strides = [1, 1]} : vector<8x128xf32> to vector<8x64xf32>
    %169 = vector.extract_strided_slice %157 {offsets = [0, 64], sizes = [8, 64], strides = [1, 1]} : vector<8x128xf32> to vector<8x64xf32>
    %170 = vector.extract_strided_slice %167 {offsets = [0, 0], sizes = [8, 64], strides = [1, 1]} : vector<8x128xf32> to vector<8x64xf32>
    %171 = vector.extract_strided_slice %167 {offsets = [0, 64], sizes = [8, 64], strides = [1, 1]} : vector<8x128xf32> to vector<8x64xf32>
    %172 = arith.mulf %169, %148 : vector<8x64xf32>
    %173 = arith.mulf %168, %170 : vector<8x64xf32>
    %174 = arith.addf %172, %173 : vector<8x64xf32>
    %175 = math.tanh %174 : vector<8x64xf32>
    %176 = arith.mulf %171, %175 : vector<8x64xf32>
    %177 = arith.select %36, %174, %148 : vector<8x64xi1>, vector<8x64xf32>
    %178 = arith.select %36, %176, %147 : vector<8x64xi1>, vector<8x64xf32>
    %c0_68 = arith.constant 0 : index
    %c0_69 = arith.constant 0 : index
    %179 = vector.load %arg10[%c0_68, %c0_69] : memref<64x64xf32, #tpu.memory_space<vmem>>, vector<8x64xf32>
    tpu.vector_store %arg10[%c0_68, %c0_69], %178 masked %27 {strides = array<i32>} : memref<64x64xf32, #tpu.memory_space<vmem>>, vector<8x64xf32>, vector<8x64xi1>
    %c56_70 = arith.constant 56 : index
    %c0_71 = arith.constant 0 : index
    %180 = vector.load %arg10[%c56_70, %c0_71] : memref<64x64xf32, #tpu.memory_space<vmem>>, vector<8x64xf32>
    tpu.vector_store %arg10[%c56_70, %c0_71], %178 masked %28 {strides = array<i32>} : memref<64x64xf32, #tpu.memory_space<vmem>>, vector<8x64xf32>, vector<8x64xi1>
    %c8_72 = arith.constant 8 : index
    %c0_73 = arith.constant 0 : index
    %181 = vector.load %arg9[%c8_72, %c0_73] : memref<64x256xf32, #tpu.memory_space<vmem>>, vector<8x256xf32>
    %cst_74 = arith.constant dense<0.000000e+00> : vector<8x256xf32>
    %182 = tpu.matmul %178, %146, %cst_74 {dimension_numbers = #tpu.dot_dimension_numbers<[1], [0], [0], [1], [0, 0, 1, 1], [], []>} : vector<8x64xf32>, vector<64x256xf32>, vector<8x256xf32> -> vector<8x256xf32>
    %183 = arith.addf %181, %182 : vector<8x256xf32>
    %184 = vector.extract_strided_slice %183 {offsets = [0, 0], sizes = [8, 128], strides = [1, 1]} : vector<8x256xf32> to vector<8x128xf32>
    %185 = arith.negf %184 : vector<8x128xf32>
    %186 = math.exp %185 : vector<8x128xf32>
    %cst_75 = arith.constant 1.000000e+00 : f32
    %187 = vector.broadcast %cst_75 : f32 to vector<8x128xf32>
    %188 = arith.addf %187, %186 : vector<8x128xf32>
    %189 = arith.divf %187, %188 : vector<8x128xf32>
    %190 = vector.extract_strided_slice %183 {offsets = [0, 128], sizes = [8, 128], strides = [1, 1]} : vector<8x256xf32> to vector<8x128xf32>
    %191 = math.tanh %190 : vector<8x128xf32>
    %192 = arith.negf %190 : vector<8x128xf32>
    %193 = math.exp %192 : vector<8x128xf32>
    %cst_76 = arith.constant 1.000000e+00 : f32
    %194 = vector.broadcast %cst_76 : f32 to vector<8x128xf32>
    %195 = arith.addf %194, %193 : vector<8x128xf32>
    %196 = arith.divf %194, %195 : vector<8x128xf32>
    %197 = vector.shape_cast %23 : vector<1x128xi1> to vector<1x128xi1>
    %198 = vector.broadcast %197 : vector<1x128xi1> to vector<8x128xi1>
    %199 = arith.select %198, %191, %196 : vector<8x128xi1>, vector<8x128xf32>
    %200 = vector.extract_strided_slice %189 {offsets = [0, 0], sizes = [8, 64], strides = [1, 1]} : vector<8x128xf32> to vector<8x64xf32>
    %201 = vector.extract_strided_slice %189 {offsets = [0, 64], sizes = [8, 64], strides = [1, 1]} : vector<8x128xf32> to vector<8x64xf32>
    %202 = vector.extract_strided_slice %199 {offsets = [0, 0], sizes = [8, 64], strides = [1, 1]} : vector<8x128xf32> to vector<8x64xf32>
    %203 = vector.extract_strided_slice %199 {offsets = [0, 64], sizes = [8, 64], strides = [1, 1]} : vector<8x128xf32> to vector<8x64xf32>
    %204 = arith.mulf %201, %177 : vector<8x64xf32>
    %205 = arith.mulf %200, %202 : vector<8x64xf32>
    %206 = arith.addf %204, %205 : vector<8x64xf32>
    %207 = math.tanh %206 : vector<8x64xf32>
    %208 = arith.mulf %203, %207 : vector<8x64xf32>
    %209 = arith.select %44, %206, %177 : vector<8x64xi1>, vector<8x64xf32>
    %210 = arith.select %44, %208, %178 : vector<8x64xi1>, vector<8x64xf32>
    %c8_77 = arith.constant 8 : index
    %c0_78 = arith.constant 0 : index
    %211 = vector.load %arg10[%c8_77, %c0_78] : memref<64x64xf32, #tpu.memory_space<vmem>>, vector<8x64xf32>
    tpu.vector_store %arg10[%c8_77, %c0_78], %210 masked %27 {strides = array<i32>} : memref<64x64xf32, #tpu.memory_space<vmem>>, vector<8x64xf32>, vector<8x64xi1>
    %c48_79 = arith.constant 48 : index
    %c0_80 = arith.constant 0 : index
    %212 = vector.load %arg10[%c48_79, %c0_80] : memref<64x64xf32, #tpu.memory_space<vmem>>, vector<8x64xf32>
    tpu.vector_store %arg10[%c48_79, %c0_80], %210 masked %28 {strides = array<i32>} : memref<64x64xf32, #tpu.memory_space<vmem>>, vector<8x64xf32>, vector<8x64xi1>
    %c16_81 = arith.constant 16 : index
    %c0_82 = arith.constant 0 : index
    %213 = vector.load %arg9[%c16_81, %c0_82] : memref<64x256xf32, #tpu.memory_space<vmem>>, vector<8x256xf32>
    %cst_83 = arith.constant dense<0.000000e+00> : vector<8x256xf32>
    %214 = tpu.matmul %210, %146, %cst_83 {dimension_numbers = #tpu.dot_dimension_numbers<[1], [0], [0], [1], [0, 0, 1, 1], [], []>} : vector<8x64xf32>, vector<64x256xf32>, vector<8x256xf32> -> vector<8x256xf32>
    %215 = arith.addf %213, %214 : vector<8x256xf32>
    %216 = vector.extract_strided_slice %215 {offsets = [0, 0], sizes = [8, 128], strides = [1, 1]} : vector<8x256xf32> to vector<8x128xf32>
    %217 = arith.negf %216 : vector<8x128xf32>
    %218 = math.exp %217 : vector<8x128xf32>
    %cst_84 = arith.constant 1.000000e+00 : f32
    %219 = vector.broadcast %cst_84 : f32 to vector<8x128xf32>
    %220 = arith.addf %219, %218 : vector<8x128xf32>
    %221 = arith.divf %219, %220 : vector<8x128xf32>
    %222 = vector.extract_strided_slice %215 {offsets = [0, 128], sizes = [8, 128], strides = [1, 1]} : vector<8x256xf32> to vector<8x128xf32>
    %223 = math.tanh %222 : vector<8x128xf32>
    %224 = arith.negf %222 : vector<8x128xf32>
    %225 = math.exp %224 : vector<8x128xf32>
    %cst_85 = arith.constant 1.000000e+00 : f32
    %226 = vector.broadcast %cst_85 : f32 to vector<8x128xf32>
    %227 = arith.addf %226, %225 : vector<8x128xf32>
    %228 = arith.divf %226, %227 : vector<8x128xf32>
    %229 = vector.shape_cast %23 : vector<1x128xi1> to vector<1x128xi1>
    %230 = vector.broadcast %229 : vector<1x128xi1> to vector<8x128xi1>
    %231 = arith.select %230, %223, %228 : vector<8x128xi1>, vector<8x128xf32>
    %232 = vector.extract_strided_slice %221 {offsets = [0, 0], sizes = [8, 64], strides = [1, 1]} : vector<8x128xf32> to vector<8x64xf32>
    %233 = vector.extract_strided_slice %221 {offsets = [0, 64], sizes = [8, 64], strides = [1, 1]} : vector<8x128xf32> to vector<8x64xf32>
    %234 = vector.extract_strided_slice %231 {offsets = [0, 0], sizes = [8, 64], strides = [1, 1]} : vector<8x128xf32> to vector<8x64xf32>
    %235 = vector.extract_strided_slice %231 {offsets = [0, 64], sizes = [8, 64], strides = [1, 1]} : vector<8x128xf32> to vector<8x64xf32>
    %236 = arith.mulf %233, %209 : vector<8x64xf32>
    %237 = arith.mulf %232, %234 : vector<8x64xf32>
    %238 = arith.addf %236, %237 : vector<8x64xf32>
    %239 = math.tanh %238 : vector<8x64xf32>
    %240 = arith.mulf %235, %239 : vector<8x64xf32>
    %241 = arith.select %52, %238, %209 : vector<8x64xi1>, vector<8x64xf32>
    %242 = arith.select %52, %240, %210 : vector<8x64xi1>, vector<8x64xf32>
    %c16_86 = arith.constant 16 : index
    %c0_87 = arith.constant 0 : index
    %243 = vector.load %arg10[%c16_86, %c0_87] : memref<64x64xf32, #tpu.memory_space<vmem>>, vector<8x64xf32>
    tpu.vector_store %arg10[%c16_86, %c0_87], %242 masked %27 {strides = array<i32>} : memref<64x64xf32, #tpu.memory_space<vmem>>, vector<8x64xf32>, vector<8x64xi1>
    %c40_88 = arith.constant 40 : index
    %c0_89 = arith.constant 0 : index
    %244 = vector.load %arg10[%c40_88, %c0_89] : memref<64x64xf32, #tpu.memory_space<vmem>>, vector<8x64xf32>
    tpu.vector_store %arg10[%c40_88, %c0_89], %242 masked %28 {strides = array<i32>} : memref<64x64xf32, #tpu.memory_space<vmem>>, vector<8x64xf32>, vector<8x64xi1>
    %c24_90 = arith.constant 24 : index
    %c0_91 = arith.constant 0 : index
    %245 = vector.load %arg9[%c24_90, %c0_91] : memref<64x256xf32, #tpu.memory_space<vmem>>, vector<8x256xf32>
    %cst_92 = arith.constant dense<0.000000e+00> : vector<8x256xf32>
    %246 = tpu.matmul %242, %146, %cst_92 {dimension_numbers = #tpu.dot_dimension_numbers<[1], [0], [0], [1], [0, 0, 1, 1], [], []>} : vector<8x64xf32>, vector<64x256xf32>, vector<8x256xf32> -> vector<8x256xf32>
    %247 = arith.addf %245, %246 : vector<8x256xf32>
    %248 = vector.extract_strided_slice %247 {offsets = [0, 0], sizes = [8, 128], strides = [1, 1]} : vector<8x256xf32> to vector<8x128xf32>
    %249 = arith.negf %248 : vector<8x128xf32>
    %250 = math.exp %249 : vector<8x128xf32>
    %cst_93 = arith.constant 1.000000e+00 : f32
    %251 = vector.broadcast %cst_93 : f32 to vector<8x128xf32>
    %252 = arith.addf %251, %250 : vector<8x128xf32>
    %253 = arith.divf %251, %252 : vector<8x128xf32>
    %254 = vector.extract_strided_slice %247 {offsets = [0, 128], sizes = [8, 128], strides = [1, 1]} : vector<8x256xf32> to vector<8x128xf32>
    %255 = math.tanh %254 : vector<8x128xf32>
    %256 = arith.negf %254 : vector<8x128xf32>
    %257 = math.exp %256 : vector<8x128xf32>
    %cst_94 = arith.constant 1.000000e+00 : f32
    %258 = vector.broadcast %cst_94 : f32 to vector<8x128xf32>
    %259 = arith.addf %258, %257 : vector<8x128xf32>
    %260 = arith.divf %258, %259 : vector<8x128xf32>
    %261 = vector.shape_cast %23 : vector<1x128xi1> to vector<1x128xi1>
    %262 = vector.broadcast %261 : vector<1x128xi1> to vector<8x128xi1>
    %263 = arith.select %262, %255, %260 : vector<8x128xi1>, vector<8x128xf32>
    %264 = vector.extract_strided_slice %253 {offsets = [0, 0], sizes = [8, 64], strides = [1, 1]} : vector<8x128xf32> to vector<8x64xf32>
    %265 = vector.extract_strided_slice %253 {offsets = [0, 64], sizes = [8, 64], strides = [1, 1]} : vector<8x128xf32> to vector<8x64xf32>
    %266 = vector.extract_strided_slice %263 {offsets = [0, 0], sizes = [8, 64], strides = [1, 1]} : vector<8x128xf32> to vector<8x64xf32>
    %267 = vector.extract_strided_slice %263 {offsets = [0, 64], sizes = [8, 64], strides = [1, 1]} : vector<8x128xf32> to vector<8x64xf32>
    %268 = arith.mulf %265, %241 : vector<8x64xf32>
    %269 = arith.mulf %264, %266 : vector<8x64xf32>
    %270 = arith.addf %268, %269 : vector<8x64xf32>
    %271 = math.tanh %270 : vector<8x64xf32>
    %272 = arith.mulf %267, %271 : vector<8x64xf32>
    %273 = arith.select %60, %270, %241 : vector<8x64xi1>, vector<8x64xf32>
    %274 = arith.select %60, %272, %242 : vector<8x64xi1>, vector<8x64xf32>
    %c24_95 = arith.constant 24 : index
    %c0_96 = arith.constant 0 : index
    %275 = vector.load %arg10[%c24_95, %c0_96] : memref<64x64xf32, #tpu.memory_space<vmem>>, vector<8x64xf32>
    tpu.vector_store %arg10[%c24_95, %c0_96], %274 masked %27 {strides = array<i32>} : memref<64x64xf32, #tpu.memory_space<vmem>>, vector<8x64xf32>, vector<8x64xi1>
    %c32_97 = arith.constant 32 : index
    %c0_98 = arith.constant 0 : index
    %276 = vector.load %arg10[%c32_97, %c0_98] : memref<64x64xf32, #tpu.memory_space<vmem>>, vector<8x64xf32>
    tpu.vector_store %arg10[%c32_97, %c0_98], %274 masked %28 {strides = array<i32>} : memref<64x64xf32, #tpu.memory_space<vmem>>, vector<8x64xf32>, vector<8x64xi1>
    %c32_99 = arith.constant 32 : index
    %c0_100 = arith.constant 0 : index
    %277 = vector.load %arg9[%c32_99, %c0_100] : memref<64x256xf32, #tpu.memory_space<vmem>>, vector<8x256xf32>
    %cst_101 = arith.constant dense<0.000000e+00> : vector<8x256xf32>
    %278 = tpu.matmul %274, %146, %cst_101 {dimension_numbers = #tpu.dot_dimension_numbers<[1], [0], [0], [1], [0, 0, 1, 1], [], []>} : vector<8x64xf32>, vector<64x256xf32>, vector<8x256xf32> -> vector<8x256xf32>
    %279 = arith.addf %277, %278 : vector<8x256xf32>
    %280 = vector.extract_strided_slice %279 {offsets = [0, 0], sizes = [8, 128], strides = [1, 1]} : vector<8x256xf32> to vector<8x128xf32>
    %281 = arith.negf %280 : vector<8x128xf32>
    %282 = math.exp %281 : vector<8x128xf32>
    %cst_102 = arith.constant 1.000000e+00 : f32
    %283 = vector.broadcast %cst_102 : f32 to vector<8x128xf32>
    %284 = arith.addf %283, %282 : vector<8x128xf32>
    %285 = arith.divf %283, %284 : vector<8x128xf32>
    %286 = vector.extract_strided_slice %279 {offsets = [0, 128], sizes = [8, 128], strides = [1, 1]} : vector<8x256xf32> to vector<8x128xf32>
    %287 = math.tanh %286 : vector<8x128xf32>
    %288 = arith.negf %286 : vector<8x128xf32>
    %289 = math.exp %288 : vector<8x128xf32>
    %cst_103 = arith.constant 1.000000e+00 : f32
    %290 = vector.broadcast %cst_103 : f32 to vector<8x128xf32>
    %291 = arith.addf %290, %289 : vector<8x128xf32>
    %292 = arith.divf %290, %291 : vector<8x128xf32>
    %293 = vector.shape_cast %23 : vector<1x128xi1> to vector<1x128xi1>
    %294 = vector.broadcast %293 : vector<1x128xi1> to vector<8x128xi1>
    %295 = arith.select %294, %287, %292 : vector<8x128xi1>, vector<8x128xf32>
    %296 = vector.extract_strided_slice %285 {offsets = [0, 0], sizes = [8, 64], strides = [1, 1]} : vector<8x128xf32> to vector<8x64xf32>
    %297 = vector.extract_strided_slice %285 {offsets = [0, 64], sizes = [8, 64], strides = [1, 1]} : vector<8x128xf32> to vector<8x64xf32>
    %298 = vector.extract_strided_slice %295 {offsets = [0, 0], sizes = [8, 64], strides = [1, 1]} : vector<8x128xf32> to vector<8x64xf32>
    %299 = vector.extract_strided_slice %295 {offsets = [0, 64], sizes = [8, 64], strides = [1, 1]} : vector<8x128xf32> to vector<8x64xf32>
    %300 = arith.mulf %297, %273 : vector<8x64xf32>
    %301 = arith.mulf %296, %298 : vector<8x64xf32>
    %302 = arith.addf %300, %301 : vector<8x64xf32>
    %303 = math.tanh %302 : vector<8x64xf32>
    %304 = arith.mulf %299, %303 : vector<8x64xf32>
    %305 = arith.select %68, %302, %273 : vector<8x64xi1>, vector<8x64xf32>
    %306 = arith.select %68, %304, %274 : vector<8x64xi1>, vector<8x64xf32>
    %c32_104 = arith.constant 32 : index
    %c0_105 = arith.constant 0 : index
    %307 = vector.load %arg10[%c32_104, %c0_105] : memref<64x64xf32, #tpu.memory_space<vmem>>, vector<8x64xf32>
    tpu.vector_store %arg10[%c32_104, %c0_105], %306 masked %27 {strides = array<i32>} : memref<64x64xf32, #tpu.memory_space<vmem>>, vector<8x64xf32>, vector<8x64xi1>
    %c24_106 = arith.constant 24 : index
    %c0_107 = arith.constant 0 : index
    %308 = vector.load %arg10[%c24_106, %c0_107] : memref<64x64xf32, #tpu.memory_space<vmem>>, vector<8x64xf32>
    tpu.vector_store %arg10[%c24_106, %c0_107], %306 masked %28 {strides = array<i32>} : memref<64x64xf32, #tpu.memory_space<vmem>>, vector<8x64xf32>, vector<8x64xi1>
    %c40_108 = arith.constant 40 : index
    %c0_109 = arith.constant 0 : index
    %309 = vector.load %arg9[%c40_108, %c0_109] : memref<64x256xf32, #tpu.memory_space<vmem>>, vector<8x256xf32>
    %cst_110 = arith.constant dense<0.000000e+00> : vector<8x256xf32>
    %310 = tpu.matmul %306, %146, %cst_110 {dimension_numbers = #tpu.dot_dimension_numbers<[1], [0], [0], [1], [0, 0, 1, 1], [], []>} : vector<8x64xf32>, vector<64x256xf32>, vector<8x256xf32> -> vector<8x256xf32>
    %311 = arith.addf %309, %310 : vector<8x256xf32>
    %312 = vector.extract_strided_slice %311 {offsets = [0, 0], sizes = [8, 128], strides = [1, 1]} : vector<8x256xf32> to vector<8x128xf32>
    %313 = arith.negf %312 : vector<8x128xf32>
    %314 = math.exp %313 : vector<8x128xf32>
    %cst_111 = arith.constant 1.000000e+00 : f32
    %315 = vector.broadcast %cst_111 : f32 to vector<8x128xf32>
    %316 = arith.addf %315, %314 : vector<8x128xf32>
    %317 = arith.divf %315, %316 : vector<8x128xf32>
    %318 = vector.extract_strided_slice %311 {offsets = [0, 128], sizes = [8, 128], strides = [1, 1]} : vector<8x256xf32> to vector<8x128xf32>
    %319 = math.tanh %318 : vector<8x128xf32>
    %320 = arith.negf %318 : vector<8x128xf32>
    %321 = math.exp %320 : vector<8x128xf32>
    %cst_112 = arith.constant 1.000000e+00 : f32
    %322 = vector.broadcast %cst_112 : f32 to vector<8x128xf32>
    %323 = arith.addf %322, %321 : vector<8x128xf32>
    %324 = arith.divf %322, %323 : vector<8x128xf32>
    %325 = vector.shape_cast %23 : vector<1x128xi1> to vector<1x128xi1>
    %326 = vector.broadcast %325 : vector<1x128xi1> to vector<8x128xi1>
    %327 = arith.select %326, %319, %324 : vector<8x128xi1>, vector<8x128xf32>
    %328 = vector.extract_strided_slice %317 {offsets = [0, 0], sizes = [8, 64], strides = [1, 1]} : vector<8x128xf32> to vector<8x64xf32>
    %329 = vector.extract_strided_slice %317 {offsets = [0, 64], sizes = [8, 64], strides = [1, 1]} : vector<8x128xf32> to vector<8x64xf32>
    %330 = vector.extract_strided_slice %327 {offsets = [0, 0], sizes = [8, 64], strides = [1, 1]} : vector<8x128xf32> to vector<8x64xf32>
    %331 = vector.extract_strided_slice %327 {offsets = [0, 64], sizes = [8, 64], strides = [1, 1]} : vector<8x128xf32> to vector<8x64xf32>
    %332 = arith.mulf %329, %305 : vector<8x64xf32>
    %333 = arith.mulf %328, %330 : vector<8x64xf32>
    %334 = arith.addf %332, %333 : vector<8x64xf32>
    %335 = math.tanh %334 : vector<8x64xf32>
    %336 = arith.mulf %331, %335 : vector<8x64xf32>
    %337 = arith.select %76, %334, %305 : vector<8x64xi1>, vector<8x64xf32>
    %338 = arith.select %76, %336, %306 : vector<8x64xi1>, vector<8x64xf32>
    %c40_113 = arith.constant 40 : index
    %c0_114 = arith.constant 0 : index
    %339 = vector.load %arg10[%c40_113, %c0_114] : memref<64x64xf32, #tpu.memory_space<vmem>>, vector<8x64xf32>
    tpu.vector_store %arg10[%c40_113, %c0_114], %338 masked %27 {strides = array<i32>} : memref<64x64xf32, #tpu.memory_space<vmem>>, vector<8x64xf32>, vector<8x64xi1>
    %c16_115 = arith.constant 16 : index
    %c0_116 = arith.constant 0 : index
    %340 = vector.load %arg10[%c16_115, %c0_116] : memref<64x64xf32, #tpu.memory_space<vmem>>, vector<8x64xf32>
    tpu.vector_store %arg10[%c16_115, %c0_116], %338 masked %28 {strides = array<i32>} : memref<64x64xf32, #tpu.memory_space<vmem>>, vector<8x64xf32>, vector<8x64xi1>
    %c48_117 = arith.constant 48 : index
    %c0_118 = arith.constant 0 : index
    %341 = vector.load %arg9[%c48_117, %c0_118] : memref<64x256xf32, #tpu.memory_space<vmem>>, vector<8x256xf32>
    %cst_119 = arith.constant dense<0.000000e+00> : vector<8x256xf32>
    %342 = tpu.matmul %338, %146, %cst_119 {dimension_numbers = #tpu.dot_dimension_numbers<[1], [0], [0], [1], [0, 0, 1, 1], [], []>} : vector<8x64xf32>, vector<64x256xf32>, vector<8x256xf32> -> vector<8x256xf32>
    %343 = arith.addf %341, %342 : vector<8x256xf32>
    %344 = vector.extract_strided_slice %343 {offsets = [0, 0], sizes = [8, 128], strides = [1, 1]} : vector<8x256xf32> to vector<8x128xf32>
    %345 = arith.negf %344 : vector<8x128xf32>
    %346 = math.exp %345 : vector<8x128xf32>
    %cst_120 = arith.constant 1.000000e+00 : f32
    %347 = vector.broadcast %cst_120 : f32 to vector<8x128xf32>
    %348 = arith.addf %347, %346 : vector<8x128xf32>
    %349 = arith.divf %347, %348 : vector<8x128xf32>
    %350 = vector.extract_strided_slice %343 {offsets = [0, 128], sizes = [8, 128], strides = [1, 1]} : vector<8x256xf32> to vector<8x128xf32>
    %351 = math.tanh %350 : vector<8x128xf32>
    %352 = arith.negf %350 : vector<8x128xf32>
    %353 = math.exp %352 : vector<8x128xf32>
    %cst_121 = arith.constant 1.000000e+00 : f32
    %354 = vector.broadcast %cst_121 : f32 to vector<8x128xf32>
    %355 = arith.addf %354, %353 : vector<8x128xf32>
    %356 = arith.divf %354, %355 : vector<8x128xf32>
    %357 = vector.shape_cast %23 : vector<1x128xi1> to vector<1x128xi1>
    %358 = vector.broadcast %357 : vector<1x128xi1> to vector<8x128xi1>
    %359 = arith.select %358, %351, %356 : vector<8x128xi1>, vector<8x128xf32>
    %360 = vector.extract_strided_slice %349 {offsets = [0, 0], sizes = [8, 64], strides = [1, 1]} : vector<8x128xf32> to vector<8x64xf32>
    %361 = vector.extract_strided_slice %349 {offsets = [0, 64], sizes = [8, 64], strides = [1, 1]} : vector<8x128xf32> to vector<8x64xf32>
    %362 = vector.extract_strided_slice %359 {offsets = [0, 0], sizes = [8, 64], strides = [1, 1]} : vector<8x128xf32> to vector<8x64xf32>
    %363 = vector.extract_strided_slice %359 {offsets = [0, 64], sizes = [8, 64], strides = [1, 1]} : vector<8x128xf32> to vector<8x64xf32>
    %364 = arith.mulf %361, %337 : vector<8x64xf32>
    %365 = arith.mulf %360, %362 : vector<8x64xf32>
    %366 = arith.addf %364, %365 : vector<8x64xf32>
    %367 = math.tanh %366 : vector<8x64xf32>
    %368 = arith.mulf %363, %367 : vector<8x64xf32>
    %369 = arith.select %84, %366, %337 : vector<8x64xi1>, vector<8x64xf32>
    %370 = arith.select %84, %368, %338 : vector<8x64xi1>, vector<8x64xf32>
    %c48_122 = arith.constant 48 : index
    %c0_123 = arith.constant 0 : index
    %371 = vector.load %arg10[%c48_122, %c0_123] : memref<64x64xf32, #tpu.memory_space<vmem>>, vector<8x64xf32>
    tpu.vector_store %arg10[%c48_122, %c0_123], %370 masked %27 {strides = array<i32>} : memref<64x64xf32, #tpu.memory_space<vmem>>, vector<8x64xf32>, vector<8x64xi1>
    %c8_124 = arith.constant 8 : index
    %c0_125 = arith.constant 0 : index
    %372 = vector.load %arg10[%c8_124, %c0_125] : memref<64x64xf32, #tpu.memory_space<vmem>>, vector<8x64xf32>
    tpu.vector_store %arg10[%c8_124, %c0_125], %370 masked %28 {strides = array<i32>} : memref<64x64xf32, #tpu.memory_space<vmem>>, vector<8x64xf32>, vector<8x64xi1>
    %c56_126 = arith.constant 56 : index
    %c0_127 = arith.constant 0 : index
    %373 = vector.load %arg9[%c56_126, %c0_127] : memref<64x256xf32, #tpu.memory_space<vmem>>, vector<8x256xf32>
    %cst_128 = arith.constant dense<0.000000e+00> : vector<8x256xf32>
    %374 = tpu.matmul %370, %146, %cst_128 {dimension_numbers = #tpu.dot_dimension_numbers<[1], [0], [0], [1], [0, 0, 1, 1], [], []>} : vector<8x64xf32>, vector<64x256xf32>, vector<8x256xf32> -> vector<8x256xf32>
    %375 = arith.addf %373, %374 : vector<8x256xf32>
    %376 = vector.extract_strided_slice %375 {offsets = [0, 0], sizes = [8, 128], strides = [1, 1]} : vector<8x256xf32> to vector<8x128xf32>
    %377 = arith.negf %376 : vector<8x128xf32>
    %378 = math.exp %377 : vector<8x128xf32>
    %cst_129 = arith.constant 1.000000e+00 : f32
    %379 = vector.broadcast %cst_129 : f32 to vector<8x128xf32>
    %380 = arith.addf %379, %378 : vector<8x128xf32>
    %381 = arith.divf %379, %380 : vector<8x128xf32>
    %382 = vector.extract_strided_slice %375 {offsets = [0, 128], sizes = [8, 128], strides = [1, 1]} : vector<8x256xf32> to vector<8x128xf32>
    %383 = math.tanh %382 : vector<8x128xf32>
    %384 = arith.negf %382 : vector<8x128xf32>
    %385 = math.exp %384 : vector<8x128xf32>
    %cst_130 = arith.constant 1.000000e+00 : f32
    %386 = vector.broadcast %cst_130 : f32 to vector<8x128xf32>
    %387 = arith.addf %386, %385 : vector<8x128xf32>
    %388 = arith.divf %386, %387 : vector<8x128xf32>
    %389 = vector.shape_cast %23 : vector<1x128xi1> to vector<1x128xi1>
    %390 = vector.broadcast %389 : vector<1x128xi1> to vector<8x128xi1>
    %391 = arith.select %390, %383, %388 : vector<8x128xi1>, vector<8x128xf32>
    %392 = vector.extract_strided_slice %381 {offsets = [0, 0], sizes = [8, 64], strides = [1, 1]} : vector<8x128xf32> to vector<8x64xf32>
    %393 = vector.extract_strided_slice %381 {offsets = [0, 64], sizes = [8, 64], strides = [1, 1]} : vector<8x128xf32> to vector<8x64xf32>
    %394 = vector.extract_strided_slice %391 {offsets = [0, 0], sizes = [8, 64], strides = [1, 1]} : vector<8x128xf32> to vector<8x64xf32>
    %395 = vector.extract_strided_slice %391 {offsets = [0, 64], sizes = [8, 64], strides = [1, 1]} : vector<8x128xf32> to vector<8x64xf32>
    %396 = arith.mulf %393, %369 : vector<8x64xf32>
    %397 = arith.mulf %392, %394 : vector<8x64xf32>
    %398 = arith.addf %396, %397 : vector<8x64xf32>
    %399 = math.tanh %398 : vector<8x64xf32>
    %400 = arith.mulf %395, %399 : vector<8x64xf32>
    %401 = arith.select %92, %400, %370 : vector<8x64xi1>, vector<8x64xf32>
    %c56_131 = arith.constant 56 : index
    %c0_132 = arith.constant 0 : index
    %402 = vector.load %arg10[%c56_131, %c0_132] : memref<64x64xf32, #tpu.memory_space<vmem>>, vector<8x64xf32>
    tpu.vector_store %arg10[%c56_131, %c0_132], %401 masked %27 {strides = array<i32>} : memref<64x64xf32, #tpu.memory_space<vmem>>, vector<8x64xf32>, vector<8x64xi1>
    %c0_133 = arith.constant 0 : index
    %c0_134 = arith.constant 0 : index
    %403 = vector.load %arg10[%c0_133, %c0_134] : memref<64x64xf32, #tpu.memory_space<vmem>>, vector<8x64xf32>
    tpu.vector_store %arg10[%c0_133, %c0_134], %401 masked %28 {strides = array<i32>} : memref<64x64xf32, #tpu.memory_space<vmem>>, vector<8x64xf32>, vector<8x64xi1>
    %404 = vector.extract_strided_slice %401 {offsets = [0, 0], sizes = [8, 32], strides = [1, 1]} : vector<8x64xf32> to vector<8x32xf32>
    %405 = arith.addf %93, %404 : vector<8x32xf32>
    %406 = vector.extract_strided_slice %401 {offsets = [0, 32], sizes = [8, 32], strides = [1, 1]} : vector<8x64xf32> to vector<8x32xf32>
    %407 = arith.addf %405, %406 : vector<8x32xf32>
    %c0_135 = arith.constant 0 : index
    %c0_136 = arith.constant 0 : index
    %408 = vector.load %arg10[%c0_135, %c0_136] : memref<64x64xf32, #tpu.memory_space<vmem>>, vector<64x64xf32>
    %c0_137 = arith.constant 0 : index
    %c0_138 = arith.constant 0 : index
    %409 = vector.load %arg5[%c0_137, %c0_138] : memref<64x256xf32, #tpu.memory_space<vmem>>, vector<64x256xf32>
    %cst_139 = arith.constant dense<0.000000e+00> : vector<64x256xf32>
    %410 = tpu.matmul %408, %409, %cst_139 {dimension_numbers = #tpu.dot_dimension_numbers<[1], [0], [0], [1], [0, 0, 1, 1], [], []>} : vector<64x64xf32>, vector<64x256xf32>, vector<64x256xf32> -> vector<64x256xf32>
    %c0_140 = arith.constant 0 : index
    %c0_141 = arith.constant 0 : index
    %411 = vector.load %arg7[%c0_140, %c0_141] : memref<1x256xf32, #tpu.memory_space<vmem>>, vector<1x256xf32>
    %412 = vector.broadcast %411 : vector<1x256xf32> to vector<64x256xf32>
    %413 = arith.addf %410, %412 : vector<64x256xf32>
    %c0_142 = arith.constant 0 : index
    %c0_143 = arith.constant 0 : index
    %414 = vector.load %arg9[%c0_142, %c0_143] : memref<64x256xf32, #tpu.memory_space<vmem>>, vector<64x256xf32>
    tpu.vector_store %arg9[%c0_142, %c0_143], %413 {strides = array<i32>} : memref<64x256xf32, #tpu.memory_space<vmem>>, vector<64x256xf32>,
    %c0_144 = arith.constant 0 : index
    %c0_145 = arith.constant 0 : index
    %415 = vector.load %arg9[%c0_144, %c0_145] : memref<64x256xf32, #tpu.memory_space<vmem>>, vector<8x256xf32>
    %c56_146 = arith.constant 56 : index
    %c0_147 = arith.constant 0 : index
    %416 = vector.load %arg9[%c56_146, %c0_147] : memref<64x256xf32, #tpu.memory_space<vmem>>, vector<8x256xf32>
    %417 = vector.shape_cast %19 : vector<1x256xi1> to vector<1x256xi1>
    %418 = vector.broadcast %417 : vector<1x256xi1> to vector<8x256xi1>
    %419 = arith.select %418, %415, %416 : vector<8x256xi1>, vector<8x256xf32>
    %c0_148 = arith.constant 0 : index
    %c0_149 = arith.constant 0 : index
    %420 = vector.load %arg9[%c0_148, %c0_149] : memref<64x256xf32, #tpu.memory_space<vmem>>, vector<8x256xf32>
    tpu.vector_store %arg9[%c0_148, %c0_149], %419 {strides = array<i32>} : memref<64x256xf32, #tpu.memory_space<vmem>>, vector<8x256xf32>,
    %421 = vector.shape_cast %19 : vector<1x256xi1> to vector<1x256xi1>
    %422 = vector.broadcast %421 : vector<1x256xi1> to vector<8x256xi1>
    %423 = arith.select %422, %416, %415 : vector<8x256xi1>, vector<8x256xf32>
    %c56_150 = arith.constant 56 : index
    %c0_151 = arith.constant 0 : index
    %424 = vector.load %arg9[%c56_150, %c0_151] : memref<64x256xf32, #tpu.memory_space<vmem>>, vector<8x256xf32>
    tpu.vector_store %arg9[%c56_150, %c0_151], %423 {strides = array<i32>} : memref<64x256xf32, #tpu.memory_space<vmem>>, vector<8x256xf32>,
    %c8_152 = arith.constant 8 : index
    %c0_153 = arith.constant 0 : index
    %425 = vector.load %arg9[%c8_152, %c0_153] : memref<64x256xf32, #tpu.memory_space<vmem>>, vector<8x256xf32>
    %c48_154 = arith.constant 48 : index
    %c0_155 = arith.constant 0 : index
    %426 = vector.load %arg9[%c48_154, %c0_155] : memref<64x256xf32, #tpu.memory_space<vmem>>, vector<8x256xf32>
    %427 = vector.shape_cast %19 : vector<1x256xi1> to vector<1x256xi1>
    %428 = vector.broadcast %427 : vector<1x256xi1> to vector<8x256xi1>
    %429 = arith.select %428, %425, %426 : vector<8x256xi1>, vector<8x256xf32>
    %c8_156 = arith.constant 8 : index
    %c0_157 = arith.constant 0 : index
    %430 = vector.load %arg9[%c8_156, %c0_157] : memref<64x256xf32, #tpu.memory_space<vmem>>, vector<8x256xf32>
    tpu.vector_store %arg9[%c8_156, %c0_157], %429 {strides = array<i32>} : memref<64x256xf32, #tpu.memory_space<vmem>>, vector<8x256xf32>,
    %431 = vector.shape_cast %19 : vector<1x256xi1> to vector<1x256xi1>
    %432 = vector.broadcast %431 : vector<1x256xi1> to vector<8x256xi1>
    %433 = arith.select %432, %426, %425 : vector<8x256xi1>, vector<8x256xf32>
    %c48_158 = arith.constant 48 : index
    %c0_159 = arith.constant 0 : index
    %434 = vector.load %arg9[%c48_158, %c0_159] : memref<64x256xf32, #tpu.memory_space<vmem>>, vector<8x256xf32>
    tpu.vector_store %arg9[%c48_158, %c0_159], %433 {strides = array<i32>} : memref<64x256xf32, #tpu.memory_space<vmem>>, vector<8x256xf32>,
    %c16_160 = arith.constant 16 : index
    %c0_161 = arith.constant 0 : index
    %435 = vector.load %arg9[%c16_160, %c0_161] : memref<64x256xf32, #tpu.memory_space<vmem>>, vector<8x256xf32>
    %c40_162 = arith.constant 40 : index
    %c0_163 = arith.constant 0 : index
    %436 = vector.load %arg9[%c40_162, %c0_163] : memref<64x256xf32, #tpu.memory_space<vmem>>, vector<8x256xf32>
    %437 = vector.shape_cast %19 : vector<1x256xi1> to vector<1x256xi1>
    %438 = vector.broadcast %437 : vector<1x256xi1> to vector<8x256xi1>
    %439 = arith.select %438, %435, %436 : vector<8x256xi1>, vector<8x256xf32>
    %c16_164 = arith.constant 16 : index
    %c0_165 = arith.constant 0 : index
    %440 = vector.load %arg9[%c16_164, %c0_165] : memref<64x256xf32, #tpu.memory_space<vmem>>, vector<8x256xf32>
    tpu.vector_store %arg9[%c16_164, %c0_165], %439 {strides = array<i32>} : memref<64x256xf32, #tpu.memory_space<vmem>>, vector<8x256xf32>,
    %441 = vector.shape_cast %19 : vector<1x256xi1> to vector<1x256xi1>
    %442 = vector.broadcast %441 : vector<1x256xi1> to vector<8x256xi1>
    %443 = arith.select %442, %436, %435 : vector<8x256xi1>, vector<8x256xf32>
    %c40_166 = arith.constant 40 : index
    %c0_167 = arith.constant 0 : index
    %444 = vector.load %arg9[%c40_166, %c0_167] : memref<64x256xf32, #tpu.memory_space<vmem>>, vector<8x256xf32>
    tpu.vector_store %arg9[%c40_166, %c0_167], %443 {strides = array<i32>} : memref<64x256xf32, #tpu.memory_space<vmem>>, vector<8x256xf32>,
    %c24_168 = arith.constant 24 : index
    %c0_169 = arith.constant 0 : index
    %445 = vector.load %arg9[%c24_168, %c0_169] : memref<64x256xf32, #tpu.memory_space<vmem>>, vector<8x256xf32>
    %c32_170 = arith.constant 32 : index
    %c0_171 = arith.constant 0 : index
    %446 = vector.load %arg9[%c32_170, %c0_171] : memref<64x256xf32, #tpu.memory_space<vmem>>, vector<8x256xf32>
    %447 = vector.shape_cast %19 : vector<1x256xi1> to vector<1x256xi1>
    %448 = vector.broadcast %447 : vector<1x256xi1> to vector<8x256xi1>
    %449 = arith.select %448, %445, %446 : vector<8x256xi1>, vector<8x256xf32>
    %c24_172 = arith.constant 24 : index
    %c0_173 = arith.constant 0 : index
    %450 = vector.load %arg9[%c24_172, %c0_173] : memref<64x256xf32, #tpu.memory_space<vmem>>, vector<8x256xf32>
    tpu.vector_store %arg9[%c24_172, %c0_173], %449 {strides = array<i32>} : memref<64x256xf32, #tpu.memory_space<vmem>>, vector<8x256xf32>,
    %451 = vector.shape_cast %19 : vector<1x256xi1> to vector<1x256xi1>
    %452 = vector.broadcast %451 : vector<1x256xi1> to vector<8x256xi1>
    %453 = arith.select %452, %446, %445 : vector<8x256xi1>, vector<8x256xf32>
    %c32_174 = arith.constant 32 : index
    %c0_175 = arith.constant 0 : index
    %454 = vector.load %arg9[%c32_174, %c0_175] : memref<64x256xf32, #tpu.memory_space<vmem>>, vector<8x256xf32>
    tpu.vector_store %arg9[%c32_174, %c0_175], %453 {strides = array<i32>} : memref<64x256xf32, #tpu.memory_space<vmem>>, vector<8x256xf32>,
    %c0_176 = arith.constant 0 : index
    %c0_177 = arith.constant 0 : index
    %455 = vector.load %arg6[%c0_176, %c0_177] : memref<64x256xf32, #tpu.memory_space<vmem>>, vector<64x256xf32>
    %cst_178 = arith.constant 0.000000e+00 : f32
    %456 = vector.broadcast %cst_178 : f32 to vector<8x64xf32>
    %cst_179 = arith.constant 0.000000e+00 : f32
    %457 = vector.broadcast %cst_179 : f32 to vector<8x64xf32>
    %c0_180 = arith.constant 0 : index
    %c0_181 = arith.constant 0 : index
    %458 = vector.load %arg9[%c0_180, %c0_181] : memref<64x256xf32, #tpu.memory_space<vmem>>, vector<8x256xf32>
    %cst_182 = arith.constant dense<0.000000e+00> : vector<8x256xf32>
    %459 = tpu.matmul %456, %455, %cst_182 {dimension_numbers = #tpu.dot_dimension_numbers<[1], [0], [0], [1], [0, 0, 1, 1], [], []>} : vector<8x64xf32>, vector<64x256xf32>, vector<8x256xf32> -> vector<8x256xf32>
    %460 = arith.addf %458, %459 : vector<8x256xf32>
    %461 = vector.extract_strided_slice %460 {offsets = [0, 0], sizes = [8, 128], strides = [1, 1]} : vector<8x256xf32> to vector<8x128xf32>
    %462 = arith.negf %461 : vector<8x128xf32>
    %463 = math.exp %462 : vector<8x128xf32>
    %cst_183 = arith.constant 1.000000e+00 : f32
    %464 = vector.broadcast %cst_183 : f32 to vector<8x128xf32>
    %465 = arith.addf %464, %463 : vector<8x128xf32>
    %466 = arith.divf %464, %465 : vector<8x128xf32>
    %467 = vector.extract_strided_slice %460 {offsets = [0, 128], sizes = [8, 128], strides = [1, 1]} : vector<8x256xf32> to vector<8x128xf32>
    %468 = math.tanh %467 : vector<8x128xf32>
    %469 = arith.negf %467 : vector<8x128xf32>
    %470 = math.exp %469 : vector<8x128xf32>
    %cst_184 = arith.constant 1.000000e+00 : f32
    %471 = vector.broadcast %cst_184 : f32 to vector<8x128xf32>
    %472 = arith.addf %471, %470 : vector<8x128xf32>
    %473 = arith.divf %471, %472 : vector<8x128xf32>
    %474 = vector.shape_cast %23 : vector<1x128xi1> to vector<1x128xi1>
    %475 = vector.broadcast %474 : vector<1x128xi1> to vector<8x128xi1>
    %476 = arith.select %475, %468, %473 : vector<8x128xi1>, vector<8x128xf32>
    %477 = vector.extract_strided_slice %466 {offsets = [0, 0], sizes = [8, 64], strides = [1, 1]} : vector<8x128xf32> to vector<8x64xf32>
    %478 = vector.extract_strided_slice %466 {offsets = [0, 64], sizes = [8, 64], strides = [1, 1]} : vector<8x128xf32> to vector<8x64xf32>
    %479 = vector.extract_strided_slice %476 {offsets = [0, 0], sizes = [8, 64], strides = [1, 1]} : vector<8x128xf32> to vector<8x64xf32>
    %480 = vector.extract_strided_slice %476 {offsets = [0, 64], sizes = [8, 64], strides = [1, 1]} : vector<8x128xf32> to vector<8x64xf32>
    %481 = arith.mulf %478, %457 : vector<8x64xf32>
    %482 = arith.mulf %477, %479 : vector<8x64xf32>
    %483 = arith.addf %481, %482 : vector<8x64xf32>
    %484 = math.tanh %483 : vector<8x64xf32>
    %485 = arith.mulf %480, %484 : vector<8x64xf32>
    %486 = arith.select %36, %483, %457 : vector<8x64xi1>, vector<8x64xf32>
    %487 = arith.select %36, %485, %456 : vector<8x64xi1>, vector<8x64xf32>
    %c8_185 = arith.constant 8 : index
    %c0_186 = arith.constant 0 : index
    %488 = vector.load %arg9[%c8_185, %c0_186] : memref<64x256xf32, #tpu.memory_space<vmem>>, vector<8x256xf32>
    %cst_187 = arith.constant dense<0.000000e+00> : vector<8x256xf32>
    %489 = tpu.matmul %487, %455, %cst_187 {dimension_numbers = #tpu.dot_dimension_numbers<[1], [0], [0], [1], [0, 0, 1, 1], [], []>} : vector<8x64xf32>, vector<64x256xf32>, vector<8x256xf32> -> vector<8x256xf32>
    %490 = arith.addf %488, %489 : vector<8x256xf32>
    %491 = vector.extract_strided_slice %490 {offsets = [0, 0], sizes = [8, 128], strides = [1, 1]} : vector<8x256xf32> to vector<8x128xf32>
    %492 = arith.negf %491 : vector<8x128xf32>
    %493 = math.exp %492 : vector<8x128xf32>
    %cst_188 = arith.constant 1.000000e+00 : f32
    %494 = vector.broadcast %cst_188 : f32 to vector<8x128xf32>
    %495 = arith.addf %494, %493 : vector<8x128xf32>
    %496 = arith.divf %494, %495 : vector<8x128xf32>
    %497 = vector.extract_strided_slice %490 {offsets = [0, 128], sizes = [8, 128], strides = [1, 1]} : vector<8x256xf32> to vector<8x128xf32>
    %498 = math.tanh %497 : vector<8x128xf32>
    %499 = arith.negf %497 : vector<8x128xf32>
    %500 = math.exp %499 : vector<8x128xf32>
    %cst_189 = arith.constant 1.000000e+00 : f32
    %501 = vector.broadcast %cst_189 : f32 to vector<8x128xf32>
    %502 = arith.addf %501, %500 : vector<8x128xf32>
    %503 = arith.divf %501, %502 : vector<8x128xf32>
    %504 = vector.shape_cast %23 : vector<1x128xi1> to vector<1x128xi1>
    %505 = vector.broadcast %504 : vector<1x128xi1> to vector<8x128xi1>
    %506 = arith.select %505, %498, %503 : vector<8x128xi1>, vector<8x128xf32>
    %507 = vector.extract_strided_slice %496 {offsets = [0, 0], sizes = [8, 64], strides = [1, 1]} : vector<8x128xf32> to vector<8x64xf32>
    %508 = vector.extract_strided_slice %496 {offsets = [0, 64], sizes = [8, 64], strides = [1, 1]} : vector<8x128xf32> to vector<8x64xf32>
    %509 = vector.extract_strided_slice %506 {offsets = [0, 0], sizes = [8, 64], strides = [1, 1]} : vector<8x128xf32> to vector<8x64xf32>
    %510 = vector.extract_strided_slice %506 {offsets = [0, 64], sizes = [8, 64], strides = [1, 1]} : vector<8x128xf32> to vector<8x64xf32>
    %511 = arith.mulf %508, %486 : vector<8x64xf32>
    %512 = arith.mulf %507, %509 : vector<8x64xf32>
    %513 = arith.addf %511, %512 : vector<8x64xf32>
    %514 = math.tanh %513 : vector<8x64xf32>
    %515 = arith.mulf %510, %514 : vector<8x64xf32>
    %516 = arith.select %44, %513, %486 : vector<8x64xi1>, vector<8x64xf32>
    %517 = arith.select %44, %515, %487 : vector<8x64xi1>, vector<8x64xf32>
    %c16_190 = arith.constant 16 : index
    %c0_191 = arith.constant 0 : index
    %518 = vector.load %arg9[%c16_190, %c0_191] : memref<64x256xf32, #tpu.memory_space<vmem>>, vector<8x256xf32>
    %cst_192 = arith.constant dense<0.000000e+00> : vector<8x256xf32>
    %519 = tpu.matmul %517, %455, %cst_192 {dimension_numbers = #tpu.dot_dimension_numbers<[1], [0], [0], [1], [0, 0, 1, 1], [], []>} : vector<8x64xf32>, vector<64x256xf32>, vector<8x256xf32> -> vector<8x256xf32>
    %520 = arith.addf %518, %519 : vector<8x256xf32>
    %521 = vector.extract_strided_slice %520 {offsets = [0, 0], sizes = [8, 128], strides = [1, 1]} : vector<8x256xf32> to vector<8x128xf32>
    %522 = arith.negf %521 : vector<8x128xf32>
    %523 = math.exp %522 : vector<8x128xf32>
    %cst_193 = arith.constant 1.000000e+00 : f32
    %524 = vector.broadcast %cst_193 : f32 to vector<8x128xf32>
    %525 = arith.addf %524, %523 : vector<8x128xf32>
    %526 = arith.divf %524, %525 : vector<8x128xf32>
    %527 = vector.extract_strided_slice %520 {offsets = [0, 128], sizes = [8, 128], strides = [1, 1]} : vector<8x256xf32> to vector<8x128xf32>
    %528 = math.tanh %527 : vector<8x128xf32>
    %529 = arith.negf %527 : vector<8x128xf32>
    %530 = math.exp %529 : vector<8x128xf32>
    %cst_194 = arith.constant 1.000000e+00 : f32
    %531 = vector.broadcast %cst_194 : f32 to vector<8x128xf32>
    %532 = arith.addf %531, %530 : vector<8x128xf32>
    %533 = arith.divf %531, %532 : vector<8x128xf32>
    %534 = vector.shape_cast %23 : vector<1x128xi1> to vector<1x128xi1>
    %535 = vector.broadcast %534 : vector<1x128xi1> to vector<8x128xi1>
    %536 = arith.select %535, %528, %533 : vector<8x128xi1>, vector<8x128xf32>
    %537 = vector.extract_strided_slice %526 {offsets = [0, 0], sizes = [8, 64], strides = [1, 1]} : vector<8x128xf32> to vector<8x64xf32>
    %538 = vector.extract_strided_slice %526 {offsets = [0, 64], sizes = [8, 64], strides = [1, 1]} : vector<8x128xf32> to vector<8x64xf32>
    %539 = vector.extract_strided_slice %536 {offsets = [0, 0], sizes = [8, 64], strides = [1, 1]} : vector<8x128xf32> to vector<8x64xf32>
    %540 = vector.extract_strided_slice %536 {offsets = [0, 64], sizes = [8, 64], strides = [1, 1]} : vector<8x128xf32> to vector<8x64xf32>
    %541 = arith.mulf %538, %516 : vector<8x64xf32>
    %542 = arith.mulf %537, %539 : vector<8x64xf32>
    %543 = arith.addf %541, %542 : vector<8x64xf32>
    %544 = math.tanh %543 : vector<8x64xf32>
    %545 = arith.mulf %540, %544 : vector<8x64xf32>
    %546 = arith.select %52, %543, %516 : vector<8x64xi1>, vector<8x64xf32>
    %547 = arith.select %52, %545, %517 : vector<8x64xi1>, vector<8x64xf32>
    %c24_195 = arith.constant 24 : index
    %c0_196 = arith.constant 0 : index
    %548 = vector.load %arg9[%c24_195, %c0_196] : memref<64x256xf32, #tpu.memory_space<vmem>>, vector<8x256xf32>
    %cst_197 = arith.constant dense<0.000000e+00> : vector<8x256xf32>
    %549 = tpu.matmul %547, %455, %cst_197 {dimension_numbers = #tpu.dot_dimension_numbers<[1], [0], [0], [1], [0, 0, 1, 1], [], []>} : vector<8x64xf32>, vector<64x256xf32>, vector<8x256xf32> -> vector<8x256xf32>
    %550 = arith.addf %548, %549 : vector<8x256xf32>
    %551 = vector.extract_strided_slice %550 {offsets = [0, 0], sizes = [8, 128], strides = [1, 1]} : vector<8x256xf32> to vector<8x128xf32>
    %552 = arith.negf %551 : vector<8x128xf32>
    %553 = math.exp %552 : vector<8x128xf32>
    %cst_198 = arith.constant 1.000000e+00 : f32
    %554 = vector.broadcast %cst_198 : f32 to vector<8x128xf32>
    %555 = arith.addf %554, %553 : vector<8x128xf32>
    %556 = arith.divf %554, %555 : vector<8x128xf32>
    %557 = vector.extract_strided_slice %550 {offsets = [0, 128], sizes = [8, 128], strides = [1, 1]} : vector<8x256xf32> to vector<8x128xf32>
    %558 = math.tanh %557 : vector<8x128xf32>
    %559 = arith.negf %557 : vector<8x128xf32>
    %560 = math.exp %559 : vector<8x128xf32>
    %cst_199 = arith.constant 1.000000e+00 : f32
    %561 = vector.broadcast %cst_199 : f32 to vector<8x128xf32>
    %562 = arith.addf %561, %560 : vector<8x128xf32>
    %563 = arith.divf %561, %562 : vector<8x128xf32>
    %564 = vector.shape_cast %23 : vector<1x128xi1> to vector<1x128xi1>
    %565 = vector.broadcast %564 : vector<1x128xi1> to vector<8x128xi1>
    %566 = arith.select %565, %558, %563 : vector<8x128xi1>, vector<8x128xf32>
    %567 = vector.extract_strided_slice %556 {offsets = [0, 0], sizes = [8, 64], strides = [1, 1]} : vector<8x128xf32> to vector<8x64xf32>
    %568 = vector.extract_strided_slice %556 {offsets = [0, 64], sizes = [8, 64], strides = [1, 1]} : vector<8x128xf32> to vector<8x64xf32>
    %569 = vector.extract_strided_slice %566 {offsets = [0, 0], sizes = [8, 64], strides = [1, 1]} : vector<8x128xf32> to vector<8x64xf32>
    %570 = vector.extract_strided_slice %566 {offsets = [0, 64], sizes = [8, 64], strides = [1, 1]} : vector<8x128xf32> to vector<8x64xf32>
    %571 = arith.mulf %568, %546 : vector<8x64xf32>
    %572 = arith.mulf %567, %569 : vector<8x64xf32>
    %573 = arith.addf %571, %572 : vector<8x64xf32>
    %574 = math.tanh %573 : vector<8x64xf32>
    %575 = arith.mulf %570, %574 : vector<8x64xf32>
    %576 = arith.select %60, %573, %546 : vector<8x64xi1>, vector<8x64xf32>
    %577 = arith.select %60, %575, %547 : vector<8x64xi1>, vector<8x64xf32>
    %c32_200 = arith.constant 32 : index
    %c0_201 = arith.constant 0 : index
    %578 = vector.load %arg9[%c32_200, %c0_201] : memref<64x256xf32, #tpu.memory_space<vmem>>, vector<8x256xf32>
    %cst_202 = arith.constant dense<0.000000e+00> : vector<8x256xf32>
    %579 = tpu.matmul %577, %455, %cst_202 {dimension_numbers = #tpu.dot_dimension_numbers<[1], [0], [0], [1], [0, 0, 1, 1], [], []>} : vector<8x64xf32>, vector<64x256xf32>, vector<8x256xf32> -> vector<8x256xf32>
    %580 = arith.addf %578, %579 : vector<8x256xf32>
    %581 = vector.extract_strided_slice %580 {offsets = [0, 0], sizes = [8, 128], strides = [1, 1]} : vector<8x256xf32> to vector<8x128xf32>
    %582 = arith.negf %581 : vector<8x128xf32>
    %583 = math.exp %582 : vector<8x128xf32>
    %cst_203 = arith.constant 1.000000e+00 : f32
    %584 = vector.broadcast %cst_203 : f32 to vector<8x128xf32>
    %585 = arith.addf %584, %583 : vector<8x128xf32>
    %586 = arith.divf %584, %585 : vector<8x128xf32>
    %587 = vector.extract_strided_slice %580 {offsets = [0, 128], sizes = [8, 128], strides = [1, 1]} : vector<8x256xf32> to vector<8x128xf32>
    %588 = math.tanh %587 : vector<8x128xf32>
    %589 = arith.negf %587 : vector<8x128xf32>
    %590 = math.exp %589 : vector<8x128xf32>
    %cst_204 = arith.constant 1.000000e+00 : f32
    %591 = vector.broadcast %cst_204 : f32 to vector<8x128xf32>
    %592 = arith.addf %591, %590 : vector<8x128xf32>
    %593 = arith.divf %591, %592 : vector<8x128xf32>
    %594 = vector.shape_cast %23 : vector<1x128xi1> to vector<1x128xi1>
    %595 = vector.broadcast %594 : vector<1x128xi1> to vector<8x128xi1>
    %596 = arith.select %595, %588, %593 : vector<8x128xi1>, vector<8x128xf32>
    %597 = vector.extract_strided_slice %586 {offsets = [0, 0], sizes = [8, 64], strides = [1, 1]} : vector<8x128xf32> to vector<8x64xf32>
    %598 = vector.extract_strided_slice %586 {offsets = [0, 64], sizes = [8, 64], strides = [1, 1]} : vector<8x128xf32> to vector<8x64xf32>
    %599 = vector.extract_strided_slice %596 {offsets = [0, 0], sizes = [8, 64], strides = [1, 1]} : vector<8x128xf32> to vector<8x64xf32>
    %600 = vector.extract_strided_slice %596 {offsets = [0, 64], sizes = [8, 64], strides = [1, 1]} : vector<8x128xf32> to vector<8x64xf32>
    %601 = arith.mulf %598, %576 : vector<8x64xf32>
    %602 = arith.mulf %597, %599 : vector<8x64xf32>
    %603 = arith.addf %601, %602 : vector<8x64xf32>
    %604 = math.tanh %603 : vector<8x64xf32>
    %605 = arith.mulf %600, %604 : vector<8x64xf32>
    %606 = arith.select %68, %603, %576 : vector<8x64xi1>, vector<8x64xf32>
    %607 = arith.select %68, %605, %577 : vector<8x64xi1>, vector<8x64xf32>
    %c40_205 = arith.constant 40 : index
    %c0_206 = arith.constant 0 : index
    %608 = vector.load %arg9[%c40_205, %c0_206] : memref<64x256xf32, #tpu.memory_space<vmem>>, vector<8x256xf32>
    %cst_207 = arith.constant dense<0.000000e+00> : vector<8x256xf32>
    %609 = tpu.matmul %607, %455, %cst_207 {dimension_numbers = #tpu.dot_dimension_numbers<[1], [0], [0], [1], [0, 0, 1, 1], [], []>} : vector<8x64xf32>, vector<64x256xf32>, vector<8x256xf32> -> vector<8x256xf32>
    %610 = arith.addf %608, %609 : vector<8x256xf32>
    %611 = vector.extract_strided_slice %610 {offsets = [0, 0], sizes = [8, 128], strides = [1, 1]} : vector<8x256xf32> to vector<8x128xf32>
    %612 = arith.negf %611 : vector<8x128xf32>
    %613 = math.exp %612 : vector<8x128xf32>
    %cst_208 = arith.constant 1.000000e+00 : f32
    %614 = vector.broadcast %cst_208 : f32 to vector<8x128xf32>
    %615 = arith.addf %614, %613 : vector<8x128xf32>
    %616 = arith.divf %614, %615 : vector<8x128xf32>
    %617 = vector.extract_strided_slice %610 {offsets = [0, 128], sizes = [8, 128], strides = [1, 1]} : vector<8x256xf32> to vector<8x128xf32>
    %618 = math.tanh %617 : vector<8x128xf32>
    %619 = arith.negf %617 : vector<8x128xf32>
    %620 = math.exp %619 : vector<8x128xf32>
    %cst_209 = arith.constant 1.000000e+00 : f32
    %621 = vector.broadcast %cst_209 : f32 to vector<8x128xf32>
    %622 = arith.addf %621, %620 : vector<8x128xf32>
    %623 = arith.divf %621, %622 : vector<8x128xf32>
    %624 = vector.shape_cast %23 : vector<1x128xi1> to vector<1x128xi1>
    %625 = vector.broadcast %624 : vector<1x128xi1> to vector<8x128xi1>
    %626 = arith.select %625, %618, %623 : vector<8x128xi1>, vector<8x128xf32>
    %627 = vector.extract_strided_slice %616 {offsets = [0, 0], sizes = [8, 64], strides = [1, 1]} : vector<8x128xf32> to vector<8x64xf32>
    %628 = vector.extract_strided_slice %616 {offsets = [0, 64], sizes = [8, 64], strides = [1, 1]} : vector<8x128xf32> to vector<8x64xf32>
    %629 = vector.extract_strided_slice %626 {offsets = [0, 0], sizes = [8, 64], strides = [1, 1]} : vector<8x128xf32> to vector<8x64xf32>
    %630 = vector.extract_strided_slice %626 {offsets = [0, 64], sizes = [8, 64], strides = [1, 1]} : vector<8x128xf32> to vector<8x64xf32>
    %631 = arith.mulf %628, %606 : vector<8x64xf32>
    %632 = arith.mulf %627, %629 : vector<8x64xf32>
    %633 = arith.addf %631, %632 : vector<8x64xf32>
    %634 = math.tanh %633 : vector<8x64xf32>
    %635 = arith.mulf %630, %634 : vector<8x64xf32>
    %636 = arith.select %76, %633, %606 : vector<8x64xi1>, vector<8x64xf32>
    %637 = arith.select %76, %635, %607 : vector<8x64xi1>, vector<8x64xf32>
    %c48_210 = arith.constant 48 : index
    %c0_211 = arith.constant 0 : index
    %638 = vector.load %arg9[%c48_210, %c0_211] : memref<64x256xf32, #tpu.memory_space<vmem>>, vector<8x256xf32>
    %cst_212 = arith.constant dense<0.000000e+00> : vector<8x256xf32>
    %639 = tpu.matmul %637, %455, %cst_212 {dimension_numbers = #tpu.dot_dimension_numbers<[1], [0], [0], [1], [0, 0, 1, 1], [], []>} : vector<8x64xf32>, vector<64x256xf32>, vector<8x256xf32> -> vector<8x256xf32>
    %640 = arith.addf %638, %639 : vector<8x256xf32>
    %641 = vector.extract_strided_slice %640 {offsets = [0, 0], sizes = [8, 128], strides = [1, 1]} : vector<8x256xf32> to vector<8x128xf32>
    %642 = arith.negf %641 : vector<8x128xf32>
    %643 = math.exp %642 : vector<8x128xf32>
    %cst_213 = arith.constant 1.000000e+00 : f32
    %644 = vector.broadcast %cst_213 : f32 to vector<8x128xf32>
    %645 = arith.addf %644, %643 : vector<8x128xf32>
    %646 = arith.divf %644, %645 : vector<8x128xf32>
    %647 = vector.extract_strided_slice %640 {offsets = [0, 128], sizes = [8, 128], strides = [1, 1]} : vector<8x256xf32> to vector<8x128xf32>
    %648 = math.tanh %647 : vector<8x128xf32>
    %649 = arith.negf %647 : vector<8x128xf32>
    %650 = math.exp %649 : vector<8x128xf32>
    %cst_214 = arith.constant 1.000000e+00 : f32
    %651 = vector.broadcast %cst_214 : f32 to vector<8x128xf32>
    %652 = arith.addf %651, %650 : vector<8x128xf32>
    %653 = arith.divf %651, %652 : vector<8x128xf32>
    %654 = vector.shape_cast %23 : vector<1x128xi1> to vector<1x128xi1>
    %655 = vector.broadcast %654 : vector<1x128xi1> to vector<8x128xi1>
    %656 = arith.select %655, %648, %653 : vector<8x128xi1>, vector<8x128xf32>
    %657 = vector.extract_strided_slice %646 {offsets = [0, 0], sizes = [8, 64], strides = [1, 1]} : vector<8x128xf32> to vector<8x64xf32>
    %658 = vector.extract_strided_slice %646 {offsets = [0, 64], sizes = [8, 64], strides = [1, 1]} : vector<8x128xf32> to vector<8x64xf32>
    %659 = vector.extract_strided_slice %656 {offsets = [0, 0], sizes = [8, 64], strides = [1, 1]} : vector<8x128xf32> to vector<8x64xf32>
    %660 = vector.extract_strided_slice %656 {offsets = [0, 64], sizes = [8, 64], strides = [1, 1]} : vector<8x128xf32> to vector<8x64xf32>
    %661 = arith.mulf %658, %636 : vector<8x64xf32>
    %662 = arith.mulf %657, %659 : vector<8x64xf32>
    %663 = arith.addf %661, %662 : vector<8x64xf32>
    %664 = math.tanh %663 : vector<8x64xf32>
    %665 = arith.mulf %660, %664 : vector<8x64xf32>
    %666 = arith.select %84, %663, %636 : vector<8x64xi1>, vector<8x64xf32>
    %667 = arith.select %84, %665, %637 : vector<8x64xi1>, vector<8x64xf32>
    %c56_215 = arith.constant 56 : index
    %c0_216 = arith.constant 0 : index
    %668 = vector.load %arg9[%c56_215, %c0_216] : memref<64x256xf32, #tpu.memory_space<vmem>>, vector<8x256xf32>
    %cst_217 = arith.constant dense<0.000000e+00> : vector<8x256xf32>
    %669 = tpu.matmul %667, %455, %cst_217 {dimension_numbers = #tpu.dot_dimension_numbers<[1], [0], [0], [1], [0, 0, 1, 1], [], []>} : vector<8x64xf32>, vector<64x256xf32>, vector<8x256xf32> -> vector<8x256xf32>
    %670 = arith.addf %668, %669 : vector<8x256xf32>
    %671 = vector.extract_strided_slice %670 {offsets = [0, 0], sizes = [8, 128], strides = [1, 1]} : vector<8x256xf32> to vector<8x128xf32>
    %672 = arith.negf %671 : vector<8x128xf32>
    %673 = math.exp %672 : vector<8x128xf32>
    %cst_218 = arith.constant 1.000000e+00 : f32
    %674 = vector.broadcast %cst_218 : f32 to vector<8x128xf32>
    %675 = arith.addf %674, %673 : vector<8x128xf32>
    %676 = arith.divf %674, %675 : vector<8x128xf32>
    %677 = vector.extract_strided_slice %670 {offsets = [0, 128], sizes = [8, 128], strides = [1, 1]} : vector<8x256xf32> to vector<8x128xf32>
    %678 = math.tanh %677 : vector<8x128xf32>
    %679 = arith.negf %677 : vector<8x128xf32>
    %680 = math.exp %679 : vector<8x128xf32>
    %cst_219 = arith.constant 1.000000e+00 : f32
    %681 = vector.broadcast %cst_219 : f32 to vector<8x128xf32>
    %682 = arith.addf %681, %680 : vector<8x128xf32>
    %683 = arith.divf %681, %682 : vector<8x128xf32>
    %684 = vector.shape_cast %23 : vector<1x128xi1> to vector<1x128xi1>
    %685 = vector.broadcast %684 : vector<1x128xi1> to vector<8x128xi1>
    %686 = arith.select %685, %678, %683 : vector<8x128xi1>, vector<8x128xf32>
    %687 = vector.extract_strided_slice %676 {offsets = [0, 0], sizes = [8, 64], strides = [1, 1]} : vector<8x128xf32> to vector<8x64xf32>
    %688 = vector.extract_strided_slice %676 {offsets = [0, 64], sizes = [8, 64], strides = [1, 1]} : vector<8x128xf32> to vector<8x64xf32>
    %689 = vector.extract_strided_slice %686 {offsets = [0, 0], sizes = [8, 64], strides = [1, 1]} : vector<8x128xf32> to vector<8x64xf32>
    %690 = vector.extract_strided_slice %686 {offsets = [0, 64], sizes = [8, 64], strides = [1, 1]} : vector<8x128xf32> to vector<8x64xf32>
    %691 = arith.mulf %688, %666 : vector<8x64xf32>
    %692 = arith.mulf %687, %689 : vector<8x64xf32>
    %693 = arith.addf %691, %692 : vector<8x64xf32>
    %694 = math.tanh %693 : vector<8x64xf32>
    %695 = arith.mulf %690, %694 : vector<8x64xf32>
    %696 = arith.select %92, %695, %667 : vector<8x64xi1>, vector<8x64xf32>
    %697 = vector.extract_strided_slice %696 {offsets = [0, 0], sizes = [8, 32], strides = [1, 1]} : vector<8x64xf32> to vector<8x32xf32>
    %698 = arith.addf %407, %697 : vector<8x32xf32>
    %699 = vector.extract_strided_slice %696 {offsets = [0, 32], sizes = [8, 32], strides = [1, 1]} : vector<8x64xf32> to vector<8x32xf32>
    %700 = arith.addf %698, %699 : vector<8x32xf32>
    %c0_220 = arith.constant 0 : index
    %c0_221 = arith.constant 0 : index
    %701 = vector.load %arg8[%c0_220, %c0_221] : memref<8x32xf32, #tpu.memory_space<vmem>>, vector<8x32xf32>
    tpu.vector_store %arg8[%c0_220, %c0_221], %700 {strides = array<i32>} : memref<8x32xf32, #tpu.memory_space<vmem>>, vector<8x32xf32>,
    return
  }
}

</mosaic_0001>

<bundles_post_ra>
// kernel: st_encoder_forward.1
= control target key start
LH: loop header
LB: loop body
LE: loop exit
PB: predicated region body
PF: predicated region fallthrough
CT: control target
= control target key end

     0   :  { %13 = vsyncpa [#allocation5], 0  ;;  %s4132_s0 = inlined_call_operand.vmem [shape: s32[64,1], index: 0, kind: input, shape index: {}]   ;;  %s4133_s1 = inlined_call_operand.vmem [shape: s32[8,1], index: 1, kind: input, shape index: {}]   ;;  %s4134_s2 = inlined_call_operand.vmem [shape: f32[64,256], index: 2, kind: input, shape index: {}]   ;;  %s4135_s3 = inlined_call_operand.hbm [shape: f32[64,256], index: 3, kind: input, shape index: {}]   ;;  %s4136_s4 = inlined_call_operand.vmem [shape: f32[1,256], index: 4, kind: input, shape index: {}]   ;;  %s4137_s5 = inlined_call_operand.hbm [shape: f32[64,256], index: 5, kind: input, shape index: {}]   ;;  %s4138_s6 = inlined_call_operand.hbm [shape: f32[64,256], index: 6, kind: input, shape index: {}]   ;;  %s4139_s7 = inlined_call_operand.vmem [shape: f32[1,256], index: 7, kind: input, shape index: {}]   ;;  %s4140_s8 = inlined_call_operand.hbm [shape: f32[8,32], index: 8, kind: output, shape index: {}]  }
   0x1   :  { %14 = vsyncpa [#allocation8], 0 }
   0x2   :  { %15 = vsyncpa [#allocation6], 0  ;;  %s2921_s27 = smov [#allocation7]   ;;  %s2922_s29 = smov [#allocation4]  }
   0x3   :  { %s41_s28 = sshll.u32 %s2921_s27, 4  ;;  %s27_s30 = sshll.u32 %s2922_s29, 4  ;;  %s42_s28 = int_to_ptr.vmem [resolvable:$true] %s41_s28  ;;  %s28_s30 = int_to_ptr.vmem [resolvable:$true] %s27_s30 }
   0x4   :  { %s2843_s9 = scalar_lea.vmem %s42_s28, 2048  ;;  %p2848_p1 = scmp.lt.s32.totalorder %s42_s28, %s42_s28 }
   0x5   :  { %p2844_p0 = scmp.ne.s32.totalorder %s42_s28, %s2843_s9  ;;  %p2849_p2 = scmp.lt.s32.totalorder %s2843_s9, %s2843_s9 }
   0x7   :  { %p2850_p3 = por %p2849_p2, %p2848_p1 }
   0x9   :  { %p2851_p4 = pnand %p2850_p3, %p2844_p0 }
   0xb   :  { %2854 = shalt.err (!%p2851_p4)
}
   0xc   :  { %s2923_s10 = smov 256   ;;  %s2924_s11 = smov 16  }
   0xd   :  { %47 = dma.hbm_to_vmem [thread:$0]  %s4137_s5, 2048, %s42_s28, [#allocation8], %s2923_s10, %s2923_s10, %s2924_s11  }
   0xe   :  { %s2863_s14 = scalar_lea.vmem %s28_s30, 2048  ;;  %p2868_p6 = scmp.lt.s32.totalorder %s28_s30, %s28_s30 }
   0xf   :  { %p2864_p5 = scmp.ne.s32.totalorder %s28_s30, %s2863_s14  ;;  %p2869_p7 = scmp.lt.s32.totalorder %s2863_s14, %s2863_s14 }
  0x11   :  { %p2870_p8 = por %p2869_p7, %p2868_p6 }
  0x13   :  { %p2871_p9 = pnand %p2870_p8, %p2864_p5 }
  0x15   :  { %2874 = shalt.err (!%p2871_p9)
}
  0x16   :  { %33 = dma.hbm_to_vmem [thread:$0]  %s4135_s3, 2048, %s28_s30, [#allocation5], %s2923_s10, %s2923_s10, %s2924_s11  }
  0x17   :  { %s2925_s17 = smov [#allocation9]  }
  0x18   :  { %s53_s18 = sshll.u32 %s2925_s17, 4  ;;  %s54_s18 = int_to_ptr.vmem [resolvable:$true] %s53_s18 }
  0x19   :  { %s2883_s19 = scalar_lea.vmem %s54_s18, 2048  ;;  %p2888_p11 = scmp.lt.s32.totalorder %s54_s18, %s54_s18 }
  0x1a   :  { %p2884_p10 = scmp.ne.s32.totalorder %s54_s18, %s2883_s19  ;;  %p2889_p12 = scmp.lt.s32.totalorder %s2883_s19, %s2883_s19 }
  0x1c   :  { %p2890_p13 = por %p2889_p12, %p2888_p11 }
  0x1e   :  { %p2891_p0 = pnand %p2890_p13, %p2884_p10 }
  0x20   :  { %2894 = shalt.err (!%p2891_p0)
}
  0x21   :  { %59 = dma.hbm_to_vmem [thread:$0]  %s4138_s6, 2048, %s54_s18, [#allocation8], %s2923_s10, %s2923_s10, %s2924_s11  }
  0x22   :  { %2915 = dma.done.wait [#allocation5], 2048  }
  0x23   :  { %2916 = vsyncadd [#allocation5], 4294965248 }
  0x24   :  { %2917 = dma.done.wait [#allocation8], 4096  }
  0x25   :  { %2918 = vsyncadd [#allocation8], 4294963200  ;;  %v4143_v0 = vmov 0   ;;  %v2927_v1 = vmov 0.0   ;;  %v127_v2 = vld [vmem:[%s4132_s0 + $0x10] sm:$0xff]  ;;  %v125_v3 = vld [vmem:[%s4132_s0] sm:$0xff]  ;;  %v72_v43 = vlaneseq }
  0x26   :  { %2642 = vset.pattern.permute.xlu1 %v4143_v0  ;;  %2641 = vset.pattern.permute.xlu0 %v4143_v0  ;;  %v128_v4 = vld [vmem:[%s4132_s0 + $0x18] sm:$0xff]  ;;  %v126_v5 = vld [vmem:[%s4132_s0 + $0x8] sm:$0xff]  ;;  %v195_v7 = vld [vmem:[%s4134_s2 + $0x70] sm:$0xff]  ;;  %vm209_vm0 = vcmask 523264   ;;  %vm2930_vm14 = vmmov 1   ;;  %s2938_s21 = smov [#allocation10]  }
  0x27   :  { %298 = vmatprep.mubr.f32.mxu0 %v2927_v1  ;;  %500 = vmatprep.mubr.f32.mxu1 %v2927_v1  ;;  %v196_v6 = vld [vmem:[%s4134_s2 + $0x78] sm:$0xff]  ;;  %v194_v8 = vld [vmem:[%s4134_s2 + $0x68] sm:$0xff]  ;;  %v193_v9 = vld [vmem:[%s4134_s2 + $0x60] sm:$0xff]  ;;  %v3140_v44 = vand.u32 127, %v72_v43  ;;  %v3190_v61 = vshrl.u32 %v72_v43, 7  ;;  %s2543_s22 = sshll.u32 %s2938_s21, 4  ;;  %s2544_s22 = int_to_ptr.vmem [resolvable:$true] %s2543_s22 }
  0x28   :  { %140 = vperm.xlu1 %2642, %v127_v2   ;;  %134 = vperm.xlu0 %2641, %v125_v3   ;;  %v130_v10 = vld [vmem:[%s4132_s0 + $0x28] sm:$0xff]  ;;  %v129_v11 = vld [vmem:[%s4132_s0 + $0x20] sm:$0xff]  ;;  %v192_v12 = vld [vmem:[%s4134_s2 + $0x58] sm:$0xff]  ;;  %s2895_s6 = scalar_lea.vmem %s2544_s22, 128  ;;  %p2900_p2 = scmp.lt.s32.totalorder %s2544_s22, %s2544_s22 }
  0x29   :  { %250 = vmatprep.subr.mxu0 %v196_v6  ;;  %v191_v13 = vld [vmem:[%s4134_s2 + $0x50] sm:$0xff]  ;;  %v190_v14 = vld [vmem:[%s4134_s2 + $0x48] sm:$0xff]  ;;  %v132_v15 = vld [vmem:[%s4132_s0 + $0x38] sm:$0xff]  ;;  %v4142_v62 = vsub.s32 0, %v3190_v61  ;;  %v4141_v3 = vsub.s32 1, %v3190_v61  ;;  %vm101_vm11 = vcmp.lt.s32.totalorder %v3140_v44, 64  ;;  %p2896_p1 = scmp.ne.s32.totalorder %s2544_s22, %s2895_s6  ;;  %p2901_p3 = scmp.lt.s32.totalorder %s2895_s6, %s2895_s6 }
  0x2a   :  { %251 = vmatpush1.msra.mxu0 %v195_v7  ;;  %v131_v16 = vld [vmem:[%s4132_s0 + $0x30] sm:$0xff]  ;;  %v189_v17 = vld [vmem:[%s4134_s2 + $0x40] sm:$0xff]  ;;  %v3045_v18 = vld [vmem:[#allocation4 + $0x78] sm:$0xff]  ;;  %vm102_vm12 = vcmp.lt.s32.totalorder %v3140_v44, 32 }
  0x2b   :  { %252 = vmatprep.subr.mxu0 %v194_v8  ;;  %v188_v19 = vld [vmem:[%s4134_s2 + $0x38] sm:$0xff]  ;;  %452 = vmatprep.subr.mxu1 %v3045_v18  ;;  %v3051_v20 = vld [vmem:[#allocation4 + $0x70] sm:$0xff]  ;;  %v3053_v21 = vld [vmem:[#allocation4 + $0x68] sm:$0xff]  ;;  %p2902_p4 = por %p2901_p3, %p2900_p2 }
  0x2c   :  { %143 = vperm.xlu1 %2642, %v128_v4   ;;  %137 = vperm.xlu0 %2641, %v126_v5   ;;  %v187_v22 = vld [vmem:[%s4134_s2 + $0x30] sm:$0xff]  ;;  %v71_v23 = vld [vmem:[%s4133_s1] sm:$0xff]  ;;  %v186_v24 = vld [vmem:[%s4134_s2 + $0x28] sm:$0xff] }
  0x2d   :  { %253 = vmatpush1.msra.mxu0 %v193_v9  ;;  %453 = vmatpush1.msra.mxu1 %v3051_v20  ;;  %v3065_v25 = vld [vmem:[#allocation4 + $0x60] sm:$0xff]  ;;  %v3071_v27 = vld [vmem:[#allocation4 + $0x58] sm:$0xff]  ;;  %v3077_v29 = vld [vmem:[#allocation4 + $0x50] sm:$0xff]  ;;  %p2903_p5 = pnand %p2902_p4, %p2896_p1 }
  0x2e   :  { %254 = vmatprep.subr.mxu0 %v192_v12  ;;  %v185_v26 = vld [vmem:[%s4134_s2 + $0x20] sm:$0xff]  ;;  %454 = vmatprep.subr.mxu1 %v3053_v21  ;;  %v184_v28 = vld [vmem:[%s4134_s2 + $0x18] sm:$0xff]  ;;  %v183_v30 = vld [vmem:[%s4134_s2 + $0x10] sm:$0xff] }
  0x2f   :  { %255 = vmatpush1.msra.mxu0 %v191_v13  ;;  %455 = vmatpush1.msra.mxu1 %v3065_v25  ;;  %v3082_v31 = vld [vmem:[#allocation4 + $0x48] sm:$0xff]  ;;  %v3088_v33 = vld [vmem:[#allocation4 + $0x40] sm:$0xff]  ;;  %v3094_v35 = vld [vmem:[#allocation4 + $0x38] sm:$0xff] }
  0x30   :  { %149 = vperm.xlu1 %2642, %v130_v10   ;;  %146 = vperm.xlu0 %2641, %v129_v11   ;;  %v182_v32 = vld [vmem:[%s4134_s2 + $0x8] sm:$0xff]  ;;  %v181_v34 = vld [vmem:[%s4134_s2] sm:$0xff]  ;;  %v3097_v36 = vld [vmem:[#allocation4 + $0x30] sm:$0xff] }
  0x31   :  { %256 = vmatprep.subr.mxu0 %v190_v14  ;;  %456 = vmatprep.subr.mxu1 %v3071_v27  ;;  %v3100_v37 = vld [vmem:[#allocation4 + $0x28] sm:$0xff]  ;;  %v3103_v38 = vld [vmem:[#allocation4 + $0x20] sm:$0xff]  ;;  %v3106_v39 = vld [vmem:[#allocation4 + $0x18] sm:$0xff]  ;;  %v74_v14 = vadd.s32 128, %v3140_v44 }
  0x32   :  { %257 = vmatpush1.msra.mxu0 %v189_v17  ;;  %457 = vmatpush1.msra.mxu1 %v3077_v29  ;;  %v3110_v40 = vld [vmem:[#allocation4 + $0x10] sm:$0xff]  ;;  %v3113_v41 = vld [vmem:[#allocation4 + $0x8] sm:$0xff]  ;;  %v3116_v42 = vld [vmem:[#allocation4] sm:$0xff]  ;;  %v79_v17 = vand.u32 63, %v3140_v44 }
  0x33   :  { %258 = vmatprep.subr.mxu0 %v188_v19  ;;  %458 = vmatprep.subr.mxu1 %v3082_v31  ;;  %v197_v63 = vld [vmem:[%s4136_s4] sm:$0x3]  ;;  %s2928_s4 = smov 64   ;;  %vm105_vm15 = vmxor %vm102_vm12, %vm2930_vm14 }
  0x34   :  { %155 = vperm.xlu1 %2642, %v132_v15   ;;  %152 = vperm.xlu0 %2641, %v131_v16   ;;  %v202_v5 = vrot.slane %v197_v63, %v4142_v62  ;;  %v206_v7 = vrot.slane %v197_v63, %v4141_v3  ;;  %vm3215_vm9 = vcmp.lt.s32.totalorder %v79_v17, 32 }
  0x35   :  { %259 = vmatpush1.msra.mxu0 %v187_v22  ;;  %459 = vmatpush1.msra.mxu1 %v3088_v33 }
  0x36   :  { %260 = vmatprep.subr.mxu0 %v186_v24  ;;  %460 = vmatprep.subr.mxu1 %v3094_v35 }
  0x37   :  { %261 = vmatpush1.msra.mxu0 %v185_v26  ;;  %461 = vmatpush1.msra.mxu1 %v3097_v36 }
  0x38   :  { %108 = vperm.xlu1 %2642, %v71_v23   ;;  %262 = vmatprep.subr.mxu0 %v184_v28  ;;  %v86_v23 = vand.u32 63, %v74_v14 }
  0x39   :  { %263 = vmatpush1.msra.mxu0 %v183_v30  ;;  %462 = vmatprep.subr.mxu1 %v3100_v37 }
  0x3a   :  { %264 = vmatprep.subr.mxu0 %v182_v32  ;;  %463 = vmatpush1.msra.mxu1 %v3103_v38  ;;  %vm3221_vm10 = vcmp.lt.s32.totalorder %v86_v23, 32 }
  0x3b   :  { %265 = vmatpush1.msra.mxu0 %v181_v34  ;;  %464 = vmatprep.subr.mxu1 %v3106_v39 }
  0x3c   :  { %686 = vmatprep.subr.mxu0 %v3045_v18  ;;  %465 = vmatpush1.msra.mxu1 %v3110_v40 }
  0x3d   :  { %466 = vmatprep.subr.mxu1 %v3113_v41 }
  0x3e   :  { %467 = vmatpush1.msra.mxu1 %v3116_v42 }
  0x3f   :  { %501 = vmatmul.mubr.f32.vlgmr.msra.gmra.mxu1 %v2927_v1  ;;  %569 = vmatprep.subr.mxu1 %v3045_v18 }
  0x40   :  { %570 = vmatpush1.msra.mxu1 %v3051_v20  ;;  %617 = vmatprep.mubr.f32.mxu1 %v2927_v1 }
  0x41   :  { %571 = vmatprep.subr.mxu1 %v3053_v21 }
  0x42   :  { %572 = vmatpush1.msra.mxu1 %v3065_v25 }
  0x43   :  { %573 = vmatprep.subr.mxu1 %v3071_v27 }
  0x44   :  { %574 = vmatpush1.msra.mxu1 %v3077_v29 }
  0x45   :  { %575 = vmatprep.subr.mxu1 %v3082_v31 }
  0x46   :  { %576 = vmatpush1.msra.mxu1 %v3088_v33 }
  0x47   :  { %577 = vmatprep.subr.mxu1 %v3094_v35 }
  0x48   :  { %578 = vmatpush1.msra.mxu1 %v3097_v36 }
  0x49   :  { %579 = vmatprep.subr.mxu1 %v3100_v37 }
  0x4a   :  { %580 = vmatpush1.msra.mxu1 %v3103_v38 }
  0x4b   :  { %581 = vmatprep.subr.mxu1 %v3106_v39 }
  0x4c   :  { %582 = vmatpush1.msra.mxu1 %v3110_v40 }
  0x4d   :  { %583 = vmatprep.subr.mxu1 %v3113_v41 }
  0x4e   :  { %584 = vmatpush1.msra.mxu1 %v3116_v42 }
  0x4f   :  { %803 = vmatprep.subr.mxu1 %v3045_v18 }
  0xa3   :  { %v135_v45 = vpop.permute.xlu0 %134  ;;  %v141_v47 = vpop.permute.xlu1 %140 }
  0xa4   :  { %vm157_vm1 = vcmp.eq.s32.totalorder %v135_v45, %v3140_v44  ;;  %vm159_vm2 = vcmp.eq.s32.totalorder %v141_v47, %v3140_v44 }
  0xa5   :  { %v2553_v46 = vsel %vm157_vm1, 1.0, %v2927_v1  ;;  %v2555_v50 = vsel %vm159_vm2, 1.0, %v2927_v1  ;;  %vm3334_vm1 = vmand %vm209_vm0, %vm102_vm12 }
  0xa6   :  { %2561 = vmatmul.mubr.msk.f32.vlgmr.msra.gmra.mxu0 %vm209_vm0, %v2553_v46  ;;  %vm3339_vm2 = vmand %vm209_vm0, %vm105_vm15 }
  0xa7   :  { %v138_v48 = vpop.permute.xlu0 %137  ;;  %304 = vmatprep.mubr.f32.mxu0 %v2927_v1  ;;  %687 = vmatpush1.msra.mxu0 %v3051_v20  ;;  %v144_v51 = vpop.permute.xlu1 %143 }
  0xa8   :  { %vm158_vm3 = vcmp.eq.s32.totalorder %v138_v48, %v3140_v44  ;;  %688 = vmatprep.subr.mxu0 %v3053_v21  ;;  %vm160_vm4 = vcmp.eq.s32.totalorder %v144_v51, %v3140_v44 }
  0xa9   :  { %v2554_v49 = vsel %vm158_vm3, 1.0, %v2927_v1  ;;  %689 = vmatpush1.msra.mxu0 %v3065_v25  ;;  %v2556_v53 = vsel %vm160_vm4, 1.0, %v2927_v1 }
  0xaa   :  { %2562 = vmatmul.mubr.msk.f32.gmra.mxu0 %vm209_vm0, %v2554_v49  ;;  %690 = vmatprep.subr.mxu0 %v3071_v27 }
  0xab   :  { %310 = vmatprep.mubr.f32.mxu0 %v2927_v1  ;;  %691 = vmatpush1.msra.mxu0 %v3077_v29  ;;  %v147_v52 = vpop.permute.xlu0 %146  ;;  %v150_v54 = vpop.permute.xlu1 %149 }
  0xac   :  { %692 = vmatprep.subr.mxu0 %v3082_v31  ;;  %vm161_vm5 = vcmp.eq.s32.totalorder %v147_v52, %v3140_v44  ;;  %vm162_vm6 = vcmp.eq.s32.totalorder %v150_v54, %v3140_v44 }
  0xad   :  { %693 = vmatpush1.msra.mxu0 %v3088_v33  ;;  %v2557_v55 = vsel %vm161_vm5, 1.0, %v2927_v1  ;;  %v2558_v57 = vsel %vm162_vm6, 1.0, %v2927_v1 }
  0xae   :  { %2563 = vmatmul.mubr.msk.f32.gmra.mxu0 %vm209_vm0, %v2555_v50  ;;  %694 = vmatprep.subr.mxu0 %v3094_v35 }
  0xaf   :  { %316 = vmatprep.mubr.f32.mxu0 %v2927_v1  ;;  %695 = vmatpush1.msra.mxu0 %v3097_v36  ;;  %v153_v56 = vpop.permute.xlu0 %152  ;;  %v156_v58 = vpop.permute.xlu1 %155 }
  0xb0   :  { %696 = vmatprep.subr.mxu0 %v3100_v37  ;;  %vm163_vm7 = vcmp.eq.s32.totalorder %v153_v56, %v3140_v44  ;;  %vm164_vm8 = vcmp.eq.s32.totalorder %v156_v58, %v3140_v44 }
  0xb1   :  { %697 = vmatpush1.msra.mxu0 %v3103_v38  ;;  %v2559_v59 = vsel %vm163_vm7, 1.0, %v2927_v1  ;;  %v2560_v60 = vsel %vm164_vm8, 1.0, %v2927_v1 }
  0xb2   :  { %2564 = vmatmul.mubr.msk.f32.gmra.mxu0 %vm209_vm0, %v2556_v53  ;;  %698 = vmatprep.subr.mxu0 %v3106_v39 }
  0xb3   :  { %322 = vmatprep.mubr.f32.mxu0 %v2927_v1  ;;  %699 = vmatpush1.msra.mxu0 %v3110_v40 }
  0xb4   :  { %700 = vmatprep.subr.mxu0 %v3113_v41 }
  0xb5   :  { %701 = vmatpush1.msra.mxu0 %v3116_v42 }
  0xb6   :  { %2565 = vmatmul.mubr.msk.f32.gmra.mxu0 %vm209_vm0, %v2557_v55  ;;  %920 = vmatprep.subr.mxu0 %v3045_v18 }
  0xb7   :  { %328 = vmatprep.mubr.f32.mxu0 %v2927_v1 }
  0xba   :  { %2566 = vmatmul.mubr.msk.f32.gmra.mxu0 %vm209_vm0, %v2558_v57 }
  0xbb   :  { %334 = vmatprep.mubr.f32.mxu0 %v2927_v1 }
  0xbe   :  { %2567 = vmatmul.mubr.msk.f32.gmra.mxu0 %vm209_vm0, %v2559_v59 }
  0xbf   :  { %340 = vmatprep.mubr.f32.mxu0 %v2927_v1 }
  0xc2   :  { %2568 = vmatmul.mubr.msk.f32.gmra.mxu0 %vm209_vm0, %v2560_v60 }
  0xc3   :  { %734 = vmatprep.mubr.f32.mxu0 %v2927_v1 }
  0xff   :  { %v502_v14 = vpop.f32.mrf.mxu1 }
 0x166   :  { %v300_v2 = vpop.f32.mrf.mxu0 }
 0x168   :  { %v302_v4 = vpop.f32.mrf.mxu0 }
 0x169   :  { %v3287_v23 = vadd.f32 %v302_v4, %v206_v7  ;;  %v504_v4 = vpop.f32.mrf.mxu1 }
 0x16a   :  { %v306_v6 = vpop.f32.mrf.mxu0 }
 0x16b   :  { %v3201_v8 = vadd.f32 %v306_v6, %v202_v5 }
 0x16c   :  { %v308_v9 = vpop.f32.mrf.mxu0 }
 0x16d   :  { %v3203_v10 = vadd.f32 %v308_v9, %v206_v7 }
 0x16e   :  { %v312_v11 = vpop.f32.mrf.mxu0 }
 0x16f   :  { %v3205_v12 = vadd.f32 %v312_v11, %v202_v5  ;;  %v3275_v11 = vadd.f32 %v300_v2, %v202_v5 }
 0x170   :  { %v314_v13 = vpop.f32.mrf.mxu0 }
 0x171   :  { %v3208_v15 = vadd.f32 %v314_v13, %v206_v7 }
 0x172   :  { %v318_v16 = vpop.f32.mrf.mxu0 }
 0x173   :  { %v3211_v19 = vadd.f32 %v318_v16, %v202_v5 }
 0x174   :  { %v320_v22 = vpop.f32.mrf.mxu0 }
 0x175   :  { %v3213_v24 = vadd.f32 %v320_v22, %v206_v7 }
 0x176   :  { %v324_v26 = vpop.f32.mrf.mxu0 }
 0x177   :  { %v3219_v30 = vadd.f32 %v324_v26, %v202_v5 }
 0x178   :  { %v326_v32 = vpop.f32.mrf.mxu0 }
 0x179   :  { %v3225_v43 = vadd.f32 %v326_v32, %v206_v7  ;;  %v407_v45 = vsel %vm3215_vm9, %v3211_v19, %v3219_v30  ;;  %v411_v46 = vsel %vm3215_vm9, %v3219_v30, %v3211_v19 }
 0x17a   :  { %v330_v47 = vpop.f32.mrf.mxu0 }
 0x17b   :  { %v3235_v48 = vadd.f32 %v330_v47, %v202_v5  ;;  %v408_v49 = vsel %vm3221_vm10, %v3213_v24, %v3225_v43  ;;  %v412_v50 = vsel %vm3221_vm10, %v3225_v43, %v3213_v24 }
 0x17c   :  { %v332_v51 = vpop.f32.mrf.mxu0 }
 0x17d   :  { %v3245_v52 = vadd.f32 %v332_v51, %v206_v7  ;;  %v395_v53 = vsel %vm3215_vm9, %v3205_v12, %v3235_v48  ;;  %v399_v54 = vsel %vm3215_vm9, %v3235_v48, %v3205_v12 }
 0x17e   :  { %v336_v55 = vpop.f32.mrf.mxu0 }
 0x17f   :  { %v3255_v56 = vadd.f32 %v336_v55, %v202_v5  ;;  %v396_v57 = vsel %vm3221_vm10, %v3208_v15, %v3245_v52 }
 0x180   :  { %v338_v59 = vpop.f32.mrf.mxu0 }
 0x181   :  { %v3265_v60 = vadd.f32 %v338_v59, %v206_v7  ;;  %v383_v63 = vsel %vm3215_vm9, %v3201_v8, %v3255_v56 }
 0x182   :  { %v342_v9 = vpop.f32.mrf.mxu0 }
 0x183   :  { %v3277_v13 = vadd.f32 %v342_v9, %v202_v5  ;;  %v384_v16 = vsel %vm3221_vm10, %v3203_v10, %v3265_v60 }
 0x184   :  { %v344_v22 = vpop.f32.mrf.mxu0 }
 0x185   :  { %v371_v2 = vsel %vm3215_vm9, %v3275_v11, %v3277_v13  ;;  %v3293_v5 = vadd.f32 %v344_v22, %v206_v7 }
 0x186   :  { %v507_v32 = vadd.f32 %v502_v14, %v371_v2 }
 0x187   :  { %v372_v47 = vsel %vm3221_vm10, %v3287_v23, %v3293_v5 }
 0x188   :  { %v2569_v55 = vmul.f32 -1.442695, %v507_v32  ;;  %v508_v7 = vadd.f32 %v504_v4, %v372_v47 }
 0x18a   :  { %2643 = vpow2.f32 %v2569_v55  ;;  %v2570_v59 = vmul.f32 -1.442695, %v508_v7 }
 0x18c   :  { %2645 = vpow2.f32 %v2570_v59  ;;  %v3314_v59 = vpop.permute.xlu1 %108 }
 0x18d   :  { %2647 = vtanh.f32 %v508_v7 }
 0x197   :  { %v2644_v9 = vpop.eup %2643 }
 0x198   :  { %v512_v3 = vadd.f32 1.0, %v2644_v9  ;;  %v2929_v9 = vmov 7  }
 0x199   :  { %v2646_v22 = vpop.eup %2645 }
 0x19a   :  { %v519_v14 = vadd.f32 1.0, %v2646_v22  ;;  %v2648_v2 = vpop.eup %2647 }
 0x19c   :  { %2649 = vrcp.f32 %v519_v14 }
 0x19d   :  { %2651 = vrcp.f32 %v512_v3 }
 0x1a9   :  { %v2650_v62 = vpop.eup %2649 }
 0x1aa   :  { %v2652_v0 = vpop.eup %2651  ;;  %v524_v51 = vsel %vm101_vm11, %v2648_v2, %v2650_v62  ;;  %v3318_v62 = vsel %vm102_vm12, 0, %v2929_v9 }
 0x1ab   :  { %v526_v32 = vmul.f32 %v2652_v0, %v524_v51  ;;  %v525_v47 = vmul.f32 0.0, %v2652_v0  ;;  %vm110_vm13 = vcmp.gt.s32.totalorder %v3314_v59, %v3318_v62 }
 0x1ad   :  { %528 = vrot.lane.b32.xlu0 %v526_v32, %s2928_s4 }
 0x21f   :  { %v529_v4 = vpop.permute.xlu0 %528 }
 0x220   :  { %v531_v55 = vadd.f32 %v529_v4, %v525_v47 }
 0x222   :  { %2653 = vtanh.f32 %v531_v55  ;;  %535 = vrot.lane.b32.xlu1 %v531_v55, %s2928_s4 }
 0x22f   :  { %v2654_v7 = vpop.eup %2653 }
 0x230   :  { %v533_v3 = vmul.f32 %v2654_v7, %v524_v51 }
 0x232   :  { %540 = vrot.lane.b32.xlu0 %v533_v3, %s2928_s4 }
 0x294   :  { %v536_v0 = vpop.permute.xlu1 %535 }
 0x295   :  { %v3325_v22 = vsel %vm110_vm13, %v536_v0, 0.0 }
 0x296   :  { %641 = vrot.lane.b32.xlu0 %v3325_v22, %s2928_s4 }
 0x2a4   :  { %v541_v2 = vpop.permute.xlu0 %540 }
 0x2a5   :  { %v543_v32 = vsel %vm110_vm13, %v541_v2, 0.0 }
 0x2a6   :  { %545 = vst.msk [vmem:[#allocation3] sm:$0xff] %vm3334_vm1, %v543_v32  ;;  %2571 = vmatmul.mubr.msk.f32.vlgmr.msra.gmra.mxu1 %vm209_vm0, %v543_v32 }
 0x2a7   :  { %547 = vst.msk [vmem:[#allocation3 + $0x38] sm:$0xff] %vm3339_vm2, %v543_v32  ;;  %804 = vmatpush1.msra.mxu1 %v3051_v20  ;;  %851 = vmatprep.mubr.f32.mxu1 %v2927_v1 }
 0x2a8   :  { %805 = vmatprep.subr.mxu1 %v3053_v21 }
 0x2a9   :  { %806 = vmatpush1.msra.mxu1 %v3065_v25 }
 0x2aa   :  { %807 = vmatprep.subr.mxu1 %v3071_v27 }
 0x2ab   :  { %808 = vmatpush1.msra.mxu1 %v3077_v29 }
 0x2ac   :  { %809 = vmatprep.subr.mxu1 %v3082_v31 }
 0x2ad   :  { %810 = vmatpush1.msra.mxu1 %v3088_v33 }
 0x2ae   :  { %811 = vmatprep.subr.mxu1 %v3094_v35 }
 0x2af   :  { %812 = vmatpush1.msra.mxu1 %v3097_v36 }
 0x2b0   :  { %813 = vmatprep.subr.mxu1 %v3100_v37 }
 0x2b1   :  { %814 = vmatpush1.msra.mxu1 %v3103_v38 }
 0x2b2   :  { %815 = vmatprep.subr.mxu1 %v3106_v39 }
 0x2b3   :  { %816 = vmatpush1.msra.mxu1 %v3110_v40 }
 0x2b4   :  { %817 = vmatprep.subr.mxu1 %v3113_v41 }
 0x2b5   :  { %818 = vmatpush1.msra.mxu1 %v3116_v42 }
 0x2b6   :  { %1037 = vmatprep.subr.mxu1 %v3045_v18 }
 0x366   :  { %v619_v47 = vpop.f32.mrf.mxu1 }
 0x367   :  { %v624_v4 = vadd.f32 %v619_v47, %v383_v63 }
 0x368   :  { %v621_v55 = vpop.f32.mrf.mxu1 }
 0x369   :  { %v2572_v7 = vmul.f32 -1.442695, %v624_v4  ;;  %v625_v3 = vadd.f32 %v621_v55, %v384_v16  ;;  %v642_v16 = vpop.permute.xlu0 %641 }
 0x36b   :  { %2655 = vpow2.f32 %v2572_v7  ;;  %v2573_v9 = vmul.f32 -1.442695, %v625_v3 }
 0x36d   :  { %2657 = vpow2.f32 %v2573_v9 }
 0x36e   :  { %2659 = vtanh.f32 %v625_v3 }
 0x378   :  { %v2656_v0 = vpop.eup %2655 }
 0x379   :  { %v629_v26 = vadd.f32 1.0, %v2656_v0 }
 0x37a   :  { %v2658_v2 = vpop.eup %2657 }
 0x37b   :  { %v636_v17 = vadd.f32 1.0, %v2658_v2  ;;  %v2660_v6 = vpop.eup %2659 }
 0x37d   :  { %2661 = vrcp.f32 %v636_v17  ;;  %v2931_v17 = vmov 6  }
 0x37e   :  { %2663 = vrcp.f32 %v629_v26  ;;  %v3385_v26 = vsel %vm102_vm12, 1, %v2931_v17 }
 0x37f   :  { %vm112_vm3 = vcmp.gt.s32.totalorder %v3314_v59, %v3385_v26 }
 0x38a   :  { %v2662_v63 = vpop.eup %2661 }
 0x38b   :  { %v2664_v47 = vpop.eup %2663  ;;  %v639_v4 = vsel %vm101_vm11, %v2660_v6, %v2662_v63 }
 0x38c   :  { %v645_v58 = vmul.f32 %v2664_v47, %v639_v4  ;;  %v644_v55 = vmul.f32 %v2664_v47, %v642_v16 }
 0x38e   :  { %647 = vrot.lane.b32.xlu1 %v645_v58, %s2928_s4 }
 0x400   :  { %v648_v7 = vpop.permute.xlu1 %647 }
 0x401   :  { %v650_v9 = vadd.f32 %v648_v7, %v644_v55 }
 0x403   :  { %2665 = vtanh.f32 %v650_v9  ;;  %654 = vrot.lane.b32.xlu1 %v650_v9, %s2928_s4 }
 0x410   :  { %v2666_v0 = vpop.eup %2665 }
 0x411   :  { %v652_v3 = vmul.f32 %v2666_v0, %v639_v4 }
 0x413   :  { %659 = vrot.lane.b32.xlu0 %v652_v3, %s2928_s4 }
 0x475   :  { %v655_v6 = vpop.permute.xlu1 %654 }
 0x476   :  { %v657_v58 = vsel %vm112_vm3, %v655_v6, %v3325_v22 }
 0x477   :  { %758 = vrot.lane.b32.xlu0 %v657_v58, %s2928_s4 }
 0x485   :  { %v660_v2 = vpop.permute.xlu0 %659 }
 0x486   :  { %v662_v63 = vsel %vm112_vm3, %v660_v2, %v543_v32 }
 0x487   :  { %663 = vst.msk [vmem:[#allocation3 + $0x8] sm:$0xff] %vm3334_vm1, %v662_v63  ;;  %2574 = vmatmul.mubr.msk.f32.vlgmr.msra.gmra.mxu0 %vm209_vm0, %v662_v63 }
 0x488   :  { %664 = vst.msk [vmem:[#allocation3 + $0x30] sm:$0xff] %vm3339_vm2, %v662_v63  ;;  %921 = vmatpush1.msra.mxu0 %v3051_v20  ;;  %968 = vmatprep.mubr.f32.mxu0 %v2927_v1 }
 0x489   :  { %922 = vmatprep.subr.mxu0 %v3053_v21 }
 0x48a   :  { %923 = vmatpush1.msra.mxu0 %v3065_v25 }
 0x48b   :  { %924 = vmatprep.subr.mxu0 %v3071_v27 }
 0x48c   :  { %925 = vmatpush1.msra.mxu0 %v3077_v29 }
 0x48d   :  { %926 = vmatprep.subr.mxu0 %v3082_v31 }
 0x48e   :  { %927 = vmatpush1.msra.mxu0 %v3088_v33 }
 0x48f   :  { %928 = vmatprep.subr.mxu0 %v3094_v35 }
 0x490   :  { %929 = vmatpush1.msra.mxu0 %v3097_v36 }
 0x491   :  { %930 = vmatprep.subr.mxu0 %v3100_v37 }
 0x492   :  { %931 = vmatpush1.msra.mxu0 %v3103_v38 }
 0x493   :  { %932 = vmatprep.subr.mxu0 %v3106_v39 }
 0x494   :  { %933 = vmatpush1.msra.mxu0 %v3110_v40 }
 0x495   :  { %934 = vmatprep.subr.mxu0 %v3113_v41 }
 0x496   :  { %935 = vmatpush1.msra.mxu0 %v3116_v42 }
 0x497   :  { %1154 = vmatprep.subr.mxu0 %v3045_v18 }
 0x547   :  { %v736_v22 = vpop.f32.mrf.mxu0 }
 0x548   :  { %v741_v32 = vadd.f32 %v736_v22, %v395_v53 }
 0x549   :  { %v738_v47 = vpop.f32.mrf.mxu0 }
 0x54a   :  { %v2575_v4 = vmul.f32 -1.442695, %v741_v32  ;;  %v742_v16 = vadd.f32 %v738_v47, %v396_v57  ;;  %v759_v57 = vpop.permute.xlu0 %758 }
 0x54c   :  { %2667 = vpow2.f32 %v2575_v4  ;;  %v2576_v55 = vmul.f32 -1.442695, %v742_v16 }
 0x54e   :  { %2669 = vpow2.f32 %v2576_v55 }
 0x54f   :  { %2671 = vtanh.f32 %v742_v16 }
 0x559   :  { %v2668_v7 = vpop.eup %2667 }
 0x55a   :  { %v746_v0 = vadd.f32 1.0, %v2668_v7  ;;  %v2932_v7 = vmov 5  }
 0x55b   :  { %v2670_v9 = vpop.eup %2669 }
 0x55c   :  { %v753_v3 = vadd.f32 1.0, %v2670_v9  ;;  %v2672_v17 = vpop.eup %2671  ;;  %v3436_v9 = vsel %vm102_vm12, 2, %v2932_v7 }
 0x55d   :  { %vm114_vm4 = vcmp.gt.s32.totalorder %v3314_v59, %v3436_v9 }
 0x55e   :  { %2673 = vrcp.f32 %v753_v3 }
 0x55f   :  { %2675 = vrcp.f32 %v746_v0 }
 0x56b   :  { %v2674_v53 = vpop.eup %2673 }
 0x56c   :  { %v2676_v6 = vpop.eup %2675  ;;  %v756_v2 = vsel %vm101_vm11, %v2672_v17, %v2674_v53 }
 0x56d   :  { %v762_v22 = vmul.f32 %v2676_v6, %v756_v2  ;;  %v761_v32 = vmul.f32 %v2676_v6, %v759_v57 }
 0x56f   :  { %764 = vrot.lane.b32.xlu1 %v762_v22, %s2928_s4 }
 0x5e1   :  { %v765_v47 = vpop.permute.xlu1 %764 }
 0x5e2   :  { %v767_v4 = vadd.f32 %v765_v47, %v761_v32 }
 0x5e4   :  { %2677 = vtanh.f32 %v767_v4  ;;  %771 = vrot.lane.b32.xlu1 %v767_v4, %s2928_s4 }
 0x5f1   :  { %v2678_v55 = vpop.eup %2677 }
 0x5f2   :  { %v769_v16 = vmul.f32 %v2678_v55, %v756_v2 }
 0x5f4   :  { %776 = vrot.lane.b32.xlu0 %v769_v16, %s2928_s4 }
 0x656   :  { %v772_v0 = vpop.permute.xlu1 %771 }
 0x657   :  { %v774_v3 = vsel %vm114_vm4, %v772_v0, %v657_v58 }
 0x658   :  { %875 = vrot.lane.b32.xlu0 %v774_v3, %s2928_s4 }
 0x666   :  { %v777_v17 = vpop.permute.xlu0 %776 }
 0x667   :  { %v779_v53 = vsel %vm114_vm4, %v777_v17, %v662_v63 }
 0x668   :  { %780 = vst.msk [vmem:[#allocation3 + $0x10] sm:$0xff] %vm3334_vm1, %v779_v53  ;;  %2577 = vmatmul.mubr.msk.f32.vlgmr.msra.gmra.mxu1 %vm209_vm0, %v779_v53 }
 0x669   :  { %781 = vst.msk [vmem:[#allocation3 + $0x28] sm:$0xff] %vm3339_vm2, %v779_v53  ;;  %1038 = vmatpush1.msra.mxu1 %v3051_v20  ;;  %1085 = vmatprep.mubr.f32.mxu1 %v2927_v1 }
 0x66a   :  { %1039 = vmatprep.subr.mxu1 %v3053_v21 }
 0x66b   :  { %1040 = vmatpush1.msra.mxu1 %v3065_v25 }
 0x66c   :  { %1041 = vmatprep.subr.mxu1 %v3071_v27 }
 0x66d   :  { %1042 = vmatpush1.msra.mxu1 %v3077_v29 }
 0x66e   :  { %1043 = vmatprep.subr.mxu1 %v3082_v31 }
 0x66f   :  { %1044 = vmatpush1.msra.mxu1 %v3088_v33 }
 0x670   :  { %1045 = vmatprep.subr.mxu1 %v3094_v35 }
 0x671   :  { %1046 = vmatpush1.msra.mxu1 %v3097_v36 }
 0x672   :  { %1047 = vmatprep.subr.mxu1 %v3100_v37 }
 0x673   :  { %1048 = vmatpush1.msra.mxu1 %v3103_v38 }
 0x674   :  { %1049 = vmatprep.subr.mxu1 %v3106_v39 }
 0x675   :  { %1050 = vmatpush1.msra.mxu1 %v3110_v40 }
 0x676   :  { %1051 = vmatprep.subr.mxu1 %v3113_v41 }
 0x677   :  { %1052 = vmatpush1.msra.mxu1 %v3116_v42 }
 0x678   :  { %1271 = vmatprep.subr.mxu1 %v3045_v18 }
 0x728   :  { %v853_v58 = vpop.f32.mrf.mxu1 }
 0x729   :  { %v858_v63 = vadd.f32 %v853_v58, %v407_v45 }
 0x72a   :  { %v855_v6 = vpop.f32.mrf.mxu1 }
 0x72b   :  { %v2578_v2 = vmul.f32 -1.442695, %v858_v63  ;;  %v859_v22 = vadd.f32 %v855_v6, %v408_v49  ;;  %v876_v49 = vpop.permute.xlu0 %875 }
 0x72d   :  { %2679 = vpow2.f32 %v2578_v2  ;;  %v2579_v57 = vmul.f32 -1.442695, %v859_v22 }
 0x72f   :  { %2681 = vpow2.f32 %v2579_v57 }
 0x730   :  { %2683 = vtanh.f32 %v859_v22  ;;  %v2933_v22 = vmov 4  }
 0x731   :  { %v3486_v57 = vsel %vm102_vm12, 3, %v2933_v22 }
 0x732   :  { %vm116_vm5 = vcmp.gt.s32.totalorder %v3314_v59, %v3486_v57 }
 0x73a   :  { %v2680_v32 = vpop.eup %2679 }
 0x73b   :  { %v863_v47 = vadd.f32 1.0, %v2680_v32 }
 0x73c   :  { %v2682_v18 = vpop.eup %2681 }
 0x73d   :  { %v870_v4 = vadd.f32 1.0, %v2682_v18  ;;  %v2684_v55 = vpop.eup %2683 }
 0x73f   :  { %2685 = vrcp.f32 %v870_v4 }
 0x740   :  { %2687 = vrcp.f32 %v863_v47 }
 0x74c   :  { %v2686_v45 = vpop.eup %2685 }
 0x74d   :  { %v2688_v16 = vpop.eup %2687  ;;  %v873_v7 = vsel %vm101_vm11, %v2684_v55, %v2686_v45 }
 0x74e   :  { %v879_v0 = vmul.f32 %v2688_v16, %v873_v7  ;;  %v878_v17 = vmul.f32 %v2688_v16, %v876_v49 }
 0x750   :  { %881 = vrot.lane.b32.xlu1 %v879_v0, %s2928_s4 }
 0x7c2   :  { %v882_v58 = vpop.permute.xlu1 %881 }
 0x7c3   :  { %v884_v63 = vadd.f32 %v882_v58, %v878_v17 }
 0x7c5   :  { %2689 = vtanh.f32 %v884_v63  ;;  %888 = vrot.lane.b32.xlu1 %v884_v63, %s2928_s4 }
 0x7d2   :  { %v2690_v6 = vpop.eup %2689 }
 0x7d3   :  { %v886_v2 = vmul.f32 %v2690_v6, %v873_v7 }
 0x7d5   :  { %893 = vrot.lane.b32.xlu0 %v886_v2, %s2928_s4 }
 0x837   :  { %v889_v32 = vpop.permute.xlu1 %888 }
 0x838   :  { %v891_v18 = vsel %vm116_vm5, %v889_v32, %v774_v3 }
 0x839   :  { %992 = vrot.lane.b32.xlu0 %v891_v18, %s2928_s4 }
 0x847   :  { %v894_v47 = vpop.permute.xlu0 %893 }
 0x848   :  { %v896_v4 = vsel %vm116_vm5, %v894_v47, %v779_v53  ;;  %v2934_v47 = vmov 3  }
 0x849   :  { %897 = vst.msk [vmem:[#allocation3 + $0x18] sm:$0xff] %vm3334_vm1, %v896_v4  ;;  %2580 = vmatmul.mubr.msk.f32.vlgmr.msra.gmra.mxu0 %vm209_vm0, %v896_v4 }
 0x84a   :  { %898 = vst.msk [vmem:[#allocation3 + $0x20] sm:$0xff] %vm3339_vm2, %v896_v4  ;;  %1155 = vmatpush1.msra.mxu0 %v3051_v20  ;;  %1202 = vmatprep.mubr.f32.mxu0 %v2927_v1 }
 0x84b   :  { %1156 = vmatprep.subr.mxu0 %v3053_v21 }
 0x84c   :  { %1157 = vmatpush1.msra.mxu0 %v3065_v25 }
 0x84d   :  { %1158 = vmatprep.subr.mxu0 %v3071_v27 }
 0x84e   :  { %1159 = vmatpush1.msra.mxu0 %v3077_v29 }
 0x84f   :  { %1160 = vmatprep.subr.mxu0 %v3082_v31 }
 0x850   :  { %1161 = vmatpush1.msra.mxu0 %v3088_v33 }
 0x851   :  { %1162 = vmatprep.subr.mxu0 %v3094_v35 }
 0x852   :  { %1163 = vmatpush1.msra.mxu0 %v3097_v36 }
 0x853   :  { %1164 = vmatprep.subr.mxu0 %v3100_v37 }
 0x854   :  { %1165 = vmatpush1.msra.mxu0 %v3103_v38 }
 0x855   :  { %1166 = vmatprep.subr.mxu0 %v3106_v39 }
 0x856   :  { %1167 = vmatpush1.msra.mxu0 %v3110_v40 }
 0x857   :  { %1168 = vmatprep.subr.mxu0 %v3113_v41 }
 0x858   :  { %1169 = vmatpush1.msra.mxu0 %v3116_v42 }
 0x8ab   :  { %v993_v24 = vpop.permute.xlu0 %992 }
 0x909   :  { %v970_v3 = vpop.f32.mrf.mxu0 }
 0x90a   :  { %v975_v53 = vadd.f32 %v970_v3, %v411_v46  ;;  %v3535_v3 = vsel %vm102_vm12, 4, %v2934_v47 }
 0x90b   :  { %v972_v55 = vpop.f32.mrf.mxu0  ;;  %vm118_vm6 = vcmp.gt.s32.totalorder %v3314_v59, %v3535_v3 }
 0x90c   :  { %v2581_v45 = vmul.f32 -1.442695, %v975_v53  ;;  %v976_v16 = vadd.f32 %v972_v55, %v412_v50 }
 0x90e   :  { %2691 = vpow2.f32 %v2581_v45  ;;  %v2582_v7 = vmul.f32 -1.442695, %v976_v16 }
 0x910   :  { %2693 = vpow2.f32 %v2582_v7  ;;  %v2935_v7 = vmov 2  }
 0x911   :  { %2695 = vtanh.f32 %v976_v16 }
 0x91b   :  { %v2692_v0 = vpop.eup %2691 }
 0x91c   :  { %v980_v17 = vadd.f32 1.0, %v2692_v0  ;;  %v3584_v0 = vsel %vm102_vm12, 5, %v2935_v7 }
 0x91d   :  { %v2694_v49 = vpop.eup %2693  ;;  %vm120_vm7 = vcmp.gt.s32.totalorder %v3314_v59, %v3584_v0 }
 0x91e   :  { %v987_v58 = vadd.f32 1.0, %v2694_v49  ;;  %v2696_v19 = vpop.eup %2695 }
 0x920   :  { %2697 = vrcp.f32 %v987_v58 }
 0x921   :  { %2699 = vrcp.f32 %v980_v17 }
 0x92d   :  { %v2698_v30 = vpop.eup %2697 }
 0x92e   :  { %v2700_v46 = vpop.eup %2699  ;;  %v990_v63 = vsel %vm101_vm11, %v2696_v19, %v2698_v30 }
 0x92f   :  { %v996_v6 = vmul.f32 %v2700_v46, %v990_v63  ;;  %v995_v43 = vmul.f32 %v2700_v46, %v993_v24  ;;  %v4153_v46 = vsel %vm3215_vm9, %v3255_v56, %v3201_v8 }
 0x931   :  { %998 = vrot.lane.b32.xlu1 %v996_v6, %s2928_s4 }
 0x9a3   :  { %v999_v50 = vpop.permute.xlu1 %998 }
 0x9a4   :  { %v1001_v2 = vadd.f32 %v999_v50, %v995_v43  ;;  %v4154_v43 = vsel %vm3221_vm10, %v3265_v60, %v3203_v10 }
 0x9a6   :  { %2701 = vtanh.f32 %v1001_v2  ;;  %1005 = vrot.lane.b32.xlu1 %v1001_v2, %s2928_s4 }
 0x9b3   :  { %v2702_v22 = vpop.eup %2701 }
 0x9b4   :  { %v1003_v32 = vmul.f32 %v2702_v22, %v990_v63 }
 0x9b6   :  { %1010 = vrot.lane.b32.xlu0 %v1003_v32, %s2928_s4 }
 0xa18   :  { %v1006_v53 = vpop.permute.xlu1 %1005 }
 0xa19   :  { %v1008_v55 = vsel %vm118_vm6, %v1006_v53, %v891_v18 }
 0xa1a   :  { %1109 = vrot.lane.b32.xlu0 %v1008_v55, %s2928_s4 }
 0xa28   :  { %v1011_v45 = vpop.permute.xlu0 %1010 }
 0xa29   :  { %v1013_v16 = vsel %vm118_vm6, %v1011_v45, %v896_v4 }
 0xa2a   :  { %1014 = vst.msk [vmem:[#allocation3 + $0x20] sm:$0xff] %vm3334_vm1, %v1013_v16  ;;  %2583 = vmatmul.mubr.msk.f32.vlgmr.msra.gmra.mxu1 %vm209_vm0, %v1013_v16 }
 0xa2b   :  { %1015 = vst.msk [vmem:[#allocation3 + $0x18] sm:$0xff] %vm3339_vm2, %v1013_v16  ;;  %1272 = vmatpush1.msra.mxu1 %v3051_v20  ;;  %1319 = vmatprep.mubr.f32.mxu1 %v2927_v1 }
 0xa2c   :  { %1273 = vmatprep.subr.mxu1 %v3053_v21 }
 0xa2d   :  { %1274 = vmatpush1.msra.mxu1 %v3065_v25 }
 0xa2e   :  { %1275 = vmatprep.subr.mxu1 %v3071_v27 }
 0xa2f   :  { %1276 = vmatpush1.msra.mxu1 %v3077_v29  ;;  %v4152_v29 = vsel %vm3221_vm10, %v3245_v52, %v3208_v15 }
 0xa30   :  { %1277 = vmatprep.subr.mxu1 %v3082_v31 }
 0xa31   :  { %1278 = vmatpush1.msra.mxu1 %v3088_v33 }
 0xa32   :  { %1279 = vmatprep.subr.mxu1 %v3094_v35  ;;  %v1371_v14 = vld [vmem:[#allocation3 + $0x18] sm:$0xff] }
 0xa33   :  { %1280 = vmatpush1.msra.mxu1 %v3097_v36 }
 0xa34   :  { %1281 = vmatprep.subr.mxu1 %v3100_v37 }
 0xa35   :  { %1282 = vmatpush1.msra.mxu1 %v3103_v38 }
 0xa36   :  { %1283 = vmatprep.subr.mxu1 %v3106_v39 }
 0xa37   :  { %1284 = vmatpush1.msra.mxu1 %v3110_v40 }
 0xa38   :  { %1285 = vmatprep.subr.mxu1 %v3113_v41 }
 0xa39   :  { %1286 = vmatpush1.msra.mxu1 %v3116_v42 }
 0xa8c   :  { %v1110_v15 = vpop.permute.xlu0 %1109 }
 0xaea   :  { %v1087_v20 = vpop.f32.mrf.mxu1 }
 0xaeb   :  { %v1092_v21 = vadd.f32 %v1087_v20, %v399_v54 }
 0xaec   :  { %v1089_v25 = vpop.f32.mrf.mxu1 }
 0xaed   :  { %v2584_v27 = vmul.f32 -1.442695, %v1092_v21  ;;  %v1093_v31 = vadd.f32 %v1089_v25, %v4152_v29  ;;  %v2936_v29 = vmov 1  }
 0xaef   :  { %2703 = vpow2.f32 %v2584_v27  ;;  %v2585_v33 = vmul.f32 -1.442695, %v1093_v31 }
 0xaf1   :  { %2705 = vpow2.f32 %v2585_v33 }
 0xaf2   :  { %2707 = vtanh.f32 %v1093_v31  ;;  %v3618_v31 = vsel %vm102_vm12, 6, %v2936_v29  ;;  %v3668_v29 = vld [vmem:[#allocation9 + $0x50] sm:$0xff] }
 0xaf3   :  { %vm122_vm8 = vcmp.gt.s32.totalorder %v3314_v59, %v3618_v31 }
 0xafc   :  { %v2704_v35 = vpop.eup %2703 }
 0xafd   :  { %v1097_v37 = vadd.f32 1.0, %v2704_v35 }
 0xafe   :  { %v2706_v36 = vpop.eup %2705 }
 0xaff   :  { %v1104_v38 = vadd.f32 1.0, %v2706_v36  ;;  %v2708_v39 = vpop.eup %2707 }
 0xb01   :  { %2709 = vrcp.f32 %v1104_v38 }
 0xb02   :  { %2711 = vrcp.f32 %v1097_v37 }
 0xb0e   :  { %v2710_v40 = vpop.eup %2709 }
 0xb0f   :  { %v2712_v41 = vpop.eup %2711  ;;  %v1107_v42 = vsel %vm101_vm11, %v2708_v39, %v2710_v40  ;;  %v4155_v39 = vsel %vm3215_vm9, %v3277_v13, %v3275_v11 }
 0xb10   :  { %v1113_v12 = vmul.f32 %v2712_v41, %v1107_v42  ;;  %v1112_v48 = vmul.f32 %v2712_v41, %v1110_v15 }
 0xb12   :  { %1115 = vrot.lane.b32.xlu1 %v1113_v12, %s2928_s4  ;;  %v4156_v12 = vsel %vm3221_vm10, %v3293_v5, %v3287_v23  ;;  %v1391_v23 = vld [vmem:[#allocation7 + $0x78] sm:$0xff]  ;;  %v1390_v5 = vld [vmem:[#allocation7 + $0x70] sm:$0xff] }
 0xb13   :  { %1444 = vmatprep.subr.mxu0 %v1391_v23 }
 0xb84   :  { %v1116_v52 = vpop.permute.xlu1 %1115 }
 0xb85   :  { %v1118_v54 = vadd.f32 %v1116_v52, %v1112_v48 }
 0xb87   :  { %2713 = vtanh.f32 %v1118_v54  ;;  %1122 = vrot.lane.b32.xlu1 %v1118_v54, %s2928_s4 }
 0xb94   :  { %v2714_v18 = vpop.eup %2713 }
 0xb95   :  { %v1120_v4 = vmul.f32 %v2714_v18, %v1107_v42 }
 0xb97   :  { %1127 = vrot.lane.b32.xlu0 %v1120_v4, %s2928_s4 }
 0xbf9   :  { %v1123_v49 = vpop.permute.xlu1 %1122 }
 0xbfa   :  { %v1125_v17 = vsel %vm120_vm7, %v1123_v49, %v1008_v55 }
 0xbfb   :  { %1226 = vrot.lane.b32.xlu0 %v1125_v17, %s2928_s4 }
 0xc09   :  { %v1128_v58 = vpop.permute.xlu0 %1127 }
 0xc0a   :  { %v1130_v19 = vsel %vm120_vm7, %v1128_v58, %v1013_v16  ;;  %v1389_v58 = vld [vmem:[#allocation7 + $0x68] sm:$0xff] }
 0xc0b   :  { %1131 = vst.msk [vmem:[#allocation3 + $0x28] sm:$0xff] %vm3334_vm1, %v1130_v19  ;;  %2586 = vmatmul.mubr.msk.f32.vlgmr.msra.gmra.mxu0 %vm209_vm0, %v1130_v19 }
 0xc0c   :  { %1132 = vst.msk [vmem:[#allocation3 + $0x10] sm:$0xff] %vm3339_vm2, %v1130_v19  ;;  %1492 = vmatprep.mubr.f32.mxu0 %v2927_v1  ;;  %1445 = vmatpush1.msra.mxu0 %v1390_v5 }
 0xc0d   :  { %1446 = vmatprep.subr.mxu0 %v1389_v58  ;;  %v4158_v58 = vsub.s32 0, %v3190_v61 }
 0xc13   :  { %v1370_v51 = vld [vmem:[#allocation3 + $0x10] sm:$0xff] }
 0xc6d   :  { %v1227_v10 = vpop.permute.xlu0 %1226 }
 0xccb   :  { %v1204_v30 = vpop.f32.mrf.mxu0 }
 0xccc   :  { %v1209_v63 = vadd.f32 %v1204_v30, %v4153_v46  ;;  %v1387_v30 = vld [vmem:[#allocation7 + $0x58] sm:$0xff]  ;;  %v1386_v46 = vld [vmem:[#allocation7 + $0x50] sm:$0xff] }
 0xccd   :  { %v1206_v6 = vpop.f32.mrf.mxu0 }
 0xcce   :  { %v2587_v24 = vmul.f32 -1.442695, %v1209_v63  ;;  %v1210_v50 = vadd.f32 %v1206_v6, %v4154_v43  ;;  %v1385_v63 = vld [vmem:[#allocation7 + $0x48] sm:$0xff] }
 0xcd0   :  { %2715 = vpow2.f32 %v2587_v24  ;;  %v2588_v2 = vmul.f32 -1.442695, %v1210_v50 }
 0xcd2   :  { %2717 = vpow2.f32 %v2588_v2  ;;  %v1384_v2 = vld [vmem:[#allocation7 + $0x40] sm:$0xff] }
 0xcd3   :  { %2719 = vtanh.f32 %v1210_v50 }
 0xcdd   :  { %v2716_v22 = vpop.eup %2715 }
 0xcde   :  { %v1214_v47 = vadd.f32 1.0, %v2716_v22  ;;  %v1383_v22 = vld [vmem:[#allocation7 + $0x38] sm:$0xff] }
 0xcdf   :  { %v2718_v32 = vpop.eup %2717 }
 0xce0   :  { %v1221_v53 = vadd.f32 1.0, %v2718_v32  ;;  %v2720_v8 = vpop.eup %2719  ;;  %v1382_v32 = vld [vmem:[#allocation7 + $0x30] sm:$0xff] }
 0xce2   :  { %2721 = vrcp.f32 %v1221_v53  ;;  %v1380_v53 = vld [vmem:[#allocation7 + $0x20] sm:$0xff] }
 0xce3   :  { %2723 = vrcp.f32 %v1214_v47  ;;  %v1381_v47 = vld [vmem:[#allocation7 + $0x28] sm:$0xff] }
 0xcef   :  { %v2722_v56 = vpop.eup %2721 }
 0xcf0   :  { %v2724_v55 = vpop.eup %2723  ;;  %v1224_v45 = vsel %vm101_vm11, %v2720_v8, %v2722_v56  ;;  %v1379_v8 = vld [vmem:[#allocation7 + $0x18] sm:$0xff]  ;;  %v1378_v56 = vld [vmem:[#allocation7 + $0x10] sm:$0xff] }
 0xcf1   :  { %v1230_v16 = vmul.f32 %v2724_v55, %v1224_v45  ;;  %v1229_v60 = vmul.f32 %v2724_v55, %v1227_v10  ;;  %v1377_v55 = vld [vmem:[#allocation7 + $0x8] sm:$0xff] }
 0xcf3   :  { %1232 = vrot.lane.b32.xlu1 %v1230_v16, %s2928_s4 }
 0xd65   :  { %v1233_v20 = vpop.permute.xlu1 %1232 }
 0xd66   :  { %v1235_v21 = vadd.f32 %v1233_v20, %v1229_v60  ;;  %v3654_v60 = vld [vmem:[#allocation9 + $0x78] sm:$0xff]  ;;  %v3656_v20 = vld [vmem:[#allocation9 + $0x70] sm:$0xff] }
 0xd67   :  { %1639 = vmatprep.subr.mxu1 %v3654_v60 }
 0xd68   :  { %2725 = vtanh.f32 %v1235_v21  ;;  %1239 = vrot.lane.b32.xlu1 %v1235_v21, %s2928_s4  ;;  %v3659_v21 = vld [vmem:[#allocation9 + $0x68] sm:$0xff] }
 0xd75   :  { %v2726_v25 = vpop.eup %2725 }
 0xd76   :  { %v1237_v27 = vmul.f32 %v2726_v25, %v1224_v45  ;;  %v1376_v45 = vld [vmem:[#allocation7] sm:$0xff] }
 0xd77   :  { %v3664_v25 = vld [vmem:[#allocation9 + $0x60] sm:$0xff] }
 0xd78   :  { %1244 = vrot.lane.b32.xlu0 %v1237_v27, %s2928_s4  ;;  %v3666_v27 = vld [vmem:[#allocation9 + $0x58] sm:$0xff] }
 0xdda   :  { %v1240_v33 = vpop.permute.xlu1 %1239 }
 0xddb   :  { %v1242_v35 = vsel %vm122_vm8, %v1240_v33, %v1125_v17  ;;  %v3671_v33 = vld [vmem:[#allocation9 + $0x48] sm:$0xff] }
 0xddc   :  { %1343 = vrot.lane.b32.xlu0 %v1242_v35, %s2928_s4  ;;  %v3676_v35 = vld [vmem:[#allocation9 + $0x40] sm:$0xff] }
 0xdea   :  { %v1245_v36 = vpop.permute.xlu0 %1244 }
 0xdeb   :  { %v3629_v37 = vsel %vm122_vm8, %v1245_v36, %v1130_v19  ;;  %v1388_v19 = vld [vmem:[#allocation7 + $0x60] sm:$0xff]  ;;  %v3678_v36 = vld [vmem:[#allocation9 + $0x38] sm:$0xff] }
 0xdec   :  { %1248 = vst.msk [vmem:[#allocation3 + $0x30] sm:$0xff] %vm3334_vm1, %v3629_v37  ;;  %2589 = vmatmul.mubr.msk.f32.vlgmr.msra.gmra.mxu1 %vm209_vm0, %v3629_v37  ;;  %1447 = vmatpush1.msra.mxu0 %v1388_v19 }
 0xded   :  { %1249 = vst.msk [vmem:[#allocation3 + $0x8] sm:$0xff] %vm3339_vm2, %v3629_v37  ;;  %1687 = vmatprep.mubr.f32.mxu1 %v2927_v1  ;;  %1448 = vmatprep.subr.mxu0 %v1387_v30 }
 0xdee   :  { %1449 = vmatpush1.msra.mxu0 %v1386_v46  ;;  %1640 = vmatpush1.msra.mxu1 %v3656_v20  ;;  %v4159_v46 = vsub.s32 1, %v3190_v61 }
 0xdef   :  { %1450 = vmatprep.subr.mxu0 %v1385_v63  ;;  %1641 = vmatprep.subr.mxu1 %v3659_v21 }
 0xdf0   :  { %1451 = vmatpush1.msra.mxu0 %v1384_v2  ;;  %1642 = vmatpush1.msra.mxu1 %v3664_v25 }
 0xdf1   :  { %1452 = vmatprep.subr.mxu0 %v1383_v22  ;;  %1643 = vmatprep.subr.mxu1 %v3666_v27 }
 0xdf2   :  { %1453 = vmatpush1.msra.mxu0 %v1382_v32  ;;  %1644 = vmatpush1.msra.mxu1 %v3668_v29 }
 0xdf3   :  { %1454 = vmatprep.subr.mxu0 %v1381_v47  ;;  %1645 = vmatprep.subr.mxu1 %v3671_v33 }
 0xdf4   :  { %1455 = vmatpush1.msra.mxu0 %v1380_v53  ;;  %1646 = vmatpush1.msra.mxu1 %v3676_v35 }
 0xdf5   :  { %1456 = vmatprep.subr.mxu0 %v1379_v8  ;;  %1647 = vmatprep.subr.mxu1 %v3678_v36 }
 0xdf6   :  { %1457 = vmatpush1.msra.mxu0 %v1378_v56 }
 0xdf7   :  { %1458 = vmatprep.subr.mxu0 %v1377_v55 }
 0xdf8   :  { %1459 = vmatpush1.msra.mxu0 %v1376_v45 }
 0xdf9   :  { %1865 = vmatprep.subr.mxu0 %v3654_v60 }
 0xe4e   :  { %v1344_v6 = vpop.permute.xlu0 %1343 }
 0xeac   :  { %v1321_v38 = vpop.f32.mrf.mxu1 }
 0xead   :  { %v1326_v40 = vadd.f32 %v1321_v38, %v4155_v39  ;;  %v3680_v38 = vld [vmem:[#allocation9 + $0x30] sm:$0xff]  ;;  %v3683_v39 = vld [vmem:[#allocation9 + $0x28] sm:$0xff] }
 0xeae   :  { %v1323_v41 = vpop.f32.mrf.mxu1  ;;  %1648 = vmatpush1.msra.mxu1 %v3680_v38 }
 0xeaf   :  { %v2590_v42 = vmul.f32 -1.442695, %v1326_v40  ;;  %v1327_v15 = vadd.f32 %v1323_v41, %v4156_v12  ;;  %1649 = vmatprep.subr.mxu1 %v3683_v39  ;;  %v3688_v40 = vld [vmem:[#allocation9 + $0x20] sm:$0xff]  ;;  %v3690_v41 = vld [vmem:[#allocation9 + $0x18] sm:$0xff]  ;;  %v3695_v12 = vld [vmem:[#allocation9 + $0x8] sm:$0xff] }
 0xeb0   :  { %1650 = vmatpush1.msra.mxu1 %v3688_v40 }
 0xeb1   :  { %2727 = vpow2.f32 %v2590_v42  ;;  %v2591_v48 = vmul.f32 -1.442695, %v1327_v15  ;;  %v3692_v42 = vld [vmem:[#allocation9 + $0x10] sm:$0xff]  ;;  %1651 = vmatprep.subr.mxu1 %v3690_v41 }
 0xeb2   :  { %1652 = vmatpush1.msra.mxu1 %v3692_v42 }
 0xeb3   :  { %2729 = vpow2.f32 %v2591_v48  ;;  %1653 = vmatprep.subr.mxu1 %v3695_v12  ;;  %v4157_v48 = vmov 0  }
 0xeb4   :  { %2731 = vtanh.f32 %v1327_v15  ;;  %v3700_v15 = vld [vmem:[#allocation9] sm:$0xff] }
 0xeb5   :  { %1654 = vmatpush1.msra.mxu1 %v3700_v15 }
 0xeb6   :  { %1688 = vmatmul.mubr.f32.vlgmr.msra.gmra.mxu1 %v2927_v1  ;;  %1750 = vmatprep.subr.mxu1 %v3654_v60 }
 0xeb7   :  { %1751 = vmatpush1.msra.mxu1 %v3656_v20  ;;  %1798 = vmatprep.mubr.f32.mxu1 %v2927_v1 }
 0xeb8   :  { %1752 = vmatprep.subr.mxu1 %v3659_v21 }
 0xeb9   :  { %1753 = vmatpush1.msra.mxu1 %v3664_v25 }
 0xeba   :  { %1754 = vmatprep.subr.mxu1 %v3666_v27 }
 0xebb   :  { %1755 = vmatpush1.msra.mxu1 %v3668_v29 }
 0xebc   :  { %1756 = vmatprep.subr.mxu1 %v3671_v33 }
 0xebd   :  { %1757 = vmatpush1.msra.mxu1 %v3676_v35 }
 0xebe   :  { %v2728_v52 = vpop.eup %2727  ;;  %1758 = vmatprep.subr.mxu1 %v3678_v36 }
 0xebf   :  { %v1331_v18 = vadd.f32 1.0, %v2728_v52  ;;  %1759 = vmatpush1.msra.mxu1 %v3680_v38  ;;  %v3725_v52 = vsel %vm102_vm12, 7, %v4157_v48 }
 0xec0   :  { %v2730_v54 = vpop.eup %2729  ;;  %1760 = vmatprep.subr.mxu1 %v3683_v39  ;;  %vm124_vm14 = vcmp.gt.s32.totalorder %v3314_v59, %v3725_v52 }
 0xec1   :  { %v1338_v4 = vadd.f32 1.0, %v2730_v54  ;;  %v2732_v11 = vpop.eup %2731  ;;  %1761 = vmatpush1.msra.mxu1 %v3688_v40 }
 0xec2   :  { %1762 = vmatprep.subr.mxu1 %v3690_v41 }
 0xec3   :  { %2733 = vrcp.f32 %v1338_v4  ;;  %1763 = vmatpush1.msra.mxu1 %v3692_v42 }
 0xec4   :  { %2735 = vrcp.f32 %v1331_v18  ;;  %1764 = vmatprep.subr.mxu1 %v3695_v12 }
 0xec5   :  { %1765 = vmatpush1.msra.mxu1 %v3700_v15 }
 0xec6   :  { %1980 = vmatprep.subr.mxu1 %v3654_v60 }
 0xed0   :  { %v2734_v13 = vpop.eup %2733 }
 0xed1   :  { %v2736_v7 = vpop.eup %2735  ;;  %v1341_v49 = vsel %vm101_vm11, %v2732_v11, %v2734_v13  ;;  %v1369_v11 = vld [vmem:[#allocation3 + $0x8] sm:$0xff] }
 0xed2   :  { %v1347_v17 = vmul.f32 %v2736_v7, %v1341_v49  ;;  %v1346_v24 = vmul.f32 %v2736_v7, %v1344_v6  ;;  %v1373_v13 = vld [vmem:[#allocation3 + $0x28] sm:$0xff]  ;;  %v1374_v7 = vld [vmem:[#allocation3 + $0x30] sm:$0xff] }
 0xed4   :  { %1349 = vrot.lane.b32.xlu1 %v1347_v17, %s2928_s4  ;;  %v1392_v17 = vld [vmem:[%s4139_s7] sm:$0x3]  ;;  %s2937_s7 = smov 96  }
 0xed5   :  { %v1397_v19 = vrot.slane %v1392_v17, %v4158_v58  ;;  %v1401_v63 = vrot.slane %v1392_v17, %v4159_v46 }
 0xf46   :  { %v1350_v43 = vpop.permute.xlu1 %1349 }
 0xf47   :  { %v1352_v50 = vadd.f32 %v1350_v43, %v1346_v24 }
 0xf49   :  { %2737 = vtanh.f32 %v1352_v50 }
 0xf56   :  { %v2738_v16 = vpop.eup %2737 }
 0xf57   :  { %v1354_v10 = vmul.f32 %v2738_v16, %v1341_v49 }
 0xf59   :  { %1356 = vrot.lane.b32.xlu0 %v1354_v10, %s2928_s4 }
 0xfcb   :  { %v1357_v54 = vpop.permute.xlu0 %1356 }
 0xfcc   :  { %v3733_v18 = vsel %vm124_vm14, %v1357_v54, %v3629_v37  ;;  %v1372_v37 = vld [vmem:[#allocation3 + $0x20] sm:$0xff] }
 0xfcd   :  { %1360 = vst.msk [vmem:[#allocation3 + $0x38] sm:$0xff] %vm3334_vm1, %v3733_v18 }
 0xfce   :  { %1361 = vst.msk [vmem:[#allocation3] sm:$0xff] %vm3339_vm2, %v3733_v18 }
 0xfd4   :  { %v1375_v49 = vld [vmem:[#allocation3 + $0x38] sm:$0xff] }
 0xfd5   :  { %v1368_v4 = vld [vmem:[#allocation3] sm:$0xff] }
 0xfd6   :  { %2592 = vmatmul.mubr.msk.f32.vlgmr.msra.gmra.mxu0 %vm209_vm0, %v1368_v4 }
 0xfd7   :  { %1498 = vmatprep.mubr.f32.mxu0 %v2927_v1  ;;  %1866 = vmatpush1.msra.mxu0 %v3656_v20 }
 0xfd8   :  { %1867 = vmatprep.subr.mxu0 %v3659_v21 }
 0xfd9   :  { %1868 = vmatpush1.msra.mxu0 %v3664_v25 }
 0xfda   :  { %2593 = vmatmul.mubr.msk.f32.gmra.mxu0 %vm209_vm0, %v1369_v11  ;;  %1869 = vmatprep.subr.mxu0 %v3666_v27 }
 0xfdb   :  { %1504 = vmatprep.mubr.f32.mxu0 %v2927_v1  ;;  %1870 = vmatpush1.msra.mxu0 %v3668_v29 }
 0xfdc   :  { %1871 = vmatprep.subr.mxu0 %v3671_v33 }
 0xfdd   :  { %1872 = vmatpush1.msra.mxu0 %v3676_v35 }
 0xfde   :  { %2594 = vmatmul.mubr.msk.f32.gmra.mxu0 %vm209_vm0, %v1370_v51  ;;  %1873 = vmatprep.subr.mxu0 %v3678_v36 }
 0xfdf   :  { %1510 = vmatprep.mubr.f32.mxu0 %v2927_v1  ;;  %1874 = vmatpush1.msra.mxu0 %v3680_v38 }
 0xfe0   :  { %1875 = vmatprep.subr.mxu0 %v3683_v39 }
 0xfe1   :  { %1876 = vmatpush1.msra.mxu0 %v3688_v40 }
 0xfe2   :  { %2595 = vmatmul.mubr.msk.f32.gmra.mxu0 %vm209_vm0, %v1371_v14  ;;  %1877 = vmatprep.subr.mxu0 %v3690_v41 }
 0xfe3   :  { %1516 = vmatprep.mubr.f32.mxu0 %v2927_v1  ;;  %1878 = vmatpush1.msra.mxu0 %v3692_v42 }
 0xfe4   :  { %1879 = vmatprep.subr.mxu0 %v3695_v12 }
 0xfe5   :  { %1880 = vmatpush1.msra.mxu0 %v3700_v15 }
 0xfe6   :  { %2596 = vmatmul.mubr.msk.f32.gmra.mxu0 %vm209_vm0, %v1372_v37  ;;  %2095 = vmatprep.subr.mxu0 %v3654_v60 }
 0xfe7   :  { %1522 = vmatprep.mubr.f32.mxu0 %v2927_v1 }
 0xfea   :  { %2597 = vmatmul.mubr.msk.f32.gmra.mxu0 %vm209_vm0, %v1373_v13 }
 0xfeb   :  { %1528 = vmatprep.mubr.f32.mxu0 %v2927_v1 }
 0xfee   :  { %2598 = vmatmul.mubr.msk.f32.gmra.mxu0 %vm209_vm0, %v1374_v7 }
 0xfef   :  { %1534 = vmatprep.mubr.f32.mxu0 %v2927_v1 }
 0xff2   :  { %2599 = vmatmul.mubr.msk.f32.gmra.mxu0 %vm209_vm0, %v1375_v49 }
 0xff3   :  { %1913 = vmatprep.mubr.f32.mxu0 %v2927_v1 }
0x1096   :  { %v1494_v23 = vpop.f32.mrf.mxu0 }
0x1098   :  { %v1496_v5 = vpop.f32.mrf.mxu0 }
0x109a   :  { %v1500_v30 = vpop.f32.mrf.mxu0 }
0x109b   :  { %v3780_v6 = vadd.f32 %v1500_v30, %v1397_v19 }
0x109c   :  { %v1502_v24 = vpop.f32.mrf.mxu0 }
0x109d   :  { %v3782_v43 = vadd.f32 %v1502_v24, %v1401_v63 }
0x109e   :  { %v1506_v50 = vpop.f32.mrf.mxu0 }
0x109f   :  { %v3784_v2 = vadd.f32 %v1506_v50, %v1397_v19 }
0x10a0   :  { %v1508_v22 = vpop.f32.mrf.mxu0 }
0x10a1   :  { %v3786_v32 = vadd.f32 %v1508_v22, %v1401_v63 }
0x10a2   :  { %v1512_v47 = vpop.f32.mrf.mxu0 }
0x10a3   :  { %v3788_v53 = vadd.f32 %v1512_v47, %v1397_v19 }
0x10a4   :  { %v1514_v8 = vpop.f32.mrf.mxu0 }
0x10a5   :  { %v3790_v56 = vadd.f32 %v1514_v8, %v1401_v63  ;;  %v3844_v8 = vadd.f32 %v1494_v23, %v1397_v19 }
0x10a6   :  { %v1518_v55 = vpop.f32.mrf.mxu0 }
0x10a7   :  { %v3792_v61 = vadd.f32 %v1518_v55, %v1397_v19 }
0x10a8   :  { %v1520_v45 = vpop.f32.mrf.mxu0 }
0x10a9   :  { %v3794_v16 = vadd.f32 %v1520_v45, %v1401_v63  ;;  %v1689_v45 = vpop.f32.mrf.mxu1 }
0x10aa   :  { %v1524_v54 = vpop.f32.mrf.mxu0 }
0x10ab   :  { %v3804_v4 = vadd.f32 %v1524_v54, %v1397_v19 }
0x10ac   :  { %v1526_v14 = vpop.f32.mrf.mxu0 }
0x10ad   :  { %v3814_v37 = vadd.f32 %v1526_v14, %v1401_v63  ;;  %v4166_v3 = vsel %vm3215_vm9, %v3804_v4, %v3784_v2 }
0x10ae   :  { %v1530_v49 = vpop.f32.mrf.mxu0 }
0x10af   :  { %v3824_v17 = vadd.f32 %v1530_v49, %v1397_v19 }
0x10b0   :  { %v1532_v46 = vpop.f32.mrf.mxu0 }
0x10b1   :  { %v3834_v24 = vadd.f32 %v1532_v46, %v1401_v63  ;;  %v1573_v50 = vsel %vm3215_vm9, %v3780_v6, %v3824_v17  ;;  %v3856_v46 = vadd.f32 %v1496_v5, %v1401_v63  ;;  %v1691_v5 = vpop.f32.mrf.mxu1 }
0x10b2   :  { %v1536_v47 = vpop.f32.mrf.mxu0 }
0x10b3   :  { %v3846_v55 = vadd.f32 %v1536_v47, %v1397_v19  ;;  %v1574_v54 = vsel %vm3221_vm10, %v3782_v43, %v3834_v24 }
0x10b4   :  { %v1538_v49 = vpop.f32.mrf.mxu0 }
0x10b5   :  { %v1561_v23 = vsel %vm3215_vm9, %v3844_v8, %v3846_v55  ;;  %v3862_v19 = vadd.f32 %v1538_v49, %v1401_v63 }
0x10b6   :  { %v1694_v22 = vadd.f32 %v1689_v45, %v1561_v23 }
0x10b7   :  { %v1562_v14 = vsel %vm3221_vm10, %v3856_v46, %v3862_v19  ;;  %v1566_v30 = vsel %vm3221_vm10, %v3862_v19, %v3856_v46 }
0x10b8   :  { %v2600_v7 = vmul.f32 -1.442695, %v1694_v22  ;;  %v1695_v63 = vadd.f32 %v1691_v5, %v1562_v14 }
0x10ba   :  { %2739 = vpow2.f32 %v2600_v7  ;;  %v2601_v49 = vmul.f32 -1.442695, %v1695_v63 }
0x10bc   :  { %2741 = vpow2.f32 %v2601_v49 }
0x10bd   :  { %2743 = vtanh.f32 %v1695_v63 }
0x10c7   :  { %v2740_v51 = vpop.eup %2739 }
0x10c8   :  { %v1699_v47 = vadd.f32 1.0, %v2740_v51 }
0x10c9   :  { %v2742_v48 = vpop.eup %2741 }
0x10ca   :  { %v1706_v45 = vadd.f32 1.0, %v2742_v48  ;;  %v2744_v23 = vpop.eup %2743 }
0x10cc   :  { %2745 = vrcp.f32 %v1706_v45 }
0x10cd   :  { %2747 = vrcp.f32 %v1699_v47 }
0x10d9   :  { %v2746_v11 = vpop.eup %2745 }
0x10da   :  { %v2748_v10 = vpop.eup %2747  ;;  %v1709_v58 = vsel %vm101_vm11, %v2744_v23, %v2746_v11 }
0x10db   :  { %v1711_v13 = vmul.f32 %v2748_v10, %v1709_v58  ;;  %v1710_v22 = vmul.f32 0.0, %v2748_v10 }
0x10dd   :  { %1713 = vrot.lane.b32.xlu1 %v1711_v13, %s2928_s4 }
0x114f   :  { %v1714_v7 = vpop.permute.xlu1 %1713 }
0x1150   :  { %v1716_v14 = vadd.f32 %v1714_v7, %v1710_v22 }
0x1152   :  { %2749 = vtanh.f32 %v1716_v14  ;;  %1720 = vrot.lane.b32.xlu1 %v1716_v14, %s2928_s4 }
0x115f   :  { %v2750_v51 = vpop.eup %2749 }
0x1160   :  { %v1718_v48 = vmul.f32 %v2750_v51, %v1709_v58 }
0x1162   :  { %1725 = vrot.lane.b32.xlu0 %v1718_v48, %s2928_s4 }
0x11c4   :  { %v1721_v47 = vpop.permute.xlu1 %1720 }
0x11c5   :  { %v1723_v5 = vsel %vm110_vm13, %v1721_v47, 0.0 }
0x11c6   :  { %1822 = vrot.lane.b32.xlu0 %v1723_v5, %s2928_s4 }
0x11d4   :  { %v1726_v11 = vpop.permute.xlu0 %1725 }
0x11d5   :  { %v1728_v10 = vsel %vm110_vm13, %v1726_v11, 0.0 }
0x11d6   :  { %2602 = vmatmul.mubr.msk.f32.vlgmr.msra.gmra.mxu1 %vm209_vm0, %v1728_v10 }
0x11d7   :  { %1981 = vmatpush1.msra.mxu1 %v3656_v20  ;;  %2028 = vmatprep.mubr.f32.mxu1 %v2927_v1 }
0x11d8   :  { %1982 = vmatprep.subr.mxu1 %v3659_v21 }
0x11d9   :  { %1983 = vmatpush1.msra.mxu1 %v3664_v25 }
0x11da   :  { %1984 = vmatprep.subr.mxu1 %v3666_v27 }
0x11db   :  { %1985 = vmatpush1.msra.mxu1 %v3668_v29 }
0x11dc   :  { %1986 = vmatprep.subr.mxu1 %v3671_v33 }
0x11dd   :  { %1987 = vmatpush1.msra.mxu1 %v3676_v35 }
0x11de   :  { %1988 = vmatprep.subr.mxu1 %v3678_v36 }
0x11df   :  { %1989 = vmatpush1.msra.mxu1 %v3680_v38 }
0x11e0   :  { %1990 = vmatprep.subr.mxu1 %v3683_v39 }
0x11e1   :  { %1991 = vmatpush1.msra.mxu1 %v3688_v40 }
0x11e2   :  { %1992 = vmatprep.subr.mxu1 %v3690_v41 }
0x11e3   :  { %1993 = vmatpush1.msra.mxu1 %v3692_v42 }
0x11e4   :  { %1994 = vmatprep.subr.mxu1 %v3695_v12 }
0x11e5   :  { %1995 = vmatpush1.msra.mxu1 %v3700_v15 }
0x11e6   :  { %2210 = vmatprep.subr.mxu1 %v3654_v60 }
0x1296   :  { %v1800_v62 = vpop.f32.mrf.mxu1 }
0x1297   :  { %v1805_v13 = vadd.f32 %v1800_v62, %v1573_v50 }
0x1298   :  { %v1802_v58 = vpop.f32.mrf.mxu1 }
0x1299   :  { %v2603_v63 = vmul.f32 -1.442695, %v1805_v13  ;;  %v1806_v49 = vadd.f32 %v1802_v58, %v1574_v54  ;;  %v1823_v54 = vpop.permute.xlu0 %1822 }
0x129b   :  { %2751 = vpow2.f32 %v2603_v63  ;;  %v2604_v45 = vmul.f32 -1.442695, %v1806_v49 }
0x129d   :  { %2753 = vpow2.f32 %v2604_v45 }
0x129e   :  { %2755 = vtanh.f32 %v1806_v49 }
0x12a8   :  { %v2752_v23 = vpop.eup %2751 }
0x12a9   :  { %v1810_v7 = vadd.f32 1.0, %v2752_v23 }
0x12aa   :  { %v2754_v22 = vpop.eup %2753 }
0x12ab   :  { %v1817_v14 = vadd.f32 1.0, %v2754_v22  ;;  %v2756_v51 = vpop.eup %2755 }
0x12ad   :  { %2757 = vrcp.f32 %v1817_v14 }
0x12ae   :  { %2759 = vrcp.f32 %v1810_v7 }
0x12ba   :  { %v2758_v50 = vpop.eup %2757 }
0x12bb   :  { %v2760_v48 = vpop.eup %2759  ;;  %v1820_v47 = vsel %vm101_vm11, %v2756_v51, %v2758_v50  ;;  %v4161_v50 = vsel %vm3221_vm10, %v3786_v32, %v3814_v37 }
0x12bc   :  { %v1826_v11 = vmul.f32 %v2760_v48, %v1820_v47  ;;  %v1825_v62 = vmul.f32 %v2760_v48, %v1823_v54 }
0x12be   :  { %1828 = vrot.lane.b32.xlu1 %v1826_v11, %s2928_s4 }
0x1330   :  { %v1829_v13 = vpop.permute.xlu1 %1828 }
0x1331   :  { %v1831_v58 = vadd.f32 %v1829_v13, %v1825_v62 }
0x1333   :  { %2761 = vtanh.f32 %v1831_v58  ;;  %1835 = vrot.lane.b32.xlu1 %v1831_v58, %s2928_s4 }
0x1340   :  { %v2762_v63 = vpop.eup %2761 }
0x1341   :  { %v1833_v49 = vmul.f32 %v2762_v63, %v1820_v47 }
0x1343   :  { %1840 = vrot.lane.b32.xlu0 %v1833_v49, %s2928_s4 }
0x13a5   :  { %v1836_v45 = vpop.permute.xlu1 %1835 }
0x13a6   :  { %v1838_v23 = vsel %vm112_vm3, %v1836_v45, %v1723_v5  ;;  %v4160_v5 = vsel %vm3215_vm9, %v3784_v2, %v3804_v4 }
0x13a7   :  { %1937 = vrot.lane.b32.xlu0 %v1838_v23, %s2928_s4 }
0x13b5   :  { %v1841_v22 = vpop.permute.xlu0 %1840 }
0x13b6   :  { %v1843_v7 = vsel %vm112_vm3, %v1841_v22, %v1728_v10 }
0x13b7   :  { %2605 = vmatmul.mubr.msk.f32.vlgmr.msra.gmra.mxu0 %vm209_vm0, %v1843_v7 }
0x13b8   :  { %2096 = vmatpush1.msra.mxu0 %v3656_v20  ;;  %2143 = vmatprep.mubr.f32.mxu0 %v2927_v1 }
0x13b9   :  { %2097 = vmatprep.subr.mxu0 %v3659_v21 }
0x13ba   :  { %2098 = vmatpush1.msra.mxu0 %v3664_v25 }
0x13bb   :  { %2099 = vmatprep.subr.mxu0 %v3666_v27 }
0x13bc   :  { %2100 = vmatpush1.msra.mxu0 %v3668_v29 }
0x13bd   :  { %2101 = vmatprep.subr.mxu0 %v3671_v33 }
0x13be   :  { %2102 = vmatpush1.msra.mxu0 %v3676_v35 }
0x13bf   :  { %2103 = vmatprep.subr.mxu0 %v3678_v36 }
0x13c0   :  { %2104 = vmatpush1.msra.mxu0 %v3680_v38 }
0x13c1   :  { %2105 = vmatprep.subr.mxu0 %v3683_v39 }
0x13c2   :  { %2106 = vmatpush1.msra.mxu0 %v3688_v40 }
0x13c3   :  { %2107 = vmatprep.subr.mxu0 %v3690_v41 }
0x13c4   :  { %2108 = vmatpush1.msra.mxu0 %v3692_v42 }
0x13c5   :  { %2109 = vmatprep.subr.mxu0 %v3695_v12 }
0x13c6   :  { %2110 = vmatpush1.msra.mxu0 %v3700_v15 }
0x13c7   :  { %2325 = vmatprep.subr.mxu0 %v3654_v60 }
0x1477   :  { %v1915_v26 = vpop.f32.mrf.mxu0 }
0x1478   :  { %v1920_v10 = vadd.f32 %v1915_v26, %v4160_v5  ;;  %v1938_v26 = vpop.permute.xlu0 %1937 }
0x1479   :  { %v1917_v14 = vpop.f32.mrf.mxu0 }
0x147a   :  { %v2606_v51 = vmul.f32 -1.442695, %v1920_v10  ;;  %v1921_v48 = vadd.f32 %v1917_v14, %v4161_v50 }
0x147c   :  { %2763 = vpow2.f32 %v2606_v51  ;;  %v2607_v47 = vmul.f32 -1.442695, %v1921_v48 }
0x147e   :  { %2765 = vpow2.f32 %v2607_v47 }
0x147f   :  { %2767 = vtanh.f32 %v1921_v48 }
0x1489   :  { %v2764_v11 = vpop.eup %2763 }
0x148a   :  { %v1925_v62 = vadd.f32 1.0, %v2764_v11 }
0x148b   :  { %v2766_v54 = vpop.eup %2765 }
0x148c   :  { %v1932_v13 = vadd.f32 1.0, %v2766_v54  ;;  %v2768_v58 = vpop.eup %2767 }
0x148e   :  { %2769 = vrcp.f32 %v1932_v13 }
0x148f   :  { %2771 = vrcp.f32 %v1925_v62 }
0x149b   :  { %v2770_v63 = vpop.eup %2769 }
0x149c   :  { %v2772_v49 = vpop.eup %2771  ;;  %v1935_v45 = vsel %vm101_vm11, %v2768_v58, %v2770_v63  ;;  %v4163_v58 = vsel %vm3221_vm10, %v3790_v56, %v3794_v16 }
0x149d   :  { %v1941_v22 = vmul.f32 %v2772_v49, %v1935_v45  ;;  %v1940_v5 = vmul.f32 %v2772_v49, %v1938_v26 }
0x149f   :  { %1943 = vrot.lane.b32.xlu1 %v1941_v22, %s2928_s4 }
0x1511   :  { %v1944_v10 = vpop.permute.xlu1 %1943 }
0x1512   :  { %v1946_v14 = vadd.f32 %v1944_v10, %v1940_v5 }
0x1514   :  { %2773 = vtanh.f32 %v1946_v14  ;;  %1950 = vrot.lane.b32.xlu1 %v1946_v14, %s2928_s4 }
0x1521   :  { %v2774_v51 = vpop.eup %2773 }
0x1522   :  { %v1948_v50 = vmul.f32 %v2774_v51, %v1935_v45 }
0x1524   :  { %1955 = vrot.lane.b32.xlu0 %v1948_v50, %s2928_s4 }
0x1586   :  { %v1951_v48 = vpop.permute.xlu1 %1950 }
0x1587   :  { %v1953_v47 = vsel %vm114_vm4, %v1951_v48, %v1838_v23  ;;  %v4162_v23 = vsel %vm3215_vm9, %v3788_v53, %v3792_v61 }
0x1588   :  { %2052 = vrot.lane.b32.xlu0 %v1953_v47, %s2928_s4 }
0x1596   :  { %v1956_v11 = vpop.permute.xlu0 %1955 }
0x1597   :  { %v1958_v54 = vsel %vm114_vm4, %v1956_v11, %v1843_v7 }
0x1598   :  { %2608 = vmatmul.mubr.msk.f32.vlgmr.msra.gmra.mxu1 %vm209_vm0, %v1958_v54 }
0x1599   :  { %2211 = vmatpush1.msra.mxu1 %v3656_v20  ;;  %2258 = vmatprep.mubr.f32.mxu1 %v2927_v1 }
0x159a   :  { %2212 = vmatprep.subr.mxu1 %v3659_v21 }
0x159b   :  { %2213 = vmatpush1.msra.mxu1 %v3664_v25 }
0x159c   :  { %2214 = vmatprep.subr.mxu1 %v3666_v27 }
0x159d   :  { %2215 = vmatpush1.msra.mxu1 %v3668_v29 }
0x159e   :  { %2216 = vmatprep.subr.mxu1 %v3671_v33 }
0x159f   :  { %2217 = vmatpush1.msra.mxu1 %v3676_v35 }
0x15a0   :  { %2218 = vmatprep.subr.mxu1 %v3678_v36 }
0x15a1   :  { %2219 = vmatpush1.msra.mxu1 %v3680_v38 }
0x15a2   :  { %2220 = vmatprep.subr.mxu1 %v3683_v39 }
0x15a3   :  { %2221 = vmatpush1.msra.mxu1 %v3688_v40 }
0x15a4   :  { %2222 = vmatprep.subr.mxu1 %v3690_v41 }
0x15a5   :  { %2223 = vmatpush1.msra.mxu1 %v3692_v42 }
0x15a6   :  { %2224 = vmatprep.subr.mxu1 %v3695_v12 }
0x15a7   :  { %2225 = vmatpush1.msra.mxu1 %v3700_v15 }
0x15a8   :  { %2440 = vmatprep.subr.mxu1 %v3654_v60 }
0x15fa   :  { %v2053_v48 = vpop.permute.xlu0 %2052 }
0x1658   :  { %v2030_v9 = vpop.f32.mrf.mxu1 }
0x1659   :  { %v2035_v7 = vadd.f32 %v2030_v9, %v4162_v23 }
0x165a   :  { %v2032_v62 = vpop.f32.mrf.mxu1 }
0x165b   :  { %v2609_v13 = vmul.f32 -1.442695, %v2035_v7  ;;  %v2036_v63 = vadd.f32 %v2032_v62, %v4163_v58 }
0x165d   :  { %2775 = vpow2.f32 %v2609_v13  ;;  %v2610_v49 = vmul.f32 -1.442695, %v2036_v63 }
0x165f   :  { %2777 = vpow2.f32 %v2610_v49 }
0x1660   :  { %2779 = vtanh.f32 %v2036_v63 }
0x166a   :  { %v2776_v45 = vpop.eup %2775 }
0x166b   :  { %v2040_v22 = vadd.f32 1.0, %v2776_v45 }
0x166c   :  { %v2778_v60 = vpop.eup %2777 }
0x166d   :  { %v2047_v26 = vadd.f32 1.0, %v2778_v60  ;;  %v2780_v5 = vpop.eup %2779 }
0x166f   :  { %2781 = vrcp.f32 %v2047_v26 }
0x1670   :  { %2783 = vrcp.f32 %v2040_v22  ;;  %v4165_v22 = vsel %vm3221_vm10, %v3794_v16, %v3790_v56 }
0x167c   :  { %v2782_v10 = vpop.eup %2781 }
0x167d   :  { %v2784_v14 = vpop.eup %2783  ;;  %v2050_v51 = vsel %vm101_vm11, %v2780_v5, %v2782_v10 }
0x167e   :  { %v2056_v50 = vmul.f32 %v2784_v14, %v2050_v51  ;;  %v2055_v11 = vmul.f32 %v2784_v14, %v2053_v48 }
0x1680   :  { %2058 = vrot.lane.b32.xlu1 %v2056_v50, %s2928_s4 }
0x16f2   :  { %v2059_v9 = vpop.permute.xlu1 %2058 }
0x16f3   :  { %v2061_v23 = vadd.f32 %v2059_v9, %v2055_v11 }
0x16f5   :  { %2785 = vtanh.f32 %v2061_v23  ;;  %2065 = vrot.lane.b32.xlu1 %v2061_v23, %s2928_s4 }
0x1702   :  { %v2786_v7 = vpop.eup %2785 }
0x1703   :  { %v2063_v62 = vmul.f32 %v2786_v7, %v2050_v51 }
0x1705   :  { %2070 = vrot.lane.b32.xlu0 %v2063_v62, %s2928_s4 }
0x1767   :  { %v2066_v13 = vpop.permute.xlu1 %2065 }
0x1768   :  { %v2068_v58 = vsel %vm116_vm5, %v2066_v13, %v1953_v47  ;;  %v4164_v47 = vsel %vm3215_vm9, %v3792_v61, %v3788_v53 }
0x1769   :  { %2167 = vrot.lane.b32.xlu0 %v2068_v58, %s2928_s4 }
0x1777   :  { %v2071_v63 = vpop.permute.xlu0 %2070 }
0x1778   :  { %v2073_v49 = vsel %vm116_vm5, %v2071_v63, %v1958_v54 }
0x1779   :  { %2611 = vmatmul.mubr.msk.f32.vlgmr.msra.gmra.mxu0 %vm209_vm0, %v2073_v49 }
0x177a   :  { %2326 = vmatpush1.msra.mxu0 %v3656_v20  ;;  %2373 = vmatprep.mubr.f32.mxu0 %v2927_v1 }
0x177b   :  { %2327 = vmatprep.subr.mxu0 %v3659_v21 }
0x177c   :  { %2328 = vmatpush1.msra.mxu0 %v3664_v25 }
0x177d   :  { %2329 = vmatprep.subr.mxu0 %v3666_v27 }
0x177e   :  { %2330 = vmatpush1.msra.mxu0 %v3668_v29 }
0x177f   :  { %2331 = vmatprep.subr.mxu0 %v3671_v33 }
0x1780   :  { %2332 = vmatpush1.msra.mxu0 %v3676_v35 }
0x1781   :  { %2333 = vmatprep.subr.mxu0 %v3678_v36 }
0x1782   :  { %2334 = vmatpush1.msra.mxu0 %v3680_v38 }
0x1783   :  { %2335 = vmatprep.subr.mxu0 %v3683_v39 }
0x1784   :  { %2336 = vmatpush1.msra.mxu0 %v3688_v40 }
0x1785   :  { %2337 = vmatprep.subr.mxu0 %v3690_v41 }
0x1786   :  { %2338 = vmatpush1.msra.mxu0 %v3692_v42 }
0x1787   :  { %2339 = vmatprep.subr.mxu0 %v3695_v12 }
0x1788   :  { %2340 = vmatpush1.msra.mxu0 %v3700_v15 }
0x17db   :  { %v2168_v56 = vpop.permute.xlu0 %2167 }
0x1839   :  { %v2145_v57 = vpop.f32.mrf.mxu0 }
0x183a   :  { %v2150_v54 = vadd.f32 %v2145_v57, %v4164_v47 }
0x183b   :  { %v2147_v45 = vpop.f32.mrf.mxu0 }
0x183c   :  { %v2612_v60 = vmul.f32 -1.442695, %v2150_v54  ;;  %v2151_v26 = vadd.f32 %v2147_v45, %v4165_v22 }
0x183e   :  { %2787 = vpow2.f32 %v2612_v60  ;;  %v2613_v5 = vmul.f32 -1.442695, %v2151_v26 }
0x1840   :  { %2789 = vpow2.f32 %v2613_v5 }
0x1841   :  { %2791 = vtanh.f32 %v2151_v26 }
0x184b   :  { %v2788_v10 = vpop.eup %2787 }
0x184c   :  { %v2155_v51 = vadd.f32 1.0, %v2788_v10  ;;  %v4168_v10 = vsel %vm3215_vm9, %v3824_v17, %v3780_v6 }
0x184d   :  { %v2790_v14 = vpop.eup %2789 }
0x184e   :  { %v2162_v50 = vadd.f32 1.0, %v2790_v14  ;;  %v2792_v53 = vpop.eup %2791 }
0x1850   :  { %2793 = vrcp.f32 %v2162_v50 }
0x1851   :  { %2795 = vrcp.f32 %v2155_v51 }
0x185d   :  { %v2794_v61 = vpop.eup %2793 }
0x185e   :  { %v2796_v48 = vpop.eup %2795  ;;  %v2165_v11 = vsel %vm101_vm11, %v2792_v53, %v2794_v61  ;;  %v4169_v53 = vsel %vm3221_vm10, %v3834_v24, %v3782_v43 }
0x185f   :  { %v2171_v9 = vmul.f32 %v2796_v48, %v2165_v11  ;;  %v2170_v16 = vmul.f32 %v2796_v48, %v2168_v56 }
0x1861   :  { %2173 = vrot.lane.b32.xlu1 %v2171_v9, %s2928_s4 }
0x18d3   :  { %v2174_v23 = vpop.permute.xlu1 %2173 }
0x18d4   :  { %v2176_v7 = vadd.f32 %v2174_v23, %v2170_v16 }
0x18d6   :  { %2797 = vtanh.f32 %v2176_v7  ;;  %2180 = vrot.lane.b32.xlu1 %v2176_v7, %s2928_s4 }
0x18e3   :  { %v2798_v62 = vpop.eup %2797 }
0x18e4   :  { %v2178_v13 = vmul.f32 %v2798_v62, %v2165_v11 }
0x18e6   :  { %2185 = vrot.lane.b32.xlu0 %v2178_v13, %s2928_s4 }
0x1948   :  { %v2181_v63 = vpop.permute.xlu1 %2180 }
0x1949   :  { %v2183_v57 = vsel %vm118_vm6, %v2181_v63, %v2068_v58 }
0x194a   :  { %2282 = vrot.lane.b32.xlu0 %v2183_v57, %s2928_s4 }
0x1958   :  { %v2186_v47 = vpop.permute.xlu0 %2185 }
0x1959   :  { %v2188_v54 = vsel %vm118_vm6, %v2186_v47, %v2073_v49 }
0x195a   :  { %2614 = vmatmul.mubr.msk.f32.vlgmr.msra.gmra.mxu1 %vm209_vm0, %v2188_v54 }
0x195b   :  { %2441 = vmatpush1.msra.mxu1 %v3656_v20  ;;  %2488 = vmatprep.mubr.f32.mxu1 %v2927_v1 }
0x195c   :  { %2442 = vmatprep.subr.mxu1 %v3659_v21 }
0x195d   :  { %2443 = vmatpush1.msra.mxu1 %v3664_v25 }
0x195e   :  { %2444 = vmatprep.subr.mxu1 %v3666_v27  ;;  %v4167_v27 = vsel %vm3221_vm10, %v3814_v37, %v3786_v32 }
0x195f   :  { %2445 = vmatpush1.msra.mxu1 %v3668_v29 }
0x1960   :  { %2446 = vmatprep.subr.mxu1 %v3671_v33 }
0x1961   :  { %2447 = vmatpush1.msra.mxu1 %v3676_v35 }
0x1962   :  { %2448 = vmatprep.subr.mxu1 %v3678_v36 }
0x1963   :  { %2449 = vmatpush1.msra.mxu1 %v3680_v38 }
0x1964   :  { %2450 = vmatprep.subr.mxu1 %v3683_v39 }
0x1965   :  { %2451 = vmatpush1.msra.mxu1 %v3688_v40 }
0x1966   :  { %2452 = vmatprep.subr.mxu1 %v3690_v41 }
0x1967   :  { %2453 = vmatpush1.msra.mxu1 %v3692_v42 }
0x1968   :  { %2454 = vmatprep.subr.mxu1 %v3695_v12 }
0x1969   :  { %2455 = vmatpush1.msra.mxu1 %v3700_v15 }
0x19bc   :  { %v2283_v2 = vpop.permute.xlu0 %2282 }
0x1a1a   :  { %v2260_v1 = vpop.f32.mrf.mxu1 }
0x1a1b   :  { %v2265_v20 = vadd.f32 %v2260_v1, %v4166_v3 }
0x1a1c   :  { %v2262_v21 = vpop.f32.mrf.mxu1 }
0x1a1d   :  { %v2615_v25 = vmul.f32 -1.442695, %v2265_v20  ;;  %v2266_v29 = vadd.f32 %v2262_v21, %v4167_v27  ;;  %v4170_v21 = vsel %vm3215_vm9, %v3846_v55, %v3844_v8 }
0x1a1f   :  { %2799 = vpow2.f32 %v2615_v25  ;;  %v2616_v33 = vmul.f32 -1.442695, %v2266_v29 }
0x1a21   :  { %2801 = vpow2.f32 %v2616_v33 }
0x1a22   :  { %2803 = vtanh.f32 %v2266_v29 }
0x1a2c   :  { %v2800_v35 = vpop.eup %2799 }
0x1a2d   :  { %v2270_v38 = vadd.f32 1.0, %v2800_v35 }
0x1a2e   :  { %v2802_v36 = vpop.eup %2801 }
0x1a2f   :  { %v2277_v39 = vadd.f32 1.0, %v2802_v36  ;;  %v2804_v40 = vpop.eup %2803 }
0x1a31   :  { %2805 = vrcp.f32 %v2277_v39 }
0x1a32   :  { %2807 = vrcp.f32 %v2270_v38 }
0x1a3e   :  { %v2806_v41 = vpop.eup %2805 }
0x1a3f   :  { %v2808_v42 = vpop.eup %2807  ;;  %v2280_v12 = vsel %vm101_vm11, %v2804_v40, %v2806_v41 }
0x1a40   :  { %v2286_v15 = vmul.f32 %v2808_v42, %v2280_v12  ;;  %v2285_v32 = vmul.f32 %v2808_v42, %v2283_v2 }
0x1a42   :  { %2288 = vrot.lane.b32.xlu1 %v2286_v15, %s2928_s4 }
0x1ab4   :  { %v2289_v4 = vpop.permute.xlu1 %2288 }
0x1ab5   :  { %v2291_v37 = vadd.f32 %v2289_v4, %v2285_v32 }
0x1ab7   :  { %2809 = vtanh.f32 %v2291_v37  ;;  %2295 = vrot.lane.b32.xlu1 %v2291_v37, %s2928_s4 }
0x1ac4   :  { %v2810_v58 = vpop.eup %2809 }
0x1ac5   :  { %v2293_v49 = vmul.f32 %v2810_v58, %v2280_v12 }
0x1ac7   :  { %2300 = vrot.lane.b32.xlu0 %v2293_v49, %s2928_s4 }
0x1b29   :  { %v2296_v45 = vpop.permute.xlu1 %2295 }
0x1b2a   :  { %v2298_v60 = vsel %vm120_vm7, %v2296_v45, %v2183_v57 }
0x1b2b   :  { %2397 = vrot.lane.b32.xlu0 %v2298_v60, %s2928_s4 }
0x1b39   :  { %v2301_v22 = vpop.permute.xlu0 %2300 }
0x1b3a   :  { %v2303_v26 = vsel %vm120_vm7, %v2301_v22, %v2188_v54 }
0x1b3b   :  { %2617 = vmatmul.mubr.msk.f32.vlgmr.msra.gmra.mxu0 %vm209_vm0, %v2303_v26 }
0x1b9d   :  { %v2398_v43 = vpop.permute.xlu0 %2397 }
0x1bfb   :  { %v2375_v5 = vpop.f32.mrf.mxu0 }
0x1bfc   :  { %v2380_v14 = vadd.f32 %v2375_v5, %v4168_v10 }
0x1bfd   :  { %v2377_v51 = vpop.f32.mrf.mxu0 }
0x1bfe   :  { %v2618_v50 = vmul.f32 -1.442695, %v2380_v14  ;;  %v2381_v61 = vadd.f32 %v2377_v51, %v4169_v53 }
0x1c00   :  { %2811 = vpow2.f32 %v2618_v50  ;;  %v2619_v0 = vmul.f32 -1.442695, %v2381_v61 }
0x1c02   :  { %2813 = vpow2.f32 %v2619_v0 }
0x1c03   :  { %2815 = vtanh.f32 %v2381_v61 }
0x1c0d   :  { %v2812_v48 = vpop.eup %2811 }
0x1c0e   :  { %v2385_v9 = vadd.f32 1.0, %v2812_v48 }
0x1c0f   :  { %v2814_v11 = vpop.eup %2813 }
0x1c10   :  { %v2392_v56 = vadd.f32 1.0, %v2814_v11  ;;  %v2816_v6 = vpop.eup %2815 }
0x1c12   :  { %2817 = vrcp.f32 %v2392_v56 }
0x1c13   :  { %2819 = vrcp.f32 %v2385_v9 }
0x1c1f   :  { %v2818_v17 = vpop.eup %2817 }
0x1c20   :  { %v2820_v16 = vpop.eup %2819  ;;  %v2395_v23 = vsel %vm101_vm11, %v2816_v6, %v2818_v17 }
0x1c21   :  { %v2401_v7 = vmul.f32 %v2820_v16, %v2395_v23  ;;  %v2400_v24 = vmul.f32 %v2820_v16, %v2398_v43 }
0x1c23   :  { %2403 = vrot.lane.b32.xlu1 %v2401_v7, %s2928_s4 }
0x1c95   :  { %v2404_v62 = vpop.permute.xlu1 %2403 }
0x1c96   :  { %v2406_v13 = vadd.f32 %v2404_v62, %v2400_v24 }
0x1c98   :  { %2821 = vtanh.f32 %v2406_v13  ;;  %2410 = vrot.lane.b32.xlu1 %v2406_v13, %s2928_s4 }
0x1ca5   :  { %v2822_v63 = vpop.eup %2821 }
0x1ca6   :  { %v2408_v57 = vmul.f32 %v2822_v63, %v2395_v23 }
0x1ca8   :  { %2415 = vrot.lane.b32.xlu0 %v2408_v57, %s2928_s4 }
0x1d0a   :  { %v2411_v47 = vpop.permute.xlu1 %2410 }
0x1d0b   :  { %v2413_v54 = vsel %vm122_vm8, %v2411_v47, %v2298_v60 }
0x1d0c   :  { %2512 = vrot.lane.b32.xlu0 %v2413_v54, %s2928_s4 }
0x1d1a   :  { %v2416_v1 = vpop.permute.xlu0 %2415 }
0x1d1b   :  { %v2418_v3 = vsel %vm122_vm8, %v2416_v1, %v2303_v26 }
0x1d1c   :  { %2620 = vmatmul.mubr.msk.f32.vlgmr.msra.gmra.mxu1 %vm209_vm0, %v2418_v3  ;;  %vm2535_vm0 = vcmask 261120  }
0x1ddc   :  { %v2490_v20 = vpop.f32.mrf.mxu1 }
0x1ddd   :  { %v2495_v25 = vadd.f32 %v2490_v20, %v4170_v21 }
0x1dde   :  { %v2492_v27 = vpop.f32.mrf.mxu1 }
0x1ddf   :  { %v2621_v29 = vmul.f32 -1.442695, %v2495_v25  ;;  %v2496_v33 = vadd.f32 %v2492_v27, %v1566_v30  ;;  %v2513_v30 = vpop.permute.xlu0 %2512 }
0x1de1   :  { %2823 = vpow2.f32 %v2621_v29  ;;  %v2622_v31 = vmul.f32 -1.442695, %v2496_v33 }
0x1de3   :  { %2825 = vpow2.f32 %v2622_v31 }
0x1de4   :  { %2827 = vtanh.f32 %v2496_v33 }
0x1dee   :  { %v2824_v35 = vpop.eup %2823 }
0x1def   :  { %v2500_v38 = vadd.f32 1.0, %v2824_v35 }
0x1df0   :  { %v2826_v36 = vpop.eup %2825 }
0x1df1   :  { %v2507_v39 = vadd.f32 1.0, %v2826_v36  ;;  %v2828_v28 = vpop.eup %2827 }
0x1df3   :  { %2829 = vrcp.f32 %v2507_v39 }
0x1df4   :  { %2831 = vrcp.f32 %v2500_v38 }
0x1e00   :  { %v2830_v8 = vpop.eup %2829 }
0x1e01   :  { %v2832_v55 = vpop.eup %2831  ;;  %v2510_v34 = vsel %vm101_vm11, %v2828_v28, %v2830_v8 }
0x1e02   :  { %v2516_v40 = vmul.f32 %v2832_v55, %v2510_v34  ;;  %v2515_v46 = vmul.f32 %v2832_v55, %v2513_v30 }
0x1e04   :  { %2518 = vrot.lane.b32.xlu1 %v2516_v40, %s2928_s4 }
0x1e08   :  { %1364 = vrot.lane.b32.xlu1 %v3733_v18, %s2937_s7 }
0x1e76   :  { %v2519_v19 = vpop.permute.xlu1 %2518 }
0x1e77   :  { %v2521_v41 = vadd.f32 %v2519_v19, %v2515_v46 }
0x1e79   :  { %2833 = vtanh.f32 %v2521_v41 }
0x1e7a   :  { %v1365_v2 = vpop.permute.xlu1 %1364 }
0x1e7b   :  { %v1367_v32 = vadd.f32 %v1365_v2, %v3733_v18 }
0x1e86   :  { %v2834_v42 = vpop.eup %2833 }
0x1e87   :  { %v2523_v12 = vmul.f32 %v2834_v42, %v2510_v34 }
0x1e89   :  { %2525 = vrot.lane.b32.xlu0 %v2523_v12, %s2928_s4 }
0x1efb   :  { %v2526_v15 = vpop.permute.xlu0 %2525 }
0x1efc   :  { %v2528_v44 = vsel %vm124_vm14, %v2526_v15, %v2418_v3 }
0x1efd   :  { %2531 = vrot.lane.b32.xlu0 %v2528_v44, %s2937_s7  ;;  %v2529_v4 = vadd.f32 %v2528_v44, %v1367_v32 }
0x1f6f   :  { %v2532_v37 = vpop.permute.xlu0 %2531 }
0x1f70   :  { %v2534_v58 = vadd.f32 %v2532_v37, %v2529_v4 }
0x1f72   :  { %2536 = vst.msk [vmem:[#allocation10] sm:$0xff] %vm2535_vm0, %v2534_v58 }
0x1f73   :  { %2906 = shalt.err (!%p2903_p5)
}
0x1f74   :  { %2546 = dma.vmem_to_hbm [thread:$0]  %s2544_s22, 128, %s4140_s8, [#allocation6]  }
0x1f75   :  { %2919 = dma.done.wait [#allocation6], 128  }
0x1f76   :  { %2920 = vsyncadd [#allocation6], 4294967168 }
0x1f77   :  { %2550 = vsyncpa [#allocation5], 1 }
0x1f78   :  { %2551 = vsyncpa [#allocation8], 1 }
0x1f79   :  { %2552 = vsyncpa [#allocation6], 1 }

</bundles_post_ra>
